<compile_context>
chip_gen: v5e
topology: v5e:2x2
jax: 0.10.0
libtpu: 0.0.40
codegen_flags: <defaults>
</compile_context>

<pallas_src>
import functools

import jax
import jax.numpy as jnp
from jax.experimental import pallas as pl
from jax.experimental.pallas import tpu as pltpu

# ---------------- small config (structure identical to the PyTorch module) ---
IMAGE_SIZE = 16      # PyTorch file uses 128; scaled down for the demo
N_CHANNELS = 3
NGF = 16             # PyTorch file uses 128
N_LATENT = 8         # PyTorch file uses 100
BATCH = 2

_TK_CAP = 512        # K tile for K-tiled matmuls (real-scale conv layers)


def _round_up(x, m):
    return (x + m - 1) // m * m


def _vmem_limit_bytes():
    """64 MiB scoped VMEM on v5e/v6e (128 MiB physical), 32 MiB on v7x."""
    try:
        phys = pltpu.get_tpu_info().vmem_capacity_bytes
        return int(min(64 * 2 ** 20, max(32 * 2 ** 20, phys // 2)))
    except Exception:
        return 32 * 2 ** 20


_VMEM_LIMIT = _vmem_limit_bytes()


def _pick_tm(m, cap=512):
    """One max-size row tile.  v5e/v6e have a single TensorCore, so splitting
    the 'parallel' row axis only adds grid-step overhead; at real scale M is
    large enough that v7x's two cores still get many parallel tiles."""
    return min(_round_up(max(m, 1), 8), cap)


def _apply_tile(mp, cap=512):
    """Largest tile (multiple of 8) that divides the padded row count."""
    t = min(mp, cap)
    while mp % t:
        t -= 8
        if t <= 0:
            return mp
    return t


# ----------------------------- matmul kernels --------------------------------
def _mm_epilogue(acc, b_ref, out_refs, act, slope, stats, m_valid):
    """Bias + activation + store; optionally emit per-tile BN partial stats."""
    out = acc + b_ref[...]                                  # (tm,Np) + (1,Np)
    if act == "leaky_relu":
        out = jnp.where(out >= 0, out, slope * out)
    elif act == "tanh":
        out = jnp.tanh(out)
    o_ref = out_refs[0]
    o_ref[...] = out.astype(o_ref.dtype)
    if stats:
        s_ref = out_refs[1]
        xm = out
        if m_valid is not None:                             # mask padded rows
            tm = out.shape[0]
            row = (jax.lax.broadcasted_iota(jnp.int32, (tm, 1), 0)
                   + pl.program_id(0) * tm)
            xm = jnp.where(row < m_valid, out, 0.0)
        st = jnp.concatenate([xm, xm * xm], axis=-1)        # (tm, 2*Np)
        st = jnp.sum(st, axis=0, keepdims=True)             # (1, 2*Np)
        s_ref[...] = jnp.broadcast_to(st, (8, st.shape[-1]))[None]


def _mm_kernel(a_ref, w_ref, b_ref, *rest, act, slope, stats, m_valid, multi_k):
    """grid=(Mi, Ki).  Single-K layers skip the f32 accumulator scratch."""
    if multi_k:
        acc_ref, out_refs = rest[-1], rest[:-1]
        k = pl.program_id(1)

        @pl.when(k == 0)
        def _():
            acc_ref[...] = jnp.zeros_like(acc_ref)

        acc_ref[...] += jnp.dot(a_ref[...], w_ref[...],
                                preferred_element_type=jnp.float32)

        @pl.when(k == pl.num_programs(1) - 1)
        def _():
            _mm_epilogue(acc_ref[...], b_ref, out_refs, act, slope, stats,
                         m_valid)
    else:
        out = jnp.dot(a_ref[...], w_ref[...],
                      preferred_element_type=jnp.float32)
        _mm_epilogue(out, b_ref, rest, act, slope, stats, m_valid)


def pallas_matmul(a, w_p, b_row=None, *, act="none", slope=0.01, stats=False,
                  out_dtype=jnp.bfloat16):
    """(M,K) @ (K,Np) with fused bias/activation and optional fused BN stats.
    `w_p` is already padded to a lane-dense Np and cast to bf16 (prepare_params).
    Returns the PADDED (Mp, Np) output (and (nm, 8, 2*Np) stats if requested)."""
    M, K = a.shape
    Kw, Np = w_p.shape
    assert K == Kw and Np % 128 == 0
    tm = _pick_tm(M)
    Mp = _round_up(M, tm)
    tk = K if K <= _TK_CAP else _TK_CAP
    Kp = _round_up(K, tk)
    multi_k = (Kp // tk) > 1
    nm = Mp // tm

    a_p = a.astype(jnp.bfloat16)
    if Mp != M or Kp != K:
        a_p = jnp.pad(a_p, ((0, Mp - M), (0, Kp - K)))
    if Kp != K:
        w_p = jnp.pad(w_p, ((0, Kp - K), (0, 0)))
    if b_row is None:
        b_row = jnp.zeros((1, Np), jnp.float32)

    m_valid = None if (not stats or M == Mp) else M
    kernel = functools.partial(_mm_kernel, act=act, slope=slope, stats=stats,
                               m_valid=m_valid, multi_k=multi_k)

    if multi_k:
        # Deeper weight streaming hides the exposed weight DMA on v5e/v6e.
        w_spec = pl.BlockSpec((tk, Np), lambda i, k: (k, 0),
                              pipeline_mode=pl.Buffered(3))
    else:
        w_spec = pl.BlockSpec((tk, Np), lambda i, k: (k, 0))

    out_shape = jax.ShapeDtypeStruct((Mp, Np), out_dtype)
    out_spec = pl.BlockSpec((tm, Np), lambda i, k: (i, 0))
    if stats:
        out_shape = (out_shape,
                     jax.ShapeDtypeStruct((nm, 8, 2 * Np), jnp.float32))
        out_spec = (out_spec,
                    pl.BlockSpec((1, 8, 2 * Np), lambda i, k: (i, 0, 0)))
    scratch = [pltpu.VMEM((tm, Np), jnp.float32)] if multi_k else []

    return pl.pallas_call(
        kernel,
        out_shape=out_shape,
        grid_spec=pltpu.PrefetchScalarGridSpec(
            num_scalar_prefetch=0,
            grid=(nm, Kp // tk),
            in_specs=[pl.BlockSpec((tm, tk), lambda i, k: (i, k)),
                      w_spec,
                      pl.BlockSpec((1, Np), lambda i, k: (0, 0))],
            out_specs=out_spec,
            scratch_shapes=scratch),
        compiler_params=pltpu.CompilerParams(
            dimension_semantics=("parallel", "arbitrary"),
            vmem_limit_bytes=_VMEM_LIMIT),
    )(a_p, w_p, b_row)


def _bmm_epilogue(out, out_refs, stats):
    o_ref = out_refs[0]
    o_ref[...] = out[None].astype(o_ref.dtype)
    if stats:
        s_ref = out_refs[1]
        st = jnp.concatenate([out, out * out], axis=-1)     # (tm, 2*Np)
        st = jnp.sum(st, axis=0, keepdims=True)             # (1, 2*Np)
        s_ref[...] = jnp.broadcast_to(st, (8, st.shape[-1]))[None, None]


def _bmm_kernel(a_ref, w_ref, *rest, stats, multi_k):
    """Phase-batched (bias-free) matmul: grid=(P, Mi, Ki)."""
    if multi_k:
        acc_ref, out_refs = rest[-1], rest[:-1]
        k = pl.program_id(2)

        @pl.when(k == 0)
        def _():
            acc_ref[...] = jnp.zeros_like(acc_ref)

        acc_ref[...] += jnp.dot(a_ref[0], w_ref[0],
                                preferred_element_type=jnp.float32)

        @pl.when(k == pl.num_programs(2) - 1)
        def _():
            _bmm_epilogue(acc_ref[...], out_refs, stats)
    else:
        out = jnp.dot(a_ref[0], w_ref[0], preferred_element_type=jnp.float32)
        _bmm_epilogue(out, rest, stats)


def pallas_batched_matmul(a, w_p, *, stats=False, out_dtype=jnp.bfloat16):
    """(P,M,K) @ (P,K,Np) -> (P,Mp,Np): the 4 convT phases in one pallas_call.
    No bias (ConvT layers are bias=False), padded rows are exact zeros so the
    fused BN stats need no row mask."""
    P, M, K = a.shape
    _, Kw, Np = w_p.shape
    assert K == Kw and Np % 128 == 0
    tm = _pick_tm(M)
    Mp = _round_up(M, tm)
    tk = K if K <= _TK_CAP else _TK_CAP
    Kp = _round_up(K, tk)
    multi_k = (Kp // tk) > 1
    nm = Mp // tm

    a_p = a.astype(jnp.bfloat16)
    if Mp != M or Kp != K:
        a_p = jnp.pad(a_p, ((0, 0), (0, Mp - M), (0, Kp - K)))
    if Kp != K:
        w_p = jnp.pad(w_p, ((0, 0), (0, Kp - K), (0, 0)))

    kernel = functools.partial(_bmm_kernel, stats=stats, multi_k=multi_k)
    out_shape = jax.ShapeDtypeStruct((P, Mp, Np), out_dtype)
    out_spec = pl.BlockSpec((1, tm, Np), lambda p, i, k: (p, i, 0))
    if stats:
        out_shape = (out_shape,
                     jax.ShapeDtypeStruct((P, nm, 8, 2 * Np), jnp.float32))
        out_spec = (out_spec,
                    pl.BlockSpec((1, 1, 8, 2 * Np),
                                 lambda p, i, k: (p, i, 0, 0)))
    scratch = [pltpu.VMEM((tm, Np), jnp.float32)] if multi_k else []

    return pl.pallas_call(
        kernel,
        out_shape=out_shape,
        grid_spec=pltpu.PrefetchScalarGridSpec(
            num_scalar_prefetch=0,
            grid=(P, nm, Kp // tk),
            in_specs=[pl.BlockSpec((1, tm, tk), lambda p, i, k: (p, i, k)),
                      pl.BlockSpec((1, tk, Np), lambda p, i, k: (p, k, 0))],
            out_specs=out_spec,
            scratch_shapes=scratch),
        compiler_params=pltpu.CompilerParams(
            dimension_semantics=("parallel", "parallel", "arbitrary"),
            vmem_limit_bytes=_VMEM_LIMIT),
    )(a_p, w_p)


# --------------------------- BatchNorm apply kernel ---------------------------
def _bn_apply_kernel(x_ref, sc_ref, sh_ref, o_ref, *, slope):
    y = x_ref[...].astype(jnp.float32) * sc_ref[...] + sh_ref[...]
    o_ref[...] = jnp.where(y >= 0, y, slope * y).astype(o_ref.dtype)


def bn_lrelu_apply(x_pad, scale_row, shift_row, slope, out_dtype=jnp.bfloat16):
    """Per-column affine + LeakyReLU on a padded lane-dense (Mp, Np) slab.
    bf16 in, f32 math, bf16 out (the only consumer is a bf16 matmul)."""
    Mp, Np = x_pad.shape
    tm = _apply_tile(Mp)
    return pl.pallas_call(
        functools.partial(_bn_apply_kernel, slope=slope),
        out_shape=jax.ShapeDtypeStruct((Mp, Np), out_dtype),
        grid_spec=pltpu.PrefetchScalarGridSpec(
            num_scalar_prefetch=0, grid=(Mp // tm,),
            in_specs=[pl.BlockSpec((tm, Np), lambda i: (i, 0)),
                      pl.BlockSpec((1, Np), lambda i: (0, 0)),
                      pl.BlockSpec((1, Np), lambda i: (0, 0))],
            out_specs=pl.BlockSpec((tm, Np), lambda i: (i, 0))),
        compiler_params=pltpu.CompilerParams(
            dimension_semantics=("parallel",),
            vmem_limit_bytes=_VMEM_LIMIT),
    )(x_pad, scale_row, shift_row)


# ----------------------- tiny JAX-side BN finishing helpers ------------------
def _reduce_stats(st):
    """(..., 8, 2*Np) fused partials -> (col_sum (Np,), col_sumsq (Np,))."""
    s = st[..., 0, :]                        # the 8 rows are broadcast copies
    s = s.reshape(-1, s.shape[-1]).sum(axis=0)
    half = s.shape[0] // 2
    return s[:half], s[half:]


def _bn_affine(ssum, ssq, count, gamma, beta, eps=1e-5):
    # NOTE: E[x^2]-E[x]^2 in f32; fine at these scales (clamped); a two-pass
    # scheme would be preferable for very large N*H*W.
    mean = ssum / count
    var = jnp.maximum(ssq / count - mean * mean, 0.0)       # biased variance
    scale = gamma.astype(jnp.float32) * jax.lax.rsqrt(var + eps)
    shift = beta.astype(jnp.float32) - mean * scale
    return scale, shift


def _row(v, np_):
    v = v.astype(jnp.float32)
    return jnp.pad(v, (0, np_ - v.shape[0])).reshape(1, np_)


# ------------------------- conv glue (patch gather in XLA) -------------------
def _im2col(x_padded, k, Ho, Wo):
    """(N, Hp, Wp, C) -> (N*Ho*Wo, k*k*C) patches, stride 1 (bf16 in -> bf16).
    # TODO(synk): replace with an implicit-GEMM conv kernel (shifted windows
    # from a halo'd VMEM tile / extra K grid steps per tap) so the k*k-times
    # larger patch matrix is never materialized in HBM at PyTorch scale.
    """
    N, _, _, C = x_padded.shape
    cols = []
    for i in range(k):
        for j in range(k):
            cols.append(x_padded[:, i:i + Ho, j:j + Wo, :])
    patches = jnp.stack(cols, axis=3)                       # (N,Ho,Wo,k*k,C)
    return patches.reshape(N * Ho * Wo, k * k * C)


def conv3x3(x_nhwc, w_p, bias, cout, *, act="none", slope=0.01,
            out_dtype=jnp.bfloat16):
    """Conv2d(k=3,s=1,p=1) with fused bias+activation (no BN)."""
    N, H, W, _ = x_nhwc.shape
    Np = w_p.shape[1]
    xp = jnp.pad(x_nhwc, ((0, 0), (1, 1), (1, 1), (0, 0)))
    patches = _im2col(xp, 3, H, W)
    b_row = _row(bias, Np) if bias is not None else None
    out = pallas_matmul(patches, w_p, b_row, act=act, slope=slope,
                        out_dtype=out_dtype)
    return out[:N * H * W, :cout].reshape(N, H, W, cout)


def conv3x3_bn_lrelu(x_nhwc, w_p, bias, gamma, beta, slope):
    """Conv2d(k3,s1,p1) -> BN -> LReLU with BN stats fused into the matmul."""
    N, H, W, _ = x_nhwc.shape
    C = gamma.shape[0]
    Np = w_p.shape[1]
    xp = jnp.pad(x_nhwc, ((0, 0), (1, 1), (1, 1), (0, 0)))
    patches = _im2col(xp, 3, H, W)
    res = pallas_matmul(patches, w_p, _row(bias, Np), act="none", stats=True,
                        out_dtype=jnp.bfloat16)
    out, st = res[0], res[1]
    ssum, ssq = _reduce_stats(st)
    scale, shift = _bn_affine(ssum[:C], ssq[:C], N * H * W, gamma, beta)
    out = bn_lrelu_apply(out, _row(scale, Np), _row(shift, Np), slope)
    return out[:N * H * W, :C].reshape(N, H, W, C)


def conv_transpose_bn_lrelu(x_nhwc, w4_p, gamma, beta, slope):
    """ConvTranspose2d(k4,s2,p1,bias=False) -> BN -> LReLU.
    4-phase sub-pixel decomposition (one 2x2 conv per output parity) in ONE
    phase-batched pallas_call with fused BN stats.  BN+LReLU runs on the
    phase-major output; the parity interleave is deferred into the next conv's
    patch gather (no standalone full-slab transpose pass)."""
    N, H, W, _ = x_nhwc.shape
    C = gamma.shape[0]
    Np = w4_p.shape[-1]
    M = N * H * W
    xp = jnp.pad(x_nhwc, ((0, 0), (1, 1), (1, 1), (0, 0)))
    patch_list = []
    for py in (0, 1):
        for px in (0, 1):
            xpp = xp[:, py:py + H + 1, px:px + W + 1, :]
            patch_list.append(_im2col(xpp, 2, H, W))        # (M, 4*Cin)
    patches = jnp.stack(patch_list, axis=0)                 # (4, M, 4*Cin)

    res = pallas_batched_matmul(patches, w4_p, stats=True)  # bf16 out
    out, st = res[0], res[1]                                # (4, Mp, Np)
    Mp = out.shape[1]
    ssum, ssq = _reduce_stats(st)
    scale, shift = _bn_affine(ssum[:C], ssq[:C], 4 * M, gamma, beta)
    flat = bn_lrelu_apply(out.reshape(4 * Mp, Np),
                          _row(scale, Np), _row(shift, Np), slope)
    out = flat.reshape(4, Mp, Np)[:, :M, :C]
    # Lazy parity interleave to (N, 2H, 2W, C): fuses into the next conv's
    # patch-matrix gather rather than a standalone HBM permutation pass.
    out = out.reshape(2, 2, N, H, W, C).transpose(2, 3, 0, 4, 1, 5)
    return out.reshape(N, 2 * H, 2 * W, C)


def convt1_head(z2d, p):
    """ConvT(k4,s1,p0) on a 1x1 input (== one matmul, spatial-major columns)
    -> BN -> LReLU -> Conv3x3 -> BN -> LReLU."""
    N = z2d.shape[0]
    C = p["bn0_g"].shape[0]
    Np = p["w0"].shape[1]
    res = pallas_matmul(z2d, p["w0"], None, act="none", stats=True,
                        out_dtype=jnp.bfloat16)
    out, st = res[0], res[1]                                # (Mp, Np)
    ssum, ssq = _reduce_stats(st)
    # columns are (spatial, channel) -> reduce the 16 spatial groups per channel
    ssum_c = ssum[:16 * C].reshape(16, C).sum(axis=0)
    ssq_c = ssq[:16 * C].reshape(16, C).sum(axis=0)
    scale, shift = _bn_affine(ssum_c, ssq_c, 16 * N, p["bn0_g"], p["bn0_b"])
    out = bn_lrelu_apply(out, _row(jnp.tile(scale, 16), Np),
                         _row(jnp.tile(shift, 16), Np), slope=0.01)
    y = out[:N, :16 * C].reshape(N, 4, 4, C)                # NHWC, no transpose
    return conv3x3_bn_lrelu(y, p["wc"], p["bc"], p["bn1_g"], p["bn1_b"],
                            slope=0.01)


# ----------------------------- parameters ------------------------------------
def init_params(key, n_latent, ngf, n_channels, image_size):
    curr, cnt = 4, 0
    while curr < image_size:
        curr *= 2
        cnt += 1
    mult = 2 ** (cnt - 1)

    keys = iter(jax.random.split(key, 128))

    def nrm(shape, scale=0.05):
        return scale * jax.random.normal(next(keys), shape, jnp.float32)

    c1 = ngf * mult
    params = {
        "convt1": dict(
            wt=nrm((n_latent, c1, 4, 4)),                   # ConvT (Cin,Cout,4,4)
            bn0_g=jnp.ones((c1,), jnp.float32), bn0_b=jnp.zeros((c1,), jnp.float32),
            wc=nrm((c1, c1, 3, 3)), bc=nrm((c1,)),          # Conv2d (Cout,Cin,3,3)+bias
            bn1_g=jnp.ones((c1,), jnp.float32), bn1_b=jnp.zeros((c1,), jnp.float32)),
        "main": [],
    }
    while mult > 1:
        cin, cout = ngf * mult, ngf * (mult // 2)
        params["main"].append(dict(
            wt=nrm((cin, cout, 4, 4)),
            bn_g=jnp.ones((cout,), jnp.float32), bn_b=jnp.zeros((cout,), jnp.float32),
            wc=nrm((cout, cout, 3, 3)), bc=nrm((cout,))))
        mult //= 2
    params["final"] = dict(
        wt=nrm((ngf, ngf, 4, 4)),
        bn_g=jnp.ones((ngf,), jnp.float32), bn_b=jnp.zeros((ngf,), jnp.float32),
        wc=nrm((n_channels, ngf, 3, 3)))                    # bias=False
    return params


def _conv3x3_weight(w_pt):
    """(Cout,Cin,3,3) -> padded bf16 (9*Cin, Np) matching the im2col tap order."""
    Cout, Cin = w_pt.shape[:2]
    w = jnp.transpose(w_pt, (2, 3, 1, 0)).reshape(9 * Cin, Cout)
    np_ = _round_up(Cout, 128)
    return jnp.pad(w, ((0, 0), (0, np_ - Cout))).astype(jnp.bfloat16)


def _convt_phase_weights(w_pt):
    """(Cin,Cout,4,4) -> padded bf16 (4, 4*Cin, Np): one 2x2 kernel per output
    parity (flip, then stride-2 subsample at offset (py, px))."""
    Cin, Cout = w_pt.shape[:2]
    wf = w_pt[:, :, ::-1, ::-1]
    np_ = _round_up(Cout, 128)
    phases = []
    for py in (0, 1):
        for px in (0, 1):
            sub = wf[:, :, py::2, px::2]                    # (Cin,Cout,2,2)
            ph = jnp.transpose(sub, (2, 3, 0, 1)).reshape(4 * Cin, Cout)
            phases.append(jnp.pad(ph, ((0, 0), (0, np_ - Cout))))
    return jnp.stack(phases, axis=0).astype(jnp.bfloat16)


def _convt1_weight(wt):
    """(Cin,Cout,4,4) -> padded bf16 (Cin, 16*Cout) with SPATIAL-MAJOR columns
    so the output reshapes straight to NHWC (no transpose in the forward)."""
    Cin, Cout = wt.shape[:2]
    w = jnp.transpose(wt, (0, 2, 3, 1)).reshape(Cin, 16 * Cout)
    np_ = _round_up(16 * Cout, 128)
    return jnp.pad(w, ((0, 0), (0, np_ - w.shape[1]))).astype(jnp.bfloat16)


def prepare_params(params):
    """One-time transform into padded, bf16, matmul-ready weight layout."""
    p = params["convt1"]
    return {
        "convt1": dict(
            w0=_convt1_weight(p["wt"]),
            bn0_g=p["bn0_g"], bn0_b=p["bn0_b"],
            wc=_conv3x3_weight(p["wc"]), bc=p["bc"],
            bn1_g=p["bn1_g"], bn1_b=p["bn1_b"]),
        "main": [dict(wt4=_convt_phase_weights(b["wt"]),
                      bn_g=b["bn_g"], bn_b=b["bn_b"],
                      wc=_conv3x3_weight(b["wc"]), bc=b["bc"])
                 for b in params["main"]],
        "final": dict(wt4=_convt_phase_weights(params["final"]["wt"]),
                      bn_g=params["final"]["bn_g"],
                      bn_b=params["final"]["bn_b"],
                      wc=_conv3x3_weight(params["final"]["wc"])),
    }


# ------------------------------- forward --------------------------------------
def generator_forward(z_nchw, prep):
    N = z_nchw.shape[0]
    z2d = z_nchw.reshape(N, -1).astype(jnp.bfloat16)        # (N, n_latent)

    # convt1 block: ConvT(k4,s1,p0) -> BN -> LReLU -> Conv3x3 -> BN -> LReLU
    y = convt1_head(z2d, prep["convt1"])

    # upsample blocks: ConvT(k4,s2,p1) -> BN -> LReLU -> Conv3x3 (+fused LReLU)
    for blk in prep["main"]:
        y = conv_transpose_bn_lrelu(y, blk["wt4"], blk["bn_g"], blk["bn_b"],
                                    slope=0.01)
        y = conv3x3(y, blk["wc"], blk["bc"], blk["bc"].shape[0],
                    act="leaky_relu", slope=0.01, out_dtype=jnp.bfloat16)

    # final block: ConvT -> BN -> LReLU(0.2) -> Conv3x3(no bias) -> Tanh
    pf = prep["final"]
    y = conv_transpose_bn_lrelu(y, pf["wt4"], pf["bn_g"], pf["bn_b"], slope=0.2)
    y = conv3x3(y, pf["wc"], None, N_CHANNELS, act="tanh", slope=0.0,
                out_dtype=jnp.float32)
    return y.transpose(0, 3, 1, 2)                          # back to NCHW


# --------------------------------- main ---------------------------------------
if __name__ == "__main__":
    key = jax.random.PRNGKey(0)
    kz, kp = jax.random.split(key)
    z = jax.random.normal(kz, (BATCH, N_LATENT, 1, 1), jnp.float32)
    params = init_params(kp, N_LATENT, NGF, N_CHANNELS, IMAGE_SIZE)
    prep = prepare_params(params)            # one-time weight layout transform

    fwd = jax.jit(generator_forward)
    out = fwd(z, prep)
    jax.block_until_ready(out)

    assert out.shape == (BATCH, N_CHANNELS, IMAGE_SIZE, IMAGE_SIZE), out.shape
    assert bool(jnp.all(jnp.isfinite(out)))
    assert bool(jnp.all(jnp.abs(out) <= 1.0 + 1e-5))        # tanh range
    print("KERNEL_OK")
</pallas_src>

<mosaic_0001>
module attributes {stable_mosaic.version = 11 : i64} {
  func.func @_mm_kernel(%arg0: i32, %arg1: i32, %arg2: memref<8x8xbf16, #tpu.memory_space<vmem>>, %arg3: memref<8x512xbf16, #tpu.memory_space<vmem>>, %arg4: memref<1x512xf32, #tpu.memory_space<vmem>>, %arg5: memref<8x512xbf16, #tpu.memory_space<vmem>>, %arg6: memref<1x8x1024xf32, #tpu.memory_space<vmem>>) attributes {dimension_semantics = [#tpu.dimension_semantics<parallel>, #tpu.dimension_semantics<arbitrary>], iteration_bounds = array<i64: 1, 1>, scalar_prefetch = 0 : i64, scratch_operands = 0 : i64, tpu.core_type = #tpu.core_type<tc>, window_params = [{transform_indices = @transform_0, window_bounds = array<i64: 8, 8>}, {transform_indices = @transform_1, window_bounds = array<i64: 8, 512>}, {pipeline_mode = #tpu.pipeline_mode<synchronous>, transform_indices = @transform_2, window_bounds = array<i64: 1, 512>}, {transform_indices = @transform_3, window_bounds = array<i64: 8, 512>}, {transform_indices = @transform_4, window_bounds = array<i64: 1, 8, 1024>}]} {
    %c0 = arith.constant 0 : index
    %c0_0 = arith.constant 0 : index
    %0 = vector.load %arg2[%c0, %c0_0] : memref<8x8xbf16, #tpu.memory_space<vmem>>, vector<8x8xbf16>
    %c0_1 = arith.constant 0 : index
    %c0_2 = arith.constant 0 : index
    %1 = vector.load %arg3[%c0_1, %c0_2] : memref<8x512xbf16, #tpu.memory_space<vmem>>, vector<8x512xbf16>
    %cst = arith.constant dense<0.000000e+00> : vector<8x512xf32>
    %2 = tpu.matmul %0, %1, %cst {dimension_numbers = #tpu.dot_dimension_numbers<[1], [0], [0], [1], [0, 0, 1, 1], [], []>} : vector<8x8xbf16>, vector<8x512xbf16>, vector<8x512xf32> -> vector<8x512xf32>
    %c0_3 = arith.constant 0 : index
    %c0_4 = arith.constant 0 : index
    %3 = vector.load %arg4[%c0_3, %c0_4] : memref<1x512xf32, #tpu.memory_space<vmem>>, vector<1x512xf32>
    %4 = vector.broadcast %3 : vector<1x512xf32> to vector<8x512xf32>
    %5 = arith.addf %2, %4 : vector<8x512xf32>
    %6 = arith.truncf %5 : vector<8x512xf32> to vector<8x512xbf16>
    %c0_5 = arith.constant 0 : index
    %c0_6 = arith.constant 0 : index
    %7 = vector.load %arg5[%c0_5, %c0_6] : memref<8x512xbf16, #tpu.memory_space<vmem>>, vector<8x512xbf16>
    tpu.vector_store %arg5[%c0_5, %c0_6], %6 {strides = array<i32>} : memref<8x512xbf16, #tpu.memory_space<vmem>>, vector<8x512xbf16>,
    %8 = tpu.iota {dimensions = array<i32: 0>} : vector<8x1xi32>
    %c8_i32 = arith.constant 8 : i32
    %9 = arith.muli %arg0, %c8_i32 : i32
    %10 = vector.broadcast %9 : i32 to vector<8x1xi32>
    %11 = arith.addi %8, %10 : vector<8x1xi32>
    %c2_i32 = arith.constant 2 : i32
    %12 = vector.broadcast %c2_i32 : i32 to vector<8x1xi32>
    %13 = arith.cmpi slt, %11, %12 : vector<8x1xi32>
    %cst_7 = arith.constant 0.000000e+00 : f32
    %14 = vector.shape_cast %13 : vector<8x1xi1> to vector<8x1xi1>
    %15 = vector.broadcast %14 : vector<8x1xi1> to vector<8x512xi1>
    %16 = vector.broadcast %cst_7 : f32 to vector<8x512xf32>
    %17 = arith.select %15, %5, %16 : vector<8x512xi1>, vector<8x512xf32>
    %18 = arith.mulf %17, %17 : vector<8x512xf32>
    %19 = tpu.concatenate %17, %18 in 1 : vector<8x512xf32>, vector<8x512xf32> -> vector<8x1024xf32>
    %cst_8 = arith.constant dense<0.000000e+00> : vector<1024xf32>
    %20 = vector.multi_reduction <add>, %19, %cst_8 [0] : vector<8x1024xf32> to vector<1024xf32>
    %21 = vector.shape_cast %20 : vector<1024xf32> to vector<1x1024xf32>
    %22 = vector.shape_cast %21 : vector<1x1024xf32> to vector<1x1024xf32>
    %23 = vector.broadcast %22 : vector<1x1024xf32> to vector<8x1024xf32>
    %24 = vector.shape_cast %23 : vector<8x1024xf32> to vector<1x8x1024xf32>
    %c0_9 = arith.constant 0 : index
    %c0_10 = arith.constant 0 : index
    %c0_11 = arith.constant 0 : index
    %25 = vector.load %arg6[%c0_9, %c0_10, %c0_11] : memref<1x8x1024xf32, #tpu.memory_space<vmem>>, vector<1x8x1024xf32>
    tpu.vector_store %arg6[%c0_9, %c0_10, %c0_11], %24 {strides = array<i32>} : memref<1x8x1024xf32, #tpu.memory_space<vmem>>, vector<1x8x1024xf32>,
    return
  }
  func.func @transform_0(%arg0: i32, %arg1: i32) -> (i32, i32) {
    %c0_i32 = arith.constant 0 : i32
    return %arg0, %arg1 : i32, i32
  }
  func.func @transform_1(%arg0: i32, %arg1: i32) -> (i32, i32) {
    %c0_i32 = arith.constant 0 : i32
    %c0_i32_0 = arith.constant 0 : i32
    return %arg1, %c0_i32 : i32, i32
  }
  func.func @transform_2(%arg0: i32, %arg1: i32) -> (i32, i32) {
    %c0_i32 = arith.constant 0 : i32
    %c0_i32_0 = arith.constant 0 : i32
    %c0_i32_1 = arith.constant 0 : i32
    return %c0_i32, %c0_i32_0 : i32, i32
  }
  func.func @transform_3(%arg0: i32, %arg1: i32) -> (i32, i32) {
    %c0_i32 = arith.constant 0 : i32
    %c0_i32_0 = arith.constant 0 : i32
    return %arg0, %c0_i32 : i32, i32
  }
  func.func @transform_4(%arg0: i32, %arg1: i32) -> (i32, i32, i32) {
    %c0_i32 = arith.constant 0 : i32
    %c0_i32_0 = arith.constant 0 : i32
    %c0_i32_1 = arith.constant 0 : i32
    return %arg0, %c0_i32, %c0_i32_0 : i32, i32, i32
  }
}

module attributes {stable_mosaic.version = 11 : i64} {
  func.func @_bn_apply_kernel(%arg0: i32, %arg1: memref<8x512xbf16, #tpu.memory_space<vmem>>, %arg2: memref<1x512xf32, #tpu.memory_space<vmem>>, %arg3: memref<1x512xf32, #tpu.memory_space<vmem>>, %arg4: memref<8x512xbf16, #tpu.memory_space<vmem>>) attributes {dimension_semantics = [#tpu.dimension_semantics<parallel>], iteration_bounds = array<i64: 1>, scalar_prefetch = 0 : i64, scratch_operands = 0 : i64, tpu.core_type = #tpu.core_type<tc>, window_params = [{transform_indices = @transform_0, window_bounds = array<i64: 8, 512>}, {pipeline_mode = #tpu.pipeline_mode<synchronous>, transform_indices = @transform_1, window_bounds = array<i64: 1, 512>}, {pipeline_mode = #tpu.pipeline_mode<synchronous>, transform_indices = @transform_2, window_bounds = array<i64: 1, 512>}, {transform_indices = @transform_3, window_bounds = array<i64: 8, 512>}]} {
    %c0 = arith.constant 0 : index
    %c0_0 = arith.constant 0 : index
    %0 = vector.load %arg1[%c0, %c0_0] : memref<8x512xbf16, #tpu.memory_space<vmem>>, vector<8x512xbf16>
    %1 = arith.extf %0 : vector<8x512xbf16> to vector<8x512xf32>
    %c0_1 = arith.constant 0 : index
    %c0_2 = arith.constant 0 : index
    %2 = vector.load %arg2[%c0_1, %c0_2] : memref<1x512xf32, #tpu.memory_space<vmem>>, vector<1x512xf32>
    %3 = vector.broadcast %2 : vector<1x512xf32> to vector<8x512xf32>
    %4 = arith.mulf %1, %3 : vector<8x512xf32>
    %c0_3 = arith.constant 0 : index
    %c0_4 = arith.constant 0 : index
    %5 = vector.load %arg3[%c0_3, %c0_4] : memref<1x512xf32, #tpu.memory_space<vmem>>, vector<1x512xf32>
    %6 = vector.broadcast %5 : vector<1x512xf32> to vector<8x512xf32>
    %7 = arith.addf %4, %6 : vector<8x512xf32>
    %cst = arith.constant 0.000000e+00 : f32
    %8 = vector.broadcast %cst : f32 to vector<8x512xf32>
    %9 = arith.cmpf oge, %7, %8 : vector<8x512xf32>
    %cst_5 = arith.constant 0.00999999977 : f32
    %10 = vector.broadcast %cst_5 : f32 to vector<8x512xf32>
    %11 = arith.mulf %10, %7 : vector<8x512xf32>
    %12 = arith.select %9, %7, %11 : vector<8x512xi1>, vector<8x512xf32>
    %13 = arith.truncf %12 : vector<8x512xf32> to vector<8x512xbf16>
    %c0_6 = arith.constant 0 : index
    %c0_7 = arith.constant 0 : index
    %14 = vector.load %arg4[%c0_6, %c0_7] : memref<8x512xbf16, #tpu.memory_space<vmem>>, vector<8x512xbf16>
    tpu.vector_store %arg4[%c0_6, %c0_7], %13 {strides = array<i32>} : memref<8x512xbf16, #tpu.memory_space<vmem>>, vector<8x512xbf16>,
    return
  }
  func.func @transform_0(%arg0: i32) -> (i32, i32) {
    %c0_i32 = arith.constant 0 : i32
    %c0_i32_0 = arith.constant 0 : i32
    return %arg0, %c0_i32 : i32, i32
  }
  func.func @transform_1(%arg0: i32) -> (i32, i32) {
    %c0_i32 = arith.constant 0 : i32
    %c0_i32_0 = arith.constant 0 : i32
    %c0_i32_1 = arith.constant 0 : i32
    return %c0_i32, %c0_i32_0 : i32, i32
  }
  func.func @transform_2(%arg0: i32) -> (i32, i32) {
    %c0_i32 = arith.constant 0 : i32
    %c0_i32_0 = arith.constant 0 : i32
    %c0_i32_1 = arith.constant 0 : i32
    return %c0_i32, %c0_i32_0 : i32, i32
  }
  func.func @transform_3(%arg0: i32) -> (i32, i32) {
    %c0_i32 = arith.constant 0 : i32
    %c0_i32_0 = arith.constant 0 : i32
    return %arg0, %c0_i32 : i32, i32
  }
}

module attributes {stable_mosaic.version = 11 : i64} {
  func.func @_mm_kernel(%arg0: i32, %arg1: i32, %arg2: memref<32x288xbf16, #tpu.memory_space<vmem>>, %arg3: memref<288x128xbf16, #tpu.memory_space<vmem>>, %arg4: memref<1x128xf32, #tpu.memory_space<vmem>>, %arg5: memref<32x128xbf16, #tpu.memory_space<vmem>>, %arg6: memref<1x8x256xf32, #tpu.memory_space<vmem>>) attributes {dimension_semantics = [#tpu.dimension_semantics<parallel>, #tpu.dimension_semantics<arbitrary>], iteration_bounds = array<i64: 1, 1>, scalar_prefetch = 0 : i64, scratch_operands = 0 : i64, tpu.core_type = #tpu.core_type<tc>, window_params = [{transform_indices = @transform_0, window_bounds = array<i64: 32, 288>}, {transform_indices = @transform_1, window_bounds = array<i64: 288, 128>}, {pipeline_mode = #tpu.pipeline_mode<synchronous>, transform_indices = @transform_2, window_bounds = array<i64: 1, 128>}, {transform_indices = @transform_3, window_bounds = array<i64: 32, 128>}, {transform_indices = @transform_4, window_bounds = array<i64: 1, 8, 256>}]} {
    %c0 = arith.constant 0 : index
    %c0_0 = arith.constant 0 : index
    %0 = vector.load %arg2[%c0, %c0_0] : memref<32x288xbf16, #tpu.memory_space<vmem>>, vector<32x288xbf16>
    %c0_1 = arith.constant 0 : index
    %c0_2 = arith.constant 0 : index
    %1 = vector.load %arg3[%c0_1, %c0_2] : memref<288x128xbf16, #tpu.memory_space<vmem>>, vector<288x128xbf16>
    %cst = arith.constant dense<0.000000e+00> : vector<32x128xf32>
    %2 = tpu.matmul %0, %1, %cst {dimension_numbers = #tpu.dot_dimension_numbers<[1], [0], [0], [1], [0, 0, 1, 1], [], []>} : vector<32x288xbf16>, vector<288x128xbf16>, vector<32x128xf32> -> vector<32x128xf32>
    %c0_3 = arith.constant 0 : index
    %c0_4 = arith.constant 0 : index
    %3 = vector.load %arg4[%c0_3, %c0_4] : memref<1x128xf32, #tpu.memory_space<vmem>>, vector<1x128xf32>
    %4 = vector.broadcast %3 : vector<1x128xf32> to vector<32x128xf32>
    %5 = arith.addf %2, %4 : vector<32x128xf32>
    %6 = arith.truncf %5 : vector<32x128xf32> to vector<32x128xbf16>
    %c0_5 = arith.constant 0 : index
    %c0_6 = arith.constant 0 : index
    %7 = vector.load %arg5[%c0_5, %c0_6] : memref<32x128xbf16, #tpu.memory_space<vmem>>, vector<32x128xbf16>
    tpu.vector_store %arg5[%c0_5, %c0_6], %6 {strides = array<i32>} : memref<32x128xbf16, #tpu.memory_space<vmem>>, vector<32x128xbf16>,
    %8 = arith.mulf %5, %5 : vector<32x128xf32>
    %9 = tpu.concatenate %5, %8 in 1 : vector<32x128xf32>, vector<32x128xf32> -> vector<32x256xf32>
    %cst_7 = arith.constant dense<0.000000e+00> : vector<256xf32>
    %10 = vector.multi_reduction <add>, %9, %cst_7 [0] : vector<32x256xf32> to vector<256xf32>
    %11 = vector.shape_cast %10 : vector<256xf32> to vector<1x256xf32>
    %12 = vector.shape_cast %11 : vector<1x256xf32> to vector<1x256xf32>
    %13 = vector.broadcast %12 : vector<1x256xf32> to vector<8x256xf32>
    %14 = vector.shape_cast %13 : vector<8x256xf32> to vector<1x8x256xf32>
    %c0_8 = arith.constant 0 : index
    %c0_9 = arith.constant 0 : index
    %c0_10 = arith.constant 0 : index
    %15 = vector.load %arg6[%c0_8, %c0_9, %c0_10] : memref<1x8x256xf32, #tpu.memory_space<vmem>>, vector<1x8x256xf32>
    tpu.vector_store %arg6[%c0_8, %c0_9, %c0_10], %14 {strides = array<i32>} : memref<1x8x256xf32, #tpu.memory_space<vmem>>, vector<1x8x256xf32>,
    return
  }
  func.func @transform_0(%arg0: i32, %arg1: i32) -> (i32, i32) {
    %c0_i32 = arith.constant 0 : i32
    return %arg0, %arg1 : i32, i32
  }
  func.func @transform_1(%arg0: i32, %arg1: i32) -> (i32, i32) {
    %c0_i32 = arith.constant 0 : i32
    %c0_i32_0 = arith.constant 0 : i32
    return %arg1, %c0_i32 : i32, i32
  }
  func.func @transform_2(%arg0: i32, %arg1: i32) -> (i32, i32) {
    %c0_i32 = arith.constant 0 : i32
    %c0_i32_0 = arith.constant 0 : i32
    %c0_i32_1 = arith.constant 0 : i32
    return %c0_i32, %c0_i32_0 : i32, i32
  }
  func.func @transform_3(%arg0: i32, %arg1: i32) -> (i32, i32) {
    %c0_i32 = arith.constant 0 : i32
    %c0_i32_0 = arith.constant 0 : i32
    return %arg0, %c0_i32 : i32, i32
  }
  func.func @transform_4(%arg0: i32, %arg1: i32) -> (i32, i32, i32) {
    %c0_i32 = arith.constant 0 : i32
    %c0_i32_0 = arith.constant 0 : i32
    %c0_i32_1 = arith.constant 0 : i32
    return %arg0, %c0_i32, %c0_i32_0 : i32, i32, i32
  }
}

module attributes {stable_mosaic.version = 11 : i64} {
  func.func @_bn_apply_kernel(%arg0: i32, %arg1: memref<32x128xbf16, #tpu.memory_space<vmem>>, %arg2: memref<1x128xf32, #tpu.memory_space<vmem>>, %arg3: memref<1x128xf32, #tpu.memory_space<vmem>>, %arg4: memref<32x128xbf16, #tpu.memory_space<vmem>>) attributes {dimension_semantics = [#tpu.dimension_semantics<parallel>], iteration_bounds = array<i64: 1>, scalar_prefetch = 0 : i64, scratch_operands = 0 : i64, tpu.core_type = #tpu.core_type<tc>, window_params = [{transform_indices = @transform_0, window_bounds = array<i64: 32, 128>}, {pipeline_mode = #tpu.pipeline_mode<synchronous>, transform_indices = @transform_1, window_bounds = array<i64: 1, 128>}, {pipeline_mode = #tpu.pipeline_mode<synchronous>, transform_indices = @transform_2, window_bounds = array<i64: 1, 128>}, {transform_indices = @transform_3, window_bounds = array<i64: 32, 128>}]} {
    %c0 = arith.constant 0 : index
    %c0_0 = arith.constant 0 : index
    %0 = vector.load %arg1[%c0, %c0_0] : memref<32x128xbf16, #tpu.memory_space<vmem>>, vector<32x128xbf16>
    %1 = arith.extf %0 : vector<32x128xbf16> to vector<32x128xf32>
    %c0_1 = arith.constant 0 : index
    %c0_2 = arith.constant 0 : index
    %2 = vector.load %arg2[%c0_1, %c0_2] : memref<1x128xf32, #tpu.memory_space<vmem>>, vector<1x128xf32>
    %3 = vector.broadcast %2 : vector<1x128xf32> to vector<32x128xf32>
    %4 = arith.mulf %1, %3 : vector<32x128xf32>
    %c0_3 = arith.constant 0 : index
    %c0_4 = arith.constant 0 : index
    %5 = vector.load %arg3[%c0_3, %c0_4] : memref<1x128xf32, #tpu.memory_space<vmem>>, vector<1x128xf32>
    %6 = vector.broadcast %5 : vector<1x128xf32> to vector<32x128xf32>
    %7 = arith.addf %4, %6 : vector<32x128xf32>
    %cst = arith.constant 0.000000e+00 : f32
    %8 = vector.broadcast %cst : f32 to vector<32x128xf32>
    %9 = arith.cmpf oge, %7, %8 : vector<32x128xf32>
    %cst_5 = arith.constant 0.00999999977 : f32
    %10 = vector.broadcast %cst_5 : f32 to vector<32x128xf32>
    %11 = arith.mulf %10, %7 : vector<32x128xf32>
    %12 = arith.select %9, %7, %11 : vector<32x128xi1>, vector<32x128xf32>
    %13 = arith.truncf %12 : vector<32x128xf32> to vector<32x128xbf16>
    %c0_6 = arith.constant 0 : index
    %c0_7 = arith.constant 0 : index
    %14 = vector.load %arg4[%c0_6, %c0_7] : memref<32x128xbf16, #tpu.memory_space<vmem>>, vector<32x128xbf16>
    tpu.vector_store %arg4[%c0_6, %c0_7], %13 {strides = array<i32>} : memref<32x128xbf16, #tpu.memory_space<vmem>>, vector<32x128xbf16>,
    return
  }
  func.func @transform_0(%arg0: i32) -> (i32, i32) {
    %c0_i32 = arith.constant 0 : i32
    %c0_i32_0 = arith.constant 0 : i32
    return %arg0, %c0_i32 : i32, i32
  }
  func.func @transform_1(%arg0: i32) -> (i32, i32) {
    %c0_i32 = arith.constant 0 : i32
    %c0_i32_0 = arith.constant 0 : i32
    %c0_i32_1 = arith.constant 0 : i32
    return %c0_i32, %c0_i32_0 : i32, i32
  }
  func.func @transform_2(%arg0: i32) -> (i32, i32) {
    %c0_i32 = arith.constant 0 : i32
    %c0_i32_0 = arith.constant 0 : i32
    %c0_i32_1 = arith.constant 0 : i32
    return %c0_i32, %c0_i32_0 : i32, i32
  }
  func.func @transform_3(%arg0: i32) -> (i32, i32) {
    %c0_i32 = arith.constant 0 : i32
    %c0_i32_0 = arith.constant 0 : i32
    return %arg0, %c0_i32 : i32, i32
  }
}

module attributes {stable_mosaic.version = 11 : i64} {
  func.func @_bmm_kernel(%arg0: i32, %arg1: i32, %arg2: i32, %arg3: memref<1x32x128xbf16, #tpu.memory_space<vmem>>, %arg4: memref<1x128x128xbf16, #tpu.memory_space<vmem>>, %arg5: memref<1x32x128xbf16, #tpu.memory_space<vmem>>, %arg6: memref<1x1x8x256xf32, #tpu.memory_space<vmem>>) attributes {dimension_semantics = [#tpu.dimension_semantics<parallel>, #tpu.dimension_semantics<parallel>, #tpu.dimension_semantics<arbitrary>], iteration_bounds = array<i64: 4, 1, 1>, scalar_prefetch = 0 : i64, scratch_operands = 0 : i64, tpu.core_type = #tpu.core_type<tc>, window_params = [{transform_indices = @transform_0, window_bounds = array<i64: 1, 32, 128>}, {transform_indices = @transform_1, window_bounds = array<i64: 1, 128, 128>}, {transform_indices = @transform_2, window_bounds = array<i64: 1, 32, 128>}, {transform_indices = @transform_3, window_bounds = array<i64: 1, 1, 8, 256>}]} {
    %c0 = arith.constant 0 : index
    %c0_0 = arith.constant 0 : index
    %c0_1 = arith.constant 0 : index
    %0 = vector.load %arg3[%c0, %c0_0, %c0_1] : memref<1x32x128xbf16, #tpu.memory_space<vmem>>, vector<1x32x128xbf16>
    %1 = vector.shape_cast %0 : vector<1x32x128xbf16> to vector<32x128xbf16>
    %c0_2 = arith.constant 0 : index
    %c0_3 = arith.constant 0 : index
    %c0_4 = arith.constant 0 : index
    %2 = vector.load %arg4[%c0_2, %c0_3, %c0_4] : memref<1x128x128xbf16, #tpu.memory_space<vmem>>, vector<1x128x128xbf16>
    %3 = vector.shape_cast %2 : vector<1x128x128xbf16> to vector<128x128xbf16>
    %cst = arith.constant dense<0.000000e+00> : vector<32x128xf32>
    %4 = tpu.matmul %1, %3, %cst {dimension_numbers = #tpu.dot_dimension_numbers<[1], [0], [0], [1], [0, 0, 1, 1], [], []>} : vector<32x128xbf16>, vector<128x128xbf16>, vector<32x128xf32> -> vector<32x128xf32>
    %5 = vector.shape_cast %4 : vector<32x128xf32> to vector<1x32x128xf32>
    %6 = arith.truncf %5 : vector<1x32x128xf32> to vector<1x32x128xbf16>
    %c0_5 = arith.constant 0 : index
    %c0_6 = arith.constant 0 : index
    %c0_7 = arith.constant 0 : index
    %7 = vector.load %arg5[%c0_5, %c0_6, %c0_7] : memref<1x32x128xbf16, #tpu.memory_space<vmem>>, vector<1x32x128xbf16>
    tpu.vector_store %arg5[%c0_5, %c0_6, %c0_7], %6 {strides = array<i32>} : memref<1x32x128xbf16, #tpu.memory_space<vmem>>, vector<1x32x128xbf16>,
    %8 = arith.mulf %4, %4 : vector<32x128xf32>
    %9 = tpu.concatenate %4, %8 in 1 : vector<32x128xf32>, vector<32x128xf32> -> vector<32x256xf32>
    %cst_8 = arith.constant dense<0.000000e+00> : vector<256xf32>
    %10 = vector.multi_reduction <add>, %9, %cst_8 [0] : vector<32x256xf32> to vector<256xf32>
    %11 = vector.shape_cast %10 : vector<256xf32> to vector<1x256xf32>
    %12 = vector.shape_cast %11 : vector<1x256xf32> to vector<1x256xf32>
    %13 = vector.broadcast %12 : vector<1x256xf32> to vector<8x256xf32>
    %14 = vector.shape_cast %13 : vector<8x256xf32> to vector<1x1x8x256xf32>
    %c0_9 = arith.constant 0 : index
    %c0_10 = arith.constant 0 : index
    %c0_11 = arith.constant 0 : index
    %c0_12 = arith.constant 0 : index
    %15 = vector.load %arg6[%c0_9, %c0_10, %c0_11, %c0_12] : memref<1x1x8x256xf32, #tpu.memory_space<vmem>>, vector<1x1x8x256xf32>
    tpu.vector_store %arg6[%c0_9, %c0_10, %c0_11, %c0_12], %14 {strides = array<i32>} : memref<1x1x8x256xf32, #tpu.memory_space<vmem>>, vector<1x1x8x256xf32>,
    return
  }
  func.func @transform_0(%arg0: i32, %arg1: i32, %arg2: i32) -> (i32, i32, i32) {
    %c0_i32 = arith.constant 0 : i32
    return %arg0, %arg1, %arg2 : i32, i32, i32
  }
  func.func @transform_1(%arg0: i32, %arg1: i32, %arg2: i32) -> (i32, i32, i32) {
    %c0_i32 = arith.constant 0 : i32
    %c0_i32_0 = arith.constant 0 : i32
    return %arg0, %arg2, %c0_i32 : i32, i32, i32
  }
  func.func @transform_2(%arg0: i32, %arg1: i32, %arg2: i32) -> (i32, i32, i32) {
    %c0_i32 = arith.constant 0 : i32
    %c0_i32_0 = arith.constant 0 : i32
    return %arg0, %arg1, %c0_i32 : i32, i32, i32
  }
  func.func @transform_3(%arg0: i32, %arg1: i32, %arg2: i32) -> (i32, i32, i32, i32) {
    %c0_i32 = arith.constant 0 : i32
    %c0_i32_0 = arith.constant 0 : i32
    %c0_i32_1 = arith.constant 0 : i32
    return %arg0, %arg1, %c0_i32, %c0_i32_0 : i32, i32, i32, i32
  }
}

module attributes {stable_mosaic.version = 11 : i64} {
  func.func @_bn_apply_kernel(%arg0: i32, %arg1: memref<128x128xbf16, #tpu.memory_space<vmem>>, %arg2: memref<1x128xf32, #tpu.memory_space<vmem>>, %arg3: memref<1x128xf32, #tpu.memory_space<vmem>>, %arg4: memref<128x128xbf16, #tpu.memory_space<vmem>>) attributes {dimension_semantics = [#tpu.dimension_semantics<parallel>], iteration_bounds = array<i64: 1>, scalar_prefetch = 0 : i64, scratch_operands = 0 : i64, tpu.core_type = #tpu.core_type<tc>, window_params = [{transform_indices = @transform_0, window_bounds = array<i64: 128, 128>}, {pipeline_mode = #tpu.pipeline_mode<synchronous>, transform_indices = @transform_1, window_bounds = array<i64: 1, 128>}, {pipeline_mode = #tpu.pipeline_mode<synchronous>, transform_indices = @transform_2, window_bounds = array<i64: 1, 128>}, {transform_indices = @transform_3, window_bounds = array<i64: 128, 128>}]} {
    %c0 = arith.constant 0 : index
    %c0_0 = arith.constant 0 : index
    %0 = vector.load %arg1[%c0, %c0_0] : memref<128x128xbf16, #tpu.memory_space<vmem>>, vector<128x128xbf16>
    %1 = arith.extf %0 : vector<128x128xbf16> to vector<128x128xf32>
    %c0_1 = arith.constant 0 : index
    %c0_2 = arith.constant 0 : index
    %2 = vector.load %arg2[%c0_1, %c0_2] : memref<1x128xf32, #tpu.memory_space<vmem>>, vector<1x128xf32>
    %3 = vector.broadcast %2 : vector<1x128xf32> to vector<128x128xf32>
    %4 = arith.mulf %1, %3 : vector<128x128xf32>
    %c0_3 = arith.constant 0 : index
    %c0_4 = arith.constant 0 : index
    %5 = vector.load %arg3[%c0_3, %c0_4] : memref<1x128xf32, #tpu.memory_space<vmem>>, vector<1x128xf32>
    %6 = vector.broadcast %5 : vector<1x128xf32> to vector<128x128xf32>
    %7 = arith.addf %4, %6 : vector<128x128xf32>
    %cst = arith.constant 0.000000e+00 : f32
    %8 = vector.broadcast %cst : f32 to vector<128x128xf32>
    %9 = arith.cmpf oge, %7, %8 : vector<128x128xf32>
    %cst_5 = arith.constant 0.00999999977 : f32
    %10 = vector.broadcast %cst_5 : f32 to vector<128x128xf32>
    %11 = arith.mulf %10, %7 : vector<128x128xf32>
    %12 = arith.select %9, %7, %11 : vector<128x128xi1>, vector<128x128xf32>
    %13 = arith.truncf %12 : vector<128x128xf32> to vector<128x128xbf16>
    %c0_6 = arith.constant 0 : index
    %c0_7 = arith.constant 0 : index
    %14 = vector.load %arg4[%c0_6, %c0_7] : memref<128x128xbf16, #tpu.memory_space<vmem>>, vector<128x128xbf16>
    tpu.vector_store %arg4[%c0_6, %c0_7], %13 {strides = array<i32>} : memref<128x128xbf16, #tpu.memory_space<vmem>>, vector<128x128xbf16>,
    return
  }
  func.func @transform_0(%arg0: i32) -> (i32, i32) {
    %c0_i32 = arith.constant 0 : i32
    %c0_i32_0 = arith.constant 0 : i32
    return %arg0, %c0_i32 : i32, i32
  }
  func.func @transform_1(%arg0: i32) -> (i32, i32) {
    %c0_i32 = arith.constant 0 : i32
    %c0_i32_0 = arith.constant 0 : i32
    %c0_i32_1 = arith.constant 0 : i32
    return %c0_i32, %c0_i32_0 : i32, i32
  }
  func.func @transform_2(%arg0: i32) -> (i32, i32) {
    %c0_i32 = arith.constant 0 : i32
    %c0_i32_0 = arith.constant 0 : i32
    %c0_i32_1 = arith.constant 0 : i32
    return %c0_i32, %c0_i32_0 : i32, i32
  }
  func.func @transform_3(%arg0: i32) -> (i32, i32) {
    %c0_i32 = arith.constant 0 : i32
    %c0_i32_0 = arith.constant 0 : i32
    return %arg0, %c0_i32 : i32, i32
  }
}

module attributes {stable_mosaic.version = 11 : i64} {
  func.func @_mm_kernel(%arg0: i32, %arg1: i32, %arg2: memref<128x144xbf16, #tpu.memory_space<vmem>>, %arg3: memref<144x128xbf16, #tpu.memory_space<vmem>>, %arg4: memref<1x128xf32, #tpu.memory_space<vmem>>, %arg5: memref<128x128xbf16, #tpu.memory_space<vmem>>) attributes {dimension_semantics = [#tpu.dimension_semantics<parallel>, #tpu.dimension_semantics<arbitrary>], iteration_bounds = array<i64: 1, 1>, scalar_prefetch = 0 : i64, scratch_operands = 0 : i64, tpu.core_type = #tpu.core_type<tc>, window_params = [{transform_indices = @transform_0, window_bounds = array<i64: 128, 144>}, {transform_indices = @transform_1, window_bounds = array<i64: 144, 128>}, {pipeline_mode = #tpu.pipeline_mode<synchronous>, transform_indices = @transform_2, window_bounds = array<i64: 1, 128>}, {transform_indices = @transform_3, window_bounds = array<i64: 128, 128>}]} {
    %c0 = arith.constant 0 : index
    %c0_0 = arith.constant 0 : index
    %0 = vector.load %arg2[%c0, %c0_0] : memref<128x144xbf16, #tpu.memory_space<vmem>>, vector<128x144xbf16>
    %c0_1 = arith.constant 0 : index
    %c0_2 = arith.constant 0 : index
    %1 = vector.load %arg3[%c0_1, %c0_2] : memref<144x128xbf16, #tpu.memory_space<vmem>>, vector<144x128xbf16>
    %cst = arith.constant dense<0.000000e+00> : vector<128x128xf32>
    %2 = tpu.matmul %0, %1, %cst {dimension_numbers = #tpu.dot_dimension_numbers<[1], [0], [0], [1], [0, 0, 1, 1], [], []>} : vector<128x144xbf16>, vector<144x128xbf16>, vector<128x128xf32> -> vector<128x128xf32>
    %c0_3 = arith.constant 0 : index
    %c0_4 = arith.constant 0 : index
    %3 = vector.load %arg4[%c0_3, %c0_4] : memref<1x128xf32, #tpu.memory_space<vmem>>, vector<1x128xf32>
    %4 = vector.broadcast %3 : vector<1x128xf32> to vector<128x128xf32>
    %5 = arith.addf %2, %4 : vector<128x128xf32>
    %cst_5 = arith.constant 0.000000e+00 : f32
    %6 = vector.broadcast %cst_5 : f32 to vector<128x128xf32>
    %7 = arith.cmpf oge, %5, %6 : vector<128x128xf32>
    %cst_6 = arith.constant 0.00999999977 : f32
    %8 = vector.broadcast %cst_6 : f32 to vector<128x128xf32>
    %9 = arith.mulf %8, %5 : vector<128x128xf32>
    %10 = arith.select %7, %5, %9 : vector<128x128xi1>, vector<128x128xf32>
    %11 = arith.truncf %10 : vector<128x128xf32> to vector<128x128xbf16>
    %c0_7 = arith.constant 0 : index
    %c0_8 = arith.constant 0 : index
    %12 = vector.load %arg5[%c0_7, %c0_8] : memref<128x128xbf16, #tpu.memory_space<vmem>>, vector<128x128xbf16>
    tpu.vector_store %arg5[%c0_7, %c0_8], %11 {strides = array<i32>} : memref<128x128xbf16, #tpu.memory_space<vmem>>, vector<128x128xbf16>,
    return
  }
  func.func @transform_0(%arg0: i32, %arg1: i32) -> (i32, i32) {
    %c0_i32 = arith.constant 0 : i32
    return %arg0, %arg1 : i32, i32
  }
  func.func @transform_1(%arg0: i32, %arg1: i32) -> (i32, i32) {
    %c0_i32 = arith.constant 0 : i32
    %c0_i32_0 = arith.constant 0 : i32
    return %arg1, %c0_i32 : i32, i32
  }
  func.func @transform_2(%arg0: i32, %arg1: i32) -> (i32, i32) {
    %c0_i32 = arith.constant 0 : i32
    %c0_i32_0 = arith.constant 0 : i32
    %c0_i32_1 = arith.constant 0 : i32
    return %c0_i32, %c0_i32_0 : i32, i32
  }
  func.func @transform_3(%arg0: i32, %arg1: i32) -> (i32, i32) {
    %c0_i32 = arith.constant 0 : i32
    %c0_i32_0 = arith.constant 0 : i32
    return %arg0, %c0_i32 : i32, i32
  }
}

module attributes {stable_mosaic.version = 11 : i64} {
  func.func @_bmm_kernel(%arg0: i32, %arg1: i32, %arg2: i32, %arg3: memref<1x128x64xbf16, #tpu.memory_space<vmem>>, %arg4: memref<1x64x128xbf16, #tpu.memory_space<vmem>>, %arg5: memref<1x128x128xbf16, #tpu.memory_space<vmem>>, %arg6: memref<1x1x8x256xf32, #tpu.memory_space<vmem>>) attributes {dimension_semantics = [#tpu.dimension_semantics<parallel>, #tpu.dimension_semantics<parallel>, #tpu.dimension_semantics<arbitrary>], iteration_bounds = array<i64: 4, 1, 1>, scalar_prefetch = 0 : i64, scratch_operands = 0 : i64, tpu.core_type = #tpu.core_type<tc>, window_params = [{transform_indices = @transform_0, window_bounds = array<i64: 1, 128, 64>}, {transform_indices = @transform_1, window_bounds = array<i64: 1, 64, 128>}, {transform_indices = @transform_2, window_bounds = array<i64: 1, 128, 128>}, {transform_indices = @transform_3, window_bounds = array<i64: 1, 1, 8, 256>}]} {
    %c0 = arith.constant 0 : index
    %c0_0 = arith.constant 0 : index
    %c0_1 = arith.constant 0 : index
    %0 = vector.load %arg3[%c0, %c0_0, %c0_1] : memref<1x128x64xbf16, #tpu.memory_space<vmem>>, vector<1x128x64xbf16>
    %1 = vector.shape_cast %0 : vector<1x128x64xbf16> to vector<128x64xbf16>
    %c0_2 = arith.constant 0 : index
    %c0_3 = arith.constant 0 : index
    %c0_4 = arith.constant 0 : index
    %2 = vector.load %arg4[%c0_2, %c0_3, %c0_4] : memref<1x64x128xbf16, #tpu.memory_space<vmem>>, vector<1x64x128xbf16>
    %3 = vector.shape_cast %2 : vector<1x64x128xbf16> to vector<64x128xbf16>
    %cst = arith.constant dense<0.000000e+00> : vector<128x128xf32>
    %4 = tpu.matmul %1, %3, %cst {dimension_numbers = #tpu.dot_dimension_numbers<[1], [0], [0], [1], [0, 0, 1, 1], [], []>} : vector<128x64xbf16>, vector<64x128xbf16>, vector<128x128xf32> -> vector<128x128xf32>
    %5 = vector.shape_cast %4 : vector<128x128xf32> to vector<1x128x128xf32>
    %6 = arith.truncf %5 : vector<1x128x128xf32> to vector<1x128x128xbf16>
    %c0_5 = arith.constant 0 : index
    %c0_6 = arith.constant 0 : index
    %c0_7 = arith.constant 0 : index
    %7 = vector.load %arg5[%c0_5, %c0_6, %c0_7] : memref<1x128x128xbf16, #tpu.memory_space<vmem>>, vector<1x128x128xbf16>
    tpu.vector_store %arg5[%c0_5, %c0_6, %c0_7], %6 {strides = array<i32>} : memref<1x128x128xbf16, #tpu.memory_space<vmem>>, vector<1x128x128xbf16>,
    %8 = arith.mulf %4, %4 : vector<128x128xf32>
    %9 = tpu.concatenate %4, %8 in 1 : vector<128x128xf32>, vector<128x128xf32> -> vector<128x256xf32>
    %cst_8 = arith.constant dense<0.000000e+00> : vector<256xf32>
    %10 = vector.multi_reduction <add>, %9, %cst_8 [0] : vector<128x256xf32> to vector<256xf32>
    %11 = vector.shape_cast %10 : vector<256xf32> to vector<1x256xf32>
    %12 = vector.shape_cast %11 : vector<1x256xf32> to vector<1x256xf32>
    %13 = vector.broadcast %12 : vector<1x256xf32> to vector<8x256xf32>
    %14 = vector.shape_cast %13 : vector<8x256xf32> to vector<1x1x8x256xf32>
    %c0_9 = arith.constant 0 : index
    %c0_10 = arith.constant 0 : index
    %c0_11 = arith.constant 0 : index
    %c0_12 = arith.constant 0 : index
    %15 = vector.load %arg6[%c0_9, %c0_10, %c0_11, %c0_12] : memref<1x1x8x256xf32, #tpu.memory_space<vmem>>, vector<1x1x8x256xf32>
    tpu.vector_store %arg6[%c0_9, %c0_10, %c0_11, %c0_12], %14 {strides = array<i32>} : memref<1x1x8x256xf32, #tpu.memory_space<vmem>>, vector<1x1x8x256xf32>,
    return
  }
  func.func @transform_0(%arg0: i32, %arg1: i32, %arg2: i32) -> (i32, i32, i32) {
    %c0_i32 = arith.constant 0 : i32
    return %arg0, %arg1, %arg2 : i32, i32, i32
  }
  func.func @transform_1(%arg0: i32, %arg1: i32, %arg2: i32) -> (i32, i32, i32) {
    %c0_i32 = arith.constant 0 : i32
    %c0_i32_0 = arith.constant 0 : i32
    return %arg0, %arg2, %c0_i32 : i32, i32, i32
  }
  func.func @transform_2(%arg0: i32, %arg1: i32, %arg2: i32) -> (i32, i32, i32) {
    %c0_i32 = arith.constant 0 : i32
    %c0_i32_0 = arith.constant 0 : i32
    return %arg0, %arg1, %c0_i32 : i32, i32, i32
  }
  func.func @transform_3(%arg0: i32, %arg1: i32, %arg2: i32) -> (i32, i32, i32, i32) {
    %c0_i32 = arith.constant 0 : i32
    %c0_i32_0 = arith.constant 0 : i32
    %c0_i32_1 = arith.constant 0 : i32
    return %arg0, %arg1, %c0_i32, %c0_i32_0 : i32, i32, i32, i32
  }
}

module attributes {stable_mosaic.version = 11 : i64} {
  func.func @_bn_apply_kernel(%arg0: i32, %arg1: memref<512x128xbf16, #tpu.memory_space<vmem>>, %arg2: memref<1x128xf32, #tpu.memory_space<vmem>>, %arg3: memref<1x128xf32, #tpu.memory_space<vmem>>, %arg4: memref<512x128xbf16, #tpu.memory_space<vmem>>) attributes {dimension_semantics = [#tpu.dimension_semantics<parallel>], iteration_bounds = array<i64: 1>, scalar_prefetch = 0 : i64, scratch_operands = 0 : i64, tpu.core_type = #tpu.core_type<tc>, window_params = [{transform_indices = @transform_0, window_bounds = array<i64: 512, 128>}, {pipeline_mode = #tpu.pipeline_mode<synchronous>, transform_indices = @transform_1, window_bounds = array<i64: 1, 128>}, {pipeline_mode = #tpu.pipeline_mode<synchronous>, transform_indices = @transform_2, window_bounds = array<i64: 1, 128>}, {transform_indices = @transform_3, window_bounds = array<i64: 512, 128>}]} {
    %c0 = arith.constant 0 : index
    %c0_0 = arith.constant 0 : index
    %0 = vector.load %arg1[%c0, %c0_0] : memref<512x128xbf16, #tpu.memory_space<vmem>>, vector<512x128xbf16>
    %1 = arith.extf %0 : vector<512x128xbf16> to vector<512x128xf32>
    %c0_1 = arith.constant 0 : index
    %c0_2 = arith.constant 0 : index
    %2 = vector.load %arg2[%c0_1, %c0_2] : memref<1x128xf32, #tpu.memory_space<vmem>>, vector<1x128xf32>
    %3 = vector.broadcast %2 : vector<1x128xf32> to vector<512x128xf32>
    %4 = arith.mulf %1, %3 : vector<512x128xf32>
    %c0_3 = arith.constant 0 : index
    %c0_4 = arith.constant 0 : index
    %5 = vector.load %arg3[%c0_3, %c0_4] : memref<1x128xf32, #tpu.memory_space<vmem>>, vector<1x128xf32>
    %6 = vector.broadcast %5 : vector<1x128xf32> to vector<512x128xf32>
    %7 = arith.addf %4, %6 : vector<512x128xf32>
    %cst = arith.constant 0.000000e+00 : f32
    %8 = vector.broadcast %cst : f32 to vector<512x128xf32>
    %9 = arith.cmpf oge, %7, %8 : vector<512x128xf32>
    %cst_5 = arith.constant 2.000000e-01 : f32
    %10 = vector.broadcast %cst_5 : f32 to vector<512x128xf32>
    %11 = arith.mulf %10, %7 : vector<512x128xf32>
    %12 = arith.select %9, %7, %11 : vector<512x128xi1>, vector<512x128xf32>
    %13 = arith.truncf %12 : vector<512x128xf32> to vector<512x128xbf16>
    %c0_6 = arith.constant 0 : index
    %c0_7 = arith.constant 0 : index
    %14 = vector.load %arg4[%c0_6, %c0_7] : memref<512x128xbf16, #tpu.memory_space<vmem>>, vector<512x128xbf16>
    tpu.vector_store %arg4[%c0_6, %c0_7], %13 {strides = array<i32>} : memref<512x128xbf16, #tpu.memory_space<vmem>>, vector<512x128xbf16>,
    return
  }
  func.func @transform_0(%arg0: i32) -> (i32, i32) {
    %c0_i32 = arith.constant 0 : i32
    %c0_i32_0 = arith.constant 0 : i32
    return %arg0, %c0_i32 : i32, i32
  }
  func.func @transform_1(%arg0: i32) -> (i32, i32) {
    %c0_i32 = arith.constant 0 : i32
    %c0_i32_0 = arith.constant 0 : i32
    %c0_i32_1 = arith.constant 0 : i32
    return %c0_i32, %c0_i32_0 : i32, i32
  }
  func.func @transform_2(%arg0: i32) -> (i32, i32) {
    %c0_i32 = arith.constant 0 : i32
    %c0_i32_0 = arith.constant 0 : i32
    %c0_i32_1 = arith.constant 0 : i32
    return %c0_i32, %c0_i32_0 : i32, i32
  }
  func.func @transform_3(%arg0: i32) -> (i32, i32) {
    %c0_i32 = arith.constant 0 : i32
    %c0_i32_0 = arith.constant 0 : i32
    return %arg0, %c0_i32 : i32, i32
  }
}

module attributes {stable_mosaic.version = 11 : i64} {
  func.func @_mm_kernel(%arg0: i32, %arg1: i32, %arg2: memref<512x144xbf16, #tpu.memory_space<vmem>>, %arg3: memref<144x128xbf16, #tpu.memory_space<vmem>>, %arg4: memref<1x128xf32, #tpu.memory_space<vmem>>, %arg5: memref<512x128xf32, #tpu.memory_space<vmem>>) attributes {dimension_semantics = [#tpu.dimension_semantics<parallel>, #tpu.dimension_semantics<arbitrary>], iteration_bounds = array<i64: 1, 1>, scalar_prefetch = 0 : i64, scratch_operands = 0 : i64, tpu.core_type = #tpu.core_type<tc>, window_params = [{transform_indices = @transform_0, window_bounds = array<i64: 512, 144>}, {transform_indices = @transform_1, window_bounds = array<i64: 144, 128>}, {pipeline_mode = #tpu.pipeline_mode<synchronous>, transform_indices = @transform_2, window_bounds = array<i64: 1, 128>}, {transform_indices = @transform_3, window_bounds = array<i64: 512, 128>}]} {
    %c0 = arith.constant 0 : index
    %c0_0 = arith.constant 0 : index
    %0 = vector.load %arg2[%c0, %c0_0] : memref<512x144xbf16, #tpu.memory_space<vmem>>, vector<512x144xbf16>
    %c0_1 = arith.constant 0 : index
    %c0_2 = arith.constant 0 : index
    %1 = vector.load %arg3[%c0_1, %c0_2] : memref<144x128xbf16, #tpu.memory_space<vmem>>, vector<144x128xbf16>
    %cst = arith.constant dense<0.000000e+00> : vector<512x128xf32>
    %2 = tpu.matmul %0, %1, %cst {dimension_numbers = #tpu.dot_dimension_numbers<[1], [0], [0], [1], [0, 0, 1, 1], [], []>} : vector<512x144xbf16>, vector<144x128xbf16>, vector<512x128xf32> -> vector<512x128xf32>
    %c0_3 = arith.constant 0 : index
    %c0_4 = arith.constant 0 : index
    %3 = vector.load %arg4[%c0_3, %c0_4] : memref<1x128xf32, #tpu.memory_space<vmem>>, vector<1x128xf32>
    %4 = vector.broadcast %3 : vector<1x128xf32> to vector<512x128xf32>
    %5 = arith.addf %2, %4 : vector<512x128xf32>
    %6 = math.tanh %5 : vector<512x128xf32>
    %c0_5 = arith.constant 0 : index
    %c0_6 = arith.constant 0 : index
    %7 = vector.load %arg5[%c0_5, %c0_6] : memref<512x128xf32, #tpu.memory_space<vmem>>, vector<512x128xf32>
    tpu.vector_store %arg5[%c0_5, %c0_6], %6 {strides = array<i32>} : memref<512x128xf32, #tpu.memory_space<vmem>>, vector<512x128xf32>,
    return
  }
  func.func @transform_0(%arg0: i32, %arg1: i32) -> (i32, i32) {
    %c0_i32 = arith.constant 0 : i32
    return %arg0, %arg1 : i32, i32
  }
  func.func @transform_1(%arg0: i32, %arg1: i32) -> (i32, i32) {
    %c0_i32 = arith.constant 0 : i32
    %c0_i32_0 = arith.constant 0 : i32
    return %arg1, %c0_i32 : i32, i32
  }
  func.func @transform_2(%arg0: i32, %arg1: i32) -> (i32, i32) {
    %c0_i32 = arith.constant 0 : i32
    %c0_i32_0 = arith.constant 0 : i32
    %c0_i32_1 = arith.constant 0 : i32
    return %c0_i32, %c0_i32_0 : i32, i32
  }
  func.func @transform_3(%arg0: i32, %arg1: i32) -> (i32, i32) {
    %c0_i32 = arith.constant 0 : i32
    %c0_i32_0 = arith.constant 0 : i32
    return %arg0, %c0_i32 : i32, i32
  }
}

</mosaic_0001>

<bundles_post_ra>
// kernel: tile.13
= control target key start
LH: loop header
LB: loop body
LE: loop exit
PB: predicated region body
PF: predicated region fallthrough
CT: control target
= control target key end

     0   :  { %s28_s0 = inlined_call_operand.vmem [shape: f32[32], index: 0, kind: input, shape index: {}]   ;;  %s29_s1 = inlined_call_operand.vmem [shape: f32[16,32], index: 1, kind: output, shape index: {}]  }
   0x1   :  { %v4_v0 = vld [vmem:[%s28_s0] ss:$0 sm:$0xff] }
   0x2   :  { %5 = vst [vmem:[%s29_s1] sm:$0xff] %v4_v0 }
   0x3   :  { %8 = vst [vmem:[%s29_s1 + $0x8] sm:$0xff] %v4_v0 }

// kernel: generator_forward.10
= control target key start
LH: loop header
LB: loop body
LE: loop exit
PB: predicated region body
PF: predicated region fallthrough
CT: control target
= control target key end

     0   :  { %10 = vsyncpa [#allocation3], 0  ;;  %s239_s18 = smov [#allocation2]   ;;  %s308_s0 = inlined_call_operand.vmem [shape: bf16[8,8], index: 0, kind: input, shape index: {}]   ;;  %s309_s1 = inlined_call_operand.hbm [shape: bf16[8,512], index: 1, kind: input, shape index: {}]   ;;  %s310_s2 = inlined_call_operand.vmem [shape: f32[1,512], index: 2, kind: input, shape index: {}]   ;;  %s311_s3 = inlined_call_operand.vmem [shape: bf16[8,512], index: 3, kind: output, shape index: {0}]   ;;  %s312_s4 = inlined_call_operand.vmem [shape: f32[1,8,1024], index: 4, kind: output, shape index: {1}]  }
   0x1   :  { %s18_s17 = sshll.u32 %s309_s1, 4  ;;  %s20_s19 = sshll.u32 %s239_s18, 4  ;;  %s19_s17 = int_to_ptr.hbm [resolvable:$true] %s18_s17  ;;  %s21_s19 = int_to_ptr.vmem [resolvable:$true] %s20_s19 }
   0x2   :  { %23 = dma.hbm_to_vmem [thread:$0]  %s19_s17, 256, %s21_s19, [#allocation3]  }
   0x3   :  { %237 = dma.done.wait [#allocation3], 256  }
   0x4   :  { %238 = vsyncadd [#allocation3], 4294967040  ;;  %v32_v0 = vld [vmem:[#allocation2] sm:$0xff]  ;;  %v33_v1 = vld [vmem:[#allocation2 + $0x8] sm:$0xff]  ;;  %vm58_vm0 = vcmask 1043456   ;;  %vm54_vm1 = vcmask 64512   ;;  %v127_v15 = vlaneseq }
   0x5   :  { %v46_v2 = vunpack.c.l.b16 %v32_v0  ;;  %v47_v3 = vunpack.c.h.b16 %v32_v0  ;;  %v48_v4 = vunpack.c.l.b16 %v33_v1  ;;  %v49_v5 = vunpack.c.h.b16 %v33_v1  ;;  %v31_v14 = vld [vmem:[%s308_s0] sm:$0xf] }
   0x6   :  { %v34_v16 = vld [vmem:[%s310_s2] sm:$0xf]  ;;  %v128_v17 = vshrl.u32 %v127_v15, 7 }
   0x7   :  { %v50_v6 = vpack.c.b16 %v46_v2, %v46_v2  ;;  %v51_v7 = vpack.c.b16 %v47_v3, %v47_v3  ;;  %v52_v8 = vpack.c.b16 %v48_v4, %v48_v4  ;;  %v53_v9 = vpack.c.b16 %v49_v5, %v49_v5 }
   0x8   :  { %v36_v18 = vperm.slane %v34_v16, 0  ;;  %v37_v19 = vperm.slane %v34_v16, 1  ;;  %vm132_vm2 = vcmp.lt.s32.totalorder %v128_v17, 2  ;;  %v38_v31 = vperm.slane %v34_v16, 2 }
   0x9   :  { %v60_v10 = vsel %vm58_vm0, %v50_v6, 0  ;;  %v63_v11 = vsel %vm58_vm0, %v51_v7, 0  ;;  %v66_v12 = vsel %vm58_vm0, %v52_v8, 0  ;;  %v69_v13 = vsel %vm58_vm0, %v53_v9, 0 }
   0xa   :  { %78 = vmatpush.bf16.msra.mxu0 %v60_v10  ;;  %91 = vmatpush.bf16.msra.mxu1 %v63_v11  ;;  %v39_v32 = vperm.slane %v34_v16, 3 }
   0xb   :  { %104 = vmatpush.bf16.msra.mxu2 %v66_v12  ;;  %117 = vmatpush.bf16.msra.mxu3 %v69_v13 }
   0xd   :  { %208 = vmatmul.msk.bf16.vlgmr.msra.gmra.mxu0 %vm54_vm1, %v31_v14  ;;  %209 = vmatmul.msk.bf16.vlgmr.msra.gmra.mxu1 %vm54_vm1, %v31_v14 }
   0xe   :  { %210 = vmatmul.msk.bf16.vlgmr.msra.gmra.mxu2 %vm54_vm1, %v31_v14  ;;  %211 = vmatmul.msk.bf16.vlgmr.msra.gmra.mxu3 %vm54_vm1, %v31_v14 }
  0x8a   :  { %v80_v20 = vpop.f32.mrf.mxu0  ;;  %v93_v21 = vpop.f32.mrf.mxu1 }
  0x8b   :  { %v81_v22 = vadd.f32 %v80_v20, %v36_v18  ;;  %v94_v23 = vadd.f32 %v93_v21, %v37_v19 }
  0x8d   :  { %v135_v24 = vsel %vm132_vm2, %v81_v22, 0.0  ;;  %v123_v25 = vpack.c.bf16 %v94_v23, %v81_v22  ;;  %v136_v26 = vsel %vm132_vm2, %v94_v23, 0.0 }
  0x8e   :  { %v139_v27 = vmul.f32 %v135_v24, %v135_v24  ;;  %v143_v28 = vrot.slane %v135_v24, 4  ;;  %v140_v29 = vmul.f32 %v136_v26, %v136_v26  ;;  %v149_v30 = vrot.slane %v136_v26, 4 }
  0x8f   :  { %125 = vst [vmem:[%s311_s3] sm:$0xff] %v123_v25 }
  0x90   :  { %v144_v33 = vadd.f32 %v143_v28, %v135_v24  ;;  %v167_v34 = vrot.slane %v139_v27, 4  ;;  %v150_v35 = vadd.f32 %v149_v30, %v136_v26  ;;  %v173_v36 = vrot.slane %v140_v29, 4 }
  0x91   :  { %v106_v37 = vpop.f32.mrf.mxu2  ;;  %v119_v38 = vpop.f32.mrf.mxu3 }
  0x92   :  { %v145_v39 = vrot.slane %v144_v33, 2  ;;  %v168_v40 = vadd.f32 %v167_v34, %v139_v27  ;;  %v151_v41 = vrot.slane %v150_v35, 2  ;;  %v174_v42 = vadd.f32 %v173_v36, %v140_v29  ;;  %v82_v43 = vpop.f32.mrf.mxu0  ;;  %v95_v44 = vpop.f32.mrf.mxu1 }
  0x93   :  { %v107_v45 = vadd.f32 %v106_v37, %v38_v31  ;;  %v120_v46 = vadd.f32 %v119_v38, %v39_v32 }
  0x94   :  { %v146_v47 = vadd.f32 %v145_v39, %v144_v33  ;;  %v169_v48 = vrot.slane %v168_v40, 2  ;;  %v152_v49 = vadd.f32 %v151_v41, %v150_v35  ;;  %v175_v50 = vrot.slane %v174_v42, 2 }
  0x95   :  { %v137_v51 = vsel %vm132_vm2, %v107_v45, 0.0  ;;  %v124_v52 = vpack.c.bf16 %v120_v46, %v107_v45  ;;  %v138_v53 = vsel %vm132_vm2, %v120_v46, 0.0 }
  0x96   :  { %v147_v54 = vrot.slane %v146_v47, 1  ;;  %v170_v55 = vadd.f32 %v169_v48, %v168_v40  ;;  %v153_v56 = vrot.slane %v152_v49, 1  ;;  %v176_v57 = vadd.f32 %v175_v50, %v174_v42 }
  0x97   :  { %v141_v58 = vmul.f32 %v137_v51, %v137_v51  ;;  %v155_v59 = vrot.slane %v137_v51, 4  ;;  %126 = vst [vmem:[%s311_s3 + $0x8] sm:$0xff] %v124_v52  ;;  %v142_v60 = vmul.f32 %v138_v53, %v138_v53  ;;  %v161_v61 = vrot.slane %v138_v53, 4 }
  0x98   :  { %v148_v62 = vadd.f32 %v147_v54, %v146_v47  ;;  %v171_v63 = vrot.slane %v170_v55, 1  ;;  %v154_v0 = vadd.f32 %v153_v56, %v152_v49  ;;  %v177_v1 = vrot.slane %v176_v57, 1 }
  0x99   :  { %v156_v2 = vadd.f32 %v155_v59, %v137_v51  ;;  %v179_v3 = vrot.slane %v141_v58, 4  ;;  %v162_v4 = vadd.f32 %v161_v61, %v138_v53  ;;  %v185_v5 = vrot.slane %v142_v60, 4  ;;  %v108_v6 = vpop.f32.mrf.mxu2  ;;  %v121_v7 = vpop.f32.mrf.mxu3 }
  0x9a   :  { %v172_v8 = vadd.f32 %v171_v63, %v170_v55  ;;  %191 = vst [vmem:[%s312_s4] sm:$0xff] %v148_v62  ;;  %v178_v9 = vadd.f32 %v177_v1, %v176_v57 }
  0x9b   :  { %192 = vst [vmem:[%s312_s4 + $0x8] sm:$0xff] %v154_v0  ;;  %v157_v10 = vrot.slane %v156_v2, 2  ;;  %v180_v11 = vadd.f32 %v179_v3, %v141_v58  ;;  %v163_v12 = vrot.slane %v162_v4, 2  ;;  %v186_v13 = vadd.f32 %v185_v5, %v142_v60 }
  0x9c   :  { %195 = vst [vmem:[%s312_s4 + $0x20] sm:$0xff] %v172_v8 }
  0x9d   :  { %196 = vst [vmem:[%s312_s4 + $0x28] sm:$0xff] %v178_v9  ;;  %v158_v14 = vadd.f32 %v157_v10, %v156_v2  ;;  %v181_v15 = vrot.slane %v180_v11, 2  ;;  %v164_v16 = vadd.f32 %v163_v12, %v162_v4  ;;  %v187_v17 = vrot.slane %v186_v13, 2 }
  0x9f   :  { %v159_v18 = vrot.slane %v158_v14, 1  ;;  %v182_v19 = vadd.f32 %v181_v15, %v180_v11  ;;  %v165_v20 = vrot.slane %v164_v16, 1  ;;  %v188_v21 = vadd.f32 %v187_v17, %v186_v13 }
  0xa1   :  { %v160_v22 = vadd.f32 %v159_v18, %v158_v14  ;;  %v183_v23 = vrot.slane %v182_v19, 1  ;;  %v166_v24 = vadd.f32 %v165_v20, %v164_v16  ;;  %v189_v25 = vrot.slane %v188_v21, 1 }
  0xa3   :  { %v184_v26 = vadd.f32 %v183_v23, %v182_v19  ;;  %193 = vst [vmem:[%s312_s4 + $0x10] sm:$0xff] %v160_v22  ;;  %v190_v27 = vadd.f32 %v189_v25, %v188_v21 }
  0xa4   :  { %194 = vst [vmem:[%s312_s4 + $0x18] sm:$0xff] %v166_v24 }
  0xa5   :  { %197 = vst [vmem:[%s312_s4 + $0x30] sm:$0xff] %v184_v26 }
  0xa6   :  { %198 = vst [vmem:[%s312_s4 + $0x38] sm:$0xff] %v190_v27 }
  0xa7   :  { %207 = vsyncpa [#allocation3], 1 }

// kernel: generator_forward.11
= control target key start
LH: loop header
LB: loop body
LE: loop exit
PB: predicated region body
PF: predicated region fallthrough
CT: control target
= control target key end

     0   :  { %s106_s0 = inlined_call_operand.vmem [shape: bf16[8,512], index: 0, kind: input, shape index: {}]   ;;  %s107_s1 = inlined_call_operand.vmem [shape: f32[1,512], index: 1, kind: input, shape index: {}]   ;;  %s108_s2 = inlined_call_operand.vmem [shape: f32[1,512], index: 2, kind: input, shape index: {}]   ;;  %s109_s3 = inlined_call_operand.vmem [shape: bf16[8,512], index: 3, kind: output, shape index: {}]  }
   0x1   :  { %v14_v0 = vld [vmem:[%s106_s0] sm:$0xff]  ;;  %v15_v7 = vld [vmem:[%s106_s0 + $0x8] sm:$0xff] }
   0x2   :  { %v20_v1 = vld [vmem:[%s107_s1] sm:$0xf]  ;;  %v16_v3 = vunpack.c.l.bf16 %v14_v0  ;;  %v17_v4 = vunpack.c.h.bf16 %v14_v0  ;;  %v18_v10 = vunpack.c.l.bf16 %v15_v7  ;;  %v19_v11 = vunpack.c.h.bf16 %v15_v7 }
   0x3   :  { %v34_v2 = vld [vmem:[%s108_s2] sm:$0xf]  ;;  %v22_v5 = vperm.slane %v20_v1, 0  ;;  %v23_v6 = vperm.slane %v20_v1, 1  ;;  %v24_v14 = vperm.slane %v20_v1, 2  ;;  %v25_v15 = vperm.slane %v20_v1, 3 }
   0x4   :  { %v36_v8 = vperm.slane %v34_v2, 0  ;;  %v37_v9 = vperm.slane %v34_v2, 1  ;;  %v38_v16 = vperm.slane %v34_v2, 2  ;;  %v39_v17 = vperm.slane %v34_v2, 3 }
   0x5   :  { %v30_v12 = vmul.f32 %v22_v5, %v16_v3  ;;  %v31_v13 = vmul.f32 %v23_v6, %v17_v4  ;;  %v32_v20 = vmul.f32 %v24_v14, %v18_v10  ;;  %v33_v21 = vmul.f32 %v25_v15, %v19_v11 }
   0x7   :  { %v44_v18 = vadd.f32 %v36_v8, %v30_v12  ;;  %v45_v19 = vadd.f32 %v37_v9, %v31_v13  ;;  %v46_v24 = vadd.f32 %v38_v16, %v32_v20  ;;  %v47_v25 = vadd.f32 %v39_v17, %v33_v21 }
   0x9   :  { %vm48_vm0 = vcmp.ge.f32.partialorder %v44_v18, 0.0  ;;  %vm49_vm1 = vcmp.ge.f32.partialorder %v45_v19, 0.0  ;;  %v52_v22 = vmul.f32 0.01, %v44_v18  ;;  %v53_v23 = vmul.f32 0.01, %v45_v19 }
   0xa   :  { %vm50_vm2 = vcmp.ge.f32.partialorder %v46_v24, 0.0  ;;  %vm51_vm3 = vcmp.ge.f32.partialorder %v47_v25, 0.0  ;;  %v54_v29 = vmul.f32 0.01, %v46_v24  ;;  %v55_v30 = vmul.f32 0.01, %v47_v25 }
   0xb   :  { %v56_v26 = vsel %vm48_vm0, %v44_v18, %v52_v22  ;;  %v57_v27 = vsel %vm49_vm1, %v45_v19, %v53_v23 }
   0xc   :  { %v60_v28 = vpack.c.bf16 %v57_v27, %v56_v26  ;;  %v58_v31 = vsel %vm50_vm2, %v46_v24, %v54_v29  ;;  %v59_v32 = vsel %vm51_vm3, %v47_v25, %v55_v30 }
   0xd   :  { %v61_v33 = vpack.c.bf16 %v59_v32, %v58_v31 }
   0xe   :  { %62 = vst [vmem:[%s109_s3] sm:$0xff] %v60_v28 }
   0xf   :  { %63 = vst [vmem:[%s109_s3 + $0x8] sm:$0xff] %v61_v33 }

// kernel: generator_forward.12
= control target key start
LH: loop header
LB: loop body
LE: loop exit
PB: predicated region body
PF: predicated region fallthrough
CT: control target
= control target key end

     0   :  { %10 = vsyncpa [#allocation3], 0  ;;  %s495_s18 = smov [#allocation2]   ;;  %s496_s20 = smov 64   ;;  %s579_s0 = inlined_call_operand.vmem [shape: bf16[32,288], index: 0, kind: input, shape index: {}]   ;;  %s580_s1 = inlined_call_operand.hbm [shape: bf16[288,128], index: 1, kind: input, shape index: {}]   ;;  %s581_s2 = inlined_call_operand.vmem [shape: f32[1,128], index: 2, kind: input, shape index: {}]   ;;  %s582_s3 = inlined_call_operand.vmem [shape: bf16[32,128], index: 3, kind: output, shape index: {0}]   ;;  %s583_s4 = inlined_call_operand.vmem [shape: f32[1,8,256], index: 4, kind: output, shape index: {1}]  }
   0x1   :  { %s17_s17 = sshll.u32 %s580_s1, 4  ;;  %s19_s19 = sshll.u32 %s495_s18, 4  ;;  %s18_s17 = int_to_ptr.hbm [resolvable:$true] %s17_s17  ;;  %s20_s19 = int_to_ptr.vmem [resolvable:$true] %s19_s19 }
   0x2   :  { %s497_s21 = smov 4  }
   0x3   :  { %25 = dma.hbm_to_vmem [thread:$0]  %s18_s17, 2304, %s20_s19, [#allocation3], %s496_s20, %s496_s20, %s497_s21  }
   0x4   :  { %493 = dma.done.wait [#allocation3], 2304  }
   0x5   :  { %494 = vsyncadd [#allocation3], 4294964992  ;;  %v435_v0 = vld [vmem:[#allocation2 + $0x38] sm:$0xff]  ;;  %v434_v2 = vld [vmem:[#allocation2 + $0x30] sm:$0xff]  ;;  %vm219_vm0 = vcmask 261120  }
   0x6   :  { %v443_v1 = vld [vmem:[#allocation2 + $0x78] sm:$0xff]  ;;  %226 = vmatpush.bf16.msra.mxu0 %v435_v0  ;;  %457 = vmatpush.bf16.msra.mxu3 %v435_v0  ;;  %v445_v3 = vld [vmem:[#allocation2 + $0x88] sm:$0xff]  ;;  %v442_v4 = vld [vmem:[#allocation2 + $0x70] sm:$0xff] }
   0x7   :  { %245 = vmatpush.bf16.msra.mxu1 %v443_v1  ;;  %270 = vmatpush.bf16.msra.mxu2 %v445_v3  ;;  %v444_v5 = vld [vmem:[#allocation2 + $0x80] sm:$0xff]  ;;  %v334_v6 = vld [vmem:[%s579_s0 + $0x8] sm:$0xf]  ;;  %v424_v7 = vld [vmem:[%s579_s0 + $0x10] sm:$0xf0] }
   0x8   :  { %v433_v8 = vld [vmem:[#allocation2 + $0x28] sm:$0xff]  ;;  %v335_v10 = vor.u32 %v424_v7, %v334_v6  ;;  %v432_v11 = vld [vmem:[#allocation2 + $0x20] sm:$0xff]  ;;  %v431_v13 = vld [vmem:[#allocation2 + $0x18] sm:$0xff] }
   0x9   :  { %v441_v9 = vld [vmem:[#allocation2 + $0x68] sm:$0xff]  ;;  %v440_v12 = vld [vmem:[#allocation2 + $0x60] sm:$0xff]  ;;  %v439_v14 = vld [vmem:[#allocation2 + $0x58] sm:$0xff] }
   0xa   :  { %227 = vmatpush.bf16.msra.mxu0 %v434_v2  ;;  %458 = vmatpush.bf16.msra.mxu3 %v434_v2  ;;  %v430_v15 = vld [vmem:[#allocation2 + $0x10] sm:$0xff]  ;;  %v346_v17 = vld [vmem:[%s579_s0 + $0x20] sm:$0xf]  ;;  %v427_v18 = vld [vmem:[%s579_s0 + $0x28] sm:$0xf0] }
   0xb   :  { %246 = vmatpush.bf16.msra.mxu1 %v442_v4  ;;  %271 = vmatpush.bf16.msra.mxu2 %v444_v5  ;;  %v438_v16 = vld [vmem:[#allocation2 + $0x50] sm:$0xff]  ;;  %v429_v19 = vld [vmem:[#allocation2 + $0x8] sm:$0xff]  ;;  %v347_v21 = vor.u32 %v427_v18, %v346_v17  ;;  %v428_v22 = vld [vmem:[#allocation2] sm:$0xff] }
   0xc   :  { %v437_v20 = vld [vmem:[#allocation2 + $0x48] sm:$0xff]  ;;  %v326_v23 = vld [vmem:[%s579_s0] sm:$0xf]  ;;  %v338_v25 = vld [vmem:[%s579_s0 + $0x18] sm:$0xf] }
   0xd   :  { %v423_v24 = vld [vmem:[%s579_s0 + $0x8] sm:$0xf0]  ;;  %v426_v26 = vld [vmem:[%s579_s0 + $0x20] sm:$0xf0]  ;;  %v328_v29 = vld [vmem:[%s579_s0 + $0xc] sm:$0xf0] }
   0xe   :  { %228 = vmatpush.bf16.msra.mxu0 %v433_v8  ;;  %459 = vmatpush.bf16.msra.mxu3 %v433_v8  ;;  %v436_v27 = vld [vmem:[#allocation2 + $0x40] sm:$0xff]  ;;  %v327_v30 = vor.u32 %v423_v24, %v326_v23  ;;  %v339_v31 = vor.u32 %v426_v26, %v338_v25  ;;  %v425_v33 = vld [vmem:[%s579_s0 + $0x1c] sm:$0xf]  ;;  %v340_v34 = vld [vmem:[%s579_s0 + $0x24] sm:$0xf0] }
   0xf   :  { %247 = vmatpush.bf16.msra.mxu1 %v441_v9  ;;  %420 = vmatmul.msk.bf16.vlgmr.msra.gmra.mxu2 %vm219_vm0, %v335_v10  ;;  %v422_v28 = vld [vmem:[%s579_s0 + $0x4] sm:$0xf]  ;;  %v343_v35 = vor.u32 %v425_v33, %v340_v34  ;;  %v468_v38 = vld [vmem:[%s581_s2] ss:$0 sm:$0xff] }
  0x10   :  { %v331_v32 = vor.u32 %v422_v28, %v328_v29 }
  0x12   :  { %229 = vmatpush.bf16.msra.mxu0 %v432_v11  ;;  %460 = vmatpush.bf16.msra.mxu3 %v432_v11 }
  0x13   :  { %248 = vmatpush.bf16.msra.mxu1 %v440_v12 }
  0x16   :  { %230 = vmatpush.bf16.msra.mxu0 %v431_v13  ;;  %461 = vmatpush.bf16.msra.mxu3 %v431_v13 }
  0x17   :  { %249 = vmatpush.bf16.msra.mxu1 %v439_v14 }
  0x1a   :  { %231 = vmatpush.bf16.msra.mxu0 %v430_v15  ;;  %462 = vmatpush.bf16.msra.mxu3 %v430_v15 }
  0x1b   :  { %250 = vmatpush.bf16.msra.mxu1 %v438_v16 }
  0x1e   :  { %232 = vmatpush.bf16.msra.mxu0 %v429_v19  ;;  %463 = vmatpush.bf16.msra.mxu3 %v429_v19 }
  0x1f   :  { %251 = vmatpush.bf16.msra.mxu1 %v437_v20  ;;  %421 = vmatmul.msk.bf16.gmra.mxu2 %vm219_vm0, %v347_v21 }
  0x22   :  { %233 = vmatpush.bf16.msra.mxu0 %v428_v22  ;;  %464 = vmatpush.bf16.msra.mxu3 %v428_v22 }
  0x23   :  { %252 = vmatpush.bf16.msra.mxu1 %v436_v27 }
  0x25   :  { %234 = vmatmul.bf16.vlgmr.msra.gmra.mxu0 %v327_v30  ;;  %239 = vmatmul.bf16.vlgmr.msra.gmra.mxu3 %v339_v31 }
  0x26   :  { %253 = vmatmul.bf16.vlgmr.msra.gmra.mxu1 %v331_v32 }
  0x36   :  { %258 = vmatmul.bf16.gmra.mxu1 %v343_v35 }
  0x92   :  { %v273_v36 = vpop.f32.mrf.mxu2 }
  0x9a   :  { %v275_v41 = vpop.f32.mrf.mxu2 }
  0xa2   :  { %v235_v37 = vpop.f32.mrf.mxu0  ;;  %v278_v52 = vpop.f32.mrf.mxu2 }
  0xa3   :  { %v254_v39 = vpop.f32.mrf.mxu1  ;;  %v236_v40 = vadd.f32 %v468_v38, %v235_v37 }
  0xa5   :  { %v255_v43 = vadd.f32 %v254_v39, %v236_v40 }
  0xa7   :  { %v274_v48 = vadd.f32 %v273_v36, %v255_v43 }
  0xa8   :  { %v240_v46 = vpop.f32.mrf.mxu3 }
  0xa9   :  { %v241_v50 = vadd.f32 %v468_v38, %v240_v46  ;;  %v291_v60 = vmul.f32 %v274_v48, %v274_v48 }
  0xaa   :  { %v237_v42 = vpop.f32.mrf.mxu0  ;;  %v280_v0 = vpop.f32.mrf.mxu2 }
  0xab   :  { %v238_v44 = vadd.f32 %v468_v38, %v237_v42  ;;  %v256_v45 = vpop.f32.mrf.mxu1 }
  0xad   :  { %v257_v47 = vadd.f32 %v256_v45, %v238_v44 }
  0xaf   :  { %v276_v49 = vadd.f32 %v275_v41, %v257_v47 }
  0xb0   :  { %v242_v55 = vpop.f32.mrf.mxu3 }
  0xb1   :  { %v449_v51 = vpack.c.bf16 %v276_v49, %v274_v48  ;;  %v292_v57 = vmul.f32 %v276_v49, %v276_v49  ;;  %v243_v58 = vadd.f32 %v468_v38, %v242_v55  ;;  %v295_v61 = vadd.f32 %v276_v49, %v274_v48 }
  0xb3   :  { %450 = vst [vmem:[%s582_s3] sm:$0xff] %v449_v51   ;;  %v259_v53 = vpop.f32.mrf.mxu1  ;;  %v304_v1 = vadd.f32 %v292_v57, %v291_v60 }
  0xb4   :  { %v260_v54 = vadd.f32 %v259_v53, %v241_v50 }
  0xb6   :  { %v279_v56 = vadd.f32 %v278_v52, %v260_v54 }
  0xb8   :  { %v293_v62 = vmul.f32 %v279_v56, %v279_v56  ;;  %v296_v2 = vadd.f32 %v295_v61, %v279_v56 }
  0xba   :  { %v305_v4 = vadd.f32 %v304_v1, %v293_v62 }
  0xbb   :  { %v261_v59 = vpop.f32.mrf.mxu1 }
  0xbc   :  { %v262_v63 = vadd.f32 %v261_v59, %v243_v58 }
  0xbe   :  { %v281_v3 = vadd.f32 %v280_v0, %v262_v63 }
  0xc0   :  { %v454_v5 = vpack.c.bf16 %v281_v3, %v279_v56  ;;  %v294_v6 = vmul.f32 %v281_v3, %v281_v3  ;;  %v297_v7 = vadd.f32 %v296_v2, %v281_v3 }
  0xc2   :  { %456 = vst [vmem:[%s582_s3 + $0x8] sm:$0xff] %v454_v5   ;;  %v298_v8 = vrot.slane %v297_v7, 4  ;;  %v306_v9 = vadd.f32 %v305_v4, %v294_v6 }
  0xc4   :  { %v299_v10 = vadd.f32 %v298_v8, %v297_v7  ;;  %v307_v11 = vrot.slane %v306_v9, 4 }
  0xc6   :  { %v300_v12 = vrot.slane %v299_v10, 2  ;;  %v308_v13 = vadd.f32 %v307_v11, %v306_v9 }
  0xc8   :  { %v301_v14 = vadd.f32 %v300_v12, %v299_v10  ;;  %v309_v15 = vrot.slane %v308_v13, 2 }
  0xca   :  { %v302_v16 = vrot.slane %v301_v14, 1  ;;  %v310_v17 = vadd.f32 %v309_v15, %v308_v13 }
  0xcc   :  { %v303_v18 = vadd.f32 %v302_v16, %v301_v14  ;;  %v311_v19 = vrot.slane %v310_v17, 1 }
  0xce   :  { %v312_v20 = vadd.f32 %v311_v19, %v310_v17  ;;  %313 = vst [vmem:[%s583_s4] sm:$0xff] %v303_v18 }
  0xd0   :  { %314 = vst [vmem:[%s583_s4 + $0x8] sm:$0xff] %v312_v20 }
  0xd1   :  { %323 = vsyncpa [#allocation3], 1 }

// kernel: generator_forward.13
= control target key start
LH: loop header
LB: loop body
LE: loop exit
PB: predicated region body
PF: predicated region fallthrough
CT: control target
= control target key end

     0   :  { %s122_s0 = inlined_call_operand.vmem [shape: bf16[32,128], index: 0, kind: input, shape index: {}]   ;;  %s123_s1 = inlined_call_operand.vmem [shape: f32[1,128], index: 1, kind: input, shape index: {}]   ;;  %s124_s2 = inlined_call_operand.vmem [shape: f32[1,128], index: 2, kind: input, shape index: {}]   ;;  %s125_s3 = inlined_call_operand.vmem [shape: bf16[32,128], index: 3, kind: output, shape index: {}]  }
   0x1   :  { %v63_v0 = vld [vmem:[%s122_s0] sm:$0xff]   ;;  %v80_v5 = vld [vmem:[%s122_s0 + $0x8] sm:$0xff]  }
   0x2   :  { %v82_v1 = vld [vmem:[%s123_s1] ss:$0 sm:$0xff]  ;;  %v64_v2 = vunpack.c.l.bf16 %v63_v0  ;;  %v65_v3 = vunpack.c.h.bf16 %v63_v0  ;;  %v68_v6 = vunpack.c.l.bf16 %v80_v5  ;;  %v69_v7 = vunpack.c.h.bf16 %v80_v5 }
   0x3   :  { %v83_v4 = vld [vmem:[%s124_s2] ss:$0 sm:$0xff] }
   0x4   :  { %v26_v8 = vmul.f32 %v82_v1, %v64_v2  ;;  %v27_v9 = vmul.f32 %v82_v1, %v65_v3  ;;  %v28_v10 = vmul.f32 %v82_v1, %v68_v6  ;;  %v29_v11 = vmul.f32 %v82_v1, %v69_v7 }
   0x6   :  { %v34_v12 = vadd.f32 %v83_v4, %v26_v8  ;;  %v35_v13 = vadd.f32 %v83_v4, %v27_v9  ;;  %v36_v14 = vadd.f32 %v83_v4, %v28_v10  ;;  %v37_v15 = vadd.f32 %v83_v4, %v29_v11 }
   0x8   :  { %vm38_vm0 = vcmp.ge.f32.partialorder %v34_v12, 0.0  ;;  %vm39_vm1 = vcmp.ge.f32.partialorder %v35_v13, 0.0  ;;  %v42_v16 = vmul.f32 0.01, %v34_v12  ;;  %v43_v17 = vmul.f32 0.01, %v35_v13 }
   0x9   :  { %vm40_vm2 = vcmp.ge.f32.partialorder %v36_v14, 0.0  ;;  %vm41_vm3 = vcmp.ge.f32.partialorder %v37_v15, 0.0  ;;  %v44_v18 = vmul.f32 0.01, %v36_v14  ;;  %v45_v19 = vmul.f32 0.01, %v37_v15 }
   0xa   :  { %v46_v20 = vsel %vm38_vm0, %v34_v12, %v42_v16  ;;  %v47_v21 = vsel %vm39_vm1, %v35_v13, %v43_v17 }
   0xb   :  { %v73_v22 = vpack.c.bf16 %v47_v21, %v46_v20  ;;  %v48_v23 = vsel %vm40_vm2, %v36_v14, %v44_v18  ;;  %v49_v24 = vsel %vm41_vm3, %v37_v15, %v45_v19 }
   0xc   :  { %v78_v25 = vpack.c.bf16 %v49_v24, %v48_v23 }
   0xd   :  { %74 = vst [vmem:[%s125_s3] sm:$0xff] %v73_v22  }
   0xe   :  { %81 = vst [vmem:[%s125_s3 + $0x8] sm:$0xff] %v78_v25  }

// kernel: generator_forward.14
= control target key start
LH: loop header
LB: loop body
LE: loop exit
PB: predicated region body
PF: predicated region fallthrough
CT: control target
= control target key end

     0   :  { %s738_s12 = smov 0   ;;  %s740_s13 = smov 0   ;;  %s782_s0 = inlined_call_operand.vmem [shape: bf16[4,32,128], index: 0, kind: input, shape index: {}]   ;;  %s783_s1 = inlined_call_operand.vmem [shape: bf16[4,128,128], index: 1, kind: input, shape index: {}]   ;;  %s784_s2 = inlined_call_operand.vmem [shape: bf16[4,32,128], index: 2, kind: output, shape index: {0}]   ;;  %s785_s3 = inlined_call_operand.vmem [shape: f32[4,1,8,256], index: 3, kind: output, shape index: {1}]  }
   0x1   :  { %s742_s14 = smov 0  }
   0x2 LB: > { %s33_s15 = sadd.s32 1, %s712_s13  ;;  %p586_p0 = scmp.ge.s32.totalorder %s716_s14, 1  ;;  %s716_s14 = sphi %s742_s14, %s14_s14   ;;  %s712_s13 = sphi %s740_s13, %s787_s13   ;;  %s708_s12 = sphi %s738_s12, %s786_s12  }
   0x3   : > { %p35_p1 = scmp.ge.s32.totalorder %s33_s15, 4  ;;  %p192_p2 = scmp.lt.s32.totalorder %s716_s14, 5 }
   0x5   : > { %s789_s15 = smov (%p35_p1, %s33_s15), 0  ;;  %p193_p3 = pnand %p586_p0, %p192_p2 }
   0x6   : > { %p246_p4 = scmp.lt.s32.totalorder (!%p193_p3), %s708_s12, 3 }
   0x7   : > { %196 = sbr.rel (%p193_p3) target bundleno = 202 (0xca), region = 28 }
   0xc   : > { %s791_s12 = smov (!%p246_p4, %s708_s12), 3 }
   0xd   : > { %s638_s16 = sshll.u32 %s791_s12, 6  ;;  %s759_s20 = sshll.u32 %s791_s12, 4 }
   0xe   : > { %s266_s19 = scalar_lea.vmem %s783_s1, %s638_s16  ;;  %s256_s23 = scalar_lea.vmem %s782_s0, %s759_s20 }
   0xf   : > { %v650_v0 = vld [vmem:[%s266_s19 + $0x38] sm:$0xff]  ;;  %v649_v1 = vld [vmem:[%s266_s19 + $0x30] sm:$0xff]  ;;  %v648_v2 = vld [vmem:[%s266_s19 + $0x28] sm:$0xff]  ;;  %s276_s26 = scalar_lea.vmem %s784_s2, %s759_s20  ;;  %s286_s29 = scalar_lea.vmem %s785_s3, %s759_s20 }
  0x10   : > { %367 = vmatpush.bf16.msra.mxu0 %v650_v0  ;;  %662 = vmatpush.bf16.msra.mxu1 %v650_v0  ;;  %v647_v3 = vld [vmem:[%s266_s19 + $0x20] sm:$0xff]  ;;  %v646_v4 = vld [vmem:[%s266_s19 + $0x18] sm:$0xff]  ;;  %v645_v5 = vld [vmem:[%s266_s19 + $0x10] sm:$0xff] }
  0x11   : > { %v644_v6 = vld [vmem:[%s266_s19 + $0x8] sm:$0xff]  ;;  %v643_v7 = vld [vmem:[%s266_s19] sm:$0xff] }
  0x12   : > { %v641_v8 = vld [vmem:[%s256_s23] sm:$0xff]  ;;  %v642_v9 = vld [vmem:[%s256_s23 + $0x8] sm:$0xff] }
  0x14   : > { %368 = vmatpush.bf16.msra.mxu0 %v649_v1  ;;  %663 = vmatpush.bf16.msra.mxu1 %v649_v1 }
  0x18   : > { %369 = vmatpush.bf16.msra.mxu0 %v648_v2  ;;  %664 = vmatpush.bf16.msra.mxu1 %v648_v2 }
  0x1c   : > { %370 = vmatpush.bf16.msra.mxu0 %v647_v3  ;;  %665 = vmatpush.bf16.msra.mxu1 %v647_v3 }
  0x20   : > { %371 = vmatpush.bf16.msra.mxu0 %v646_v4  ;;  %666 = vmatpush.bf16.msra.mxu1 %v646_v4 }
  0x24   : > { %372 = vmatpush.bf16.msra.mxu0 %v645_v5  ;;  %667 = vmatpush.bf16.msra.mxu1 %v645_v5 }
  0x28   : > { %373 = vmatpush.bf16.msra.mxu0 %v644_v6  ;;  %668 = vmatpush.bf16.msra.mxu1 %v644_v6 }
  0x2c   : > { %374 = vmatpush.bf16.msra.mxu0 %v643_v7  ;;  %669 = vmatpush.bf16.msra.mxu1 %v643_v7 }
  0x2f   : > { %375 = vmatmul.bf16.vlgmr.msra.gmra.mxu0 %v641_v8  ;;  %380 = vmatmul.bf16.vlgmr.msra.gmra.mxu1 %v642_v9 }
  0xac   : > { %v376_v10 = vpop.f32.mrf.mxu0  ;;  %v381_v11 = vpop.f32.mrf.mxu1 }
  0xad   : > { %v394_v12 = vmul.f32 %v376_v10, %v376_v10  ;;  %v396_v19 = vmul.f32 %v381_v11, %v381_v11 }
  0xb4   : > { %v378_v13 = vpop.f32.mrf.mxu0  ;;  %v383_v14 = vpop.f32.mrf.mxu1 }
  0xb5   : > { %v654_v15 = vpack.c.bf16 %v378_v13, %v376_v10  ;;  %v395_v16 = vmul.f32 %v378_v13, %v378_v13  ;;  %v398_v17 = vadd.f32 %v378_v13, %v376_v10  ;;  %v659_v18 = vpack.c.bf16 %v383_v14, %v381_v11 }
  0xb6   : > { %v397_v22 = vmul.f32 %v383_v14, %v383_v14 }
  0xb7   : > { %655 = vst [vmem:[%s276_s26] sm:$0xff] %v654_v15   ;;  %v407_v20 = vadd.f32 %v395_v16, %v394_v12  ;;  %v399_v21 = vadd.f32 %v398_v17, %v381_v11 }
  0xb8   : > { %661 = vst [vmem:[%s276_s26 + $0x8] sm:$0xff] %v659_v18  }
  0xb9   : > { %v400_v23 = vadd.f32 %v399_v21, %v383_v14  ;;  %v408_v24 = vadd.f32 %v407_v20, %v396_v19 }
  0xbb   : > { %v401_v25 = vrot.slane %v400_v23, 4  ;;  %v409_v26 = vadd.f32 %v408_v24, %v397_v22 }
  0xbd   : > { %v402_v27 = vadd.f32 %v401_v25, %v400_v23  ;;  %v410_v28 = vrot.slane %v409_v26, 4 }
  0xbf   : > { %v403_v29 = vrot.slane %v402_v27, 2  ;;  %v411_v30 = vadd.f32 %v410_v28, %v409_v26 }
  0xc1   : > { %v404_v31 = vadd.f32 %v403_v29, %v402_v27  ;;  %v412_v32 = vrot.slane %v411_v30, 2 }
  0xc3   : > { %v405_v33 = vrot.slane %v404_v31, 1  ;;  %v413_v34 = vadd.f32 %v412_v32, %v411_v30 }
  0xc5   : > { %v406_v35 = vadd.f32 %v405_v33, %v404_v31  ;;  %v414_v36 = vrot.slane %v413_v34, 1 }
  0xc7   : > { %v415_v37 = vadd.f32 %v414_v36, %v413_v34  ;;  %416 = vst [vmem:[%s286_s29] sm:$0xff] %v406_v35 }
  0xc9   : > { %417 = vst [vmem:[%s286_s29 + $0x8] sm:$0xff] %v415_v37 }
  0xca PF: > { %s14_s14 = sadd.s32 1, %s716_s14   ;;  %s786_s12 = smov %s712_s13 }
  0xcb   : > { %p11_p5 = scmp.ge.s32.totalorder %s14_s14, 6   ;;  %s787_s13 = smov %s789_s15 }
  0xcd   :  { %13 = sbr.rel (!%p11_p5) target bundleno = 2 (0x2), region = 73 }

// kernel: generator_forward.15
= control target key start
LH: loop header
LB: loop body
LE: loop exit
PB: predicated region body
PF: predicated region fallthrough
CT: control target
= control target key end

     0   :  { %s368_s0 = inlined_call_operand.vmem [shape: bf16[128,128], index: 0, kind: input, shape index: {}]   ;;  %s369_s1 = inlined_call_operand.vmem [shape: f32[1,128], index: 1, kind: input, shape index: {}]   ;;  %s370_s2 = inlined_call_operand.vmem [shape: f32[1,128], index: 2, kind: input, shape index: {}]   ;;  %s371_s3 = inlined_call_operand.vmem [shape: bf16[128,128], index: 3, kind: output, shape index: {}]  }
   0x1   :  { %v171_v0 = vld [vmem:[%s368_s0] sm:$0xff]   ;;  %v242_v5 = vld [vmem:[%s368_s0 + $0x8] sm:$0xff]   ;;  %v243_v8 = vld [vmem:[%s368_s0 + $0x10] sm:$0xff]  }
   0x2   :  { %v284_v1 = vld [vmem:[%s369_s1] ss:$0 sm:$0xff]  ;;  %v172_v2 = vunpack.c.l.bf16 %v171_v0  ;;  %v173_v3 = vunpack.c.h.bf16 %v171_v0  ;;  %v176_v6 = vunpack.c.l.bf16 %v242_v5  ;;  %v177_v7 = vunpack.c.h.bf16 %v242_v5  ;;  %v244_v9 = vld [vmem:[%s368_s0 + $0x18] sm:$0xff]   ;;  %v246_v39 = vld [vmem:[%s368_s0 + $0x28] sm:$0xff]  }
   0x3   :  { %v289_v4 = vld [vmem:[%s370_s2] ss:$0 sm:$0xff]  ;;  %v180_v12 = vunpack.c.l.bf16 %v243_v8  ;;  %v181_v13 = vunpack.c.h.bf16 %v243_v8  ;;  %v184_v16 = vunpack.c.l.bf16 %v244_v9  ;;  %v185_v17 = vunpack.c.h.bf16 %v244_v9  ;;  %v247_v49 = vld [vmem:[%s368_s0 + $0x30] sm:$0xff]   ;;  %v248_v57 = vld [vmem:[%s368_s0 + $0x38] sm:$0xff]  }
   0x4   :  { %v50_v10 = vmul.f32 %v284_v1, %v172_v2  ;;  %v51_v11 = vmul.f32 %v284_v1, %v173_v3  ;;  %v52_v14 = vmul.f32 %v284_v1, %v176_v6  ;;  %v53_v15 = vmul.f32 %v284_v1, %v177_v7  ;;  %v245_v38 = vld [vmem:[%s368_s0 + $0x20] sm:$0xff]  }
   0x5   :  { %v54_v20 = vmul.f32 %v284_v1, %v180_v12  ;;  %v55_v21 = vmul.f32 %v284_v1, %v181_v13  ;;  %v56_v24 = vmul.f32 %v284_v1, %v184_v16  ;;  %v57_v25 = vmul.f32 %v284_v1, %v185_v17 }
   0x6   :  { %v70_v18 = vadd.f32 %v289_v4, %v50_v10  ;;  %v71_v19 = vadd.f32 %v289_v4, %v51_v11  ;;  %v72_v22 = vadd.f32 %v289_v4, %v52_v14  ;;  %v73_v23 = vadd.f32 %v289_v4, %v53_v15 }
   0x7   :  { %v74_v32 = vadd.f32 %v289_v4, %v54_v20  ;;  %v75_v33 = vadd.f32 %v289_v4, %v55_v21  ;;  %v76_v37 = vadd.f32 %v289_v4, %v56_v24  ;;  %v77_v43 = vadd.f32 %v289_v4, %v57_v25 }
   0x8   :  { %vm86_vm0 = vcmp.ge.f32.partialorder %v70_v18, 0.0  ;;  %vm87_vm1 = vcmp.ge.f32.partialorder %v71_v19, 0.0  ;;  %v102_v26 = vmul.f32 0.01, %v70_v18  ;;  %v103_v27 = vmul.f32 0.01, %v71_v19 }
   0x9   :  { %vm88_vm2 = vcmp.ge.f32.partialorder %v72_v22, 0.0  ;;  %vm89_vm3 = vcmp.ge.f32.partialorder %v73_v23, 0.0  ;;  %v104_v28 = vmul.f32 0.01, %v72_v22  ;;  %v105_v29 = vmul.f32 0.01, %v73_v23 }
   0xa   :  { %v118_v30 = vsel %vm86_vm0, %v70_v18, %v102_v26  ;;  %v119_v31 = vsel %vm87_vm1, %v71_v19, %v103_v27  ;;  %vm90_vm4 = vcmp.ge.f32.partialorder %v74_v32, 0.0  ;;  %vm91_vm5 = vcmp.ge.f32.partialorder %v75_v33, 0.0 }
   0xb   :  { %v205_v34 = vpack.c.bf16 %v119_v31, %v118_v30  ;;  %v120_v35 = vsel %vm88_vm2, %v72_v22, %v104_v28  ;;  %v121_v36 = vsel %vm89_vm3, %v73_v23, %v105_v29  ;;  %v106_v41 = vmul.f32 0.01, %v74_v32 }
   0xc   :  { %v210_v40 = vpack.c.bf16 %v121_v36, %v120_v35  ;;  %v107_v42 = vmul.f32 0.01, %v75_v33  ;;  %vm92_vm6 = vcmp.ge.f32.partialorder %v76_v37, 0.0  ;;  %v108_v44 = vmul.f32 0.01, %v76_v37 }
   0xd   :  { %206 = vst [vmem:[%s371_s3] sm:$0xff] %v205_v34   ;;  %v122_v45 = vsel %vm90_vm4, %v74_v32, %v106_v41  ;;  %v188_v46 = vunpack.c.l.bf16 %v245_v38  ;;  %v189_v47 = vunpack.c.h.bf16 %v245_v38  ;;  %v192_v48 = vunpack.c.l.bf16 %v246_v39 }
   0xe   :  { %249 = vst [vmem:[%s371_s3 + $0x8] sm:$0xff] %v210_v40   ;;  %v123_v50 = vsel %vm91_vm5, %v75_v33, %v107_v42  ;;  %vm93_vm7 = vcmp.ge.f32.partialorder %v77_v43, 0.0  ;;  %v109_v51 = vmul.f32 0.01, %v77_v43  ;;  %v124_v52 = vsel %vm92_vm6, %v76_v37, %v108_v44 }
   0xf   :  { %v215_v53 = vpack.c.bf16 %v123_v50, %v122_v45  ;;  %v58_v54 = vmul.f32 %v284_v1, %v188_v46  ;;  %v59_v55 = vmul.f32 %v284_v1, %v189_v47  ;;  %v193_v56 = vunpack.c.h.bf16 %v246_v39 }
  0x10   :  { %v125_v58 = vsel %vm93_vm7, %v77_v43, %v109_v51  ;;  %v60_v59 = vmul.f32 %v284_v1, %v192_v48  ;;  %v196_v60 = vunpack.c.l.bf16 %v247_v49  ;;  %v197_v61 = vunpack.c.h.bf16 %v247_v49 }
  0x11   :  { %250 = vst [vmem:[%s371_s3 + $0x10] sm:$0xff] %v215_v53   ;;  %v220_v62 = vpack.c.bf16 %v125_v58, %v124_v52  ;;  %v78_v63 = vadd.f32 %v289_v4, %v58_v54  ;;  %v79_v0 = vadd.f32 %v289_v4, %v59_v55  ;;  %v61_v2 = vmul.f32 %v284_v1, %v193_v56 }
  0x12   :  { %v80_v3 = vadd.f32 %v289_v4, %v60_v59  ;;  %v62_v5 = vmul.f32 %v284_v1, %v196_v60  ;;  %v63_v6 = vmul.f32 %v284_v1, %v197_v61  ;;  %v200_v7 = vunpack.c.l.bf16 %v248_v57 }
  0x13   :  { %251 = vst [vmem:[%s371_s3 + $0x18] sm:$0xff] %v220_v62   ;;  %vm94_vm8 = vcmp.ge.f32.partialorder %v78_v63, 0.0  ;;  %vm95_vm9 = vcmp.ge.f32.partialorder %v79_v0, 0.0  ;;  %v110_v8 = vmul.f32 0.01, %v78_v63  ;;  %v81_v9 = vadd.f32 %v289_v4, %v61_v2 }
  0x14   :  { %v111_v10 = vmul.f32 0.01, %v79_v0  ;;  %vm96_vm10 = vcmp.ge.f32.partialorder %v80_v3, 0.0  ;;  %v112_v11 = vmul.f32 0.01, %v80_v3  ;;  %v82_v12 = vadd.f32 %v289_v4, %v62_v5 }
  0x15   :  { %v126_v13 = vsel %vm94_vm8, %v78_v63, %v110_v8  ;;  %vm97_vm11 = vcmp.ge.f32.partialorder %v81_v9, 0.0  ;;  %v113_v14 = vmul.f32 0.01, %v81_v9  ;;  %v83_v15 = vadd.f32 %v289_v4, %v63_v6 }
  0x16   :  { %v127_v16 = vsel %vm95_vm9, %v79_v0, %v111_v10  ;;  %v128_v17 = vsel %vm96_vm10, %v80_v3, %v112_v11  ;;  %vm98_vm12 = vcmp.ge.f32.partialorder %v82_v12, 0.0  ;;  %v114_v18 = vmul.f32 0.01, %v82_v12 }
  0x17   :  { %v225_v19 = vpack.c.bf16 %v127_v16, %v126_v13  ;;  %v129_v20 = vsel %vm97_vm11, %v81_v9, %v113_v14  ;;  %vm99_vm13 = vcmp.ge.f32.partialorder %v83_v15, 0.0  ;;  %v115_v21 = vmul.f32 0.01, %v83_v15 }
  0x18   :  { %v230_v22 = vpack.c.bf16 %v129_v20, %v128_v17  ;;  %v130_v23 = vsel %vm98_vm12, %v82_v12, %v114_v18  ;;  %v201_v24 = vunpack.c.h.bf16 %v248_v57  ;;  %v64_v25 = vmul.f32 %v284_v1, %v200_v7 }
  0x19   :  { %252 = vst [vmem:[%s371_s3 + $0x20] sm:$0xff] %v225_v19   ;;  %v131_v26 = vsel %vm99_vm13, %v83_v15, %v115_v21 }
  0x1a   :  { %253 = vst [vmem:[%s371_s3 + $0x28] sm:$0xff] %v230_v22   ;;  %v235_v27 = vpack.c.bf16 %v131_v26, %v130_v23  ;;  %v65_v28 = vmul.f32 %v284_v1, %v201_v24  ;;  %v84_v29 = vadd.f32 %v289_v4, %v64_v25 }
  0x1c   :  { %254 = vst [vmem:[%s371_s3 + $0x30] sm:$0xff] %v235_v27   ;;  %v85_v30 = vadd.f32 %v289_v4, %v65_v28  ;;  %vm100_vm14 = vcmp.ge.f32.partialorder %v84_v29, 0.0  ;;  %v116_v31 = vmul.f32 0.01, %v84_v29 }
  0x1e   :  { %vm101_vm15 = vcmp.ge.f32.partialorder %v85_v30, 0.0  ;;  %v117_v32 = vmul.f32 0.01, %v85_v30  ;;  %v132_v33 = vsel %vm100_vm14, %v84_v29, %v116_v31 }
  0x20   :  { %v133_v34 = vsel %vm101_vm15, %v85_v30, %v117_v32 }
  0x21   :  { %v240_v35 = vpack.c.bf16 %v133_v34, %v132_v33 }
  0x23   :  { %255 = vst [vmem:[%s371_s3 + $0x38] sm:$0xff] %v240_v35  }

// kernel: generator_forward.16
= control target key start
LH: loop header
LB: loop body
LE: loop exit
PB: predicated region body
PF: predicated region fallthrough
CT: control target
= control target key end

     0   :  { %vm179_vm0 = vcmask 130048   ;;  %s778_s1 = inlined_call_operand.vmem [shape: bf16[144,128], index: 1, kind: input, shape index: {}]   ;;  %s779_s0 = inlined_call_operand.vmem [shape: bf16[128,144], index: 0, kind: input, shape index: {}]   ;;  %s780_s2 = inlined_call_operand.vmem [shape: f32[1,128], index: 2, kind: input, shape index: {}]   ;;  %s781_s3 = inlined_call_operand.vmem [shape: bf16[128,128], index: 3, kind: output, shape index: {}]  }
   0x1   :  { %v517_v0 = vld [vmem:[%s778_s1 + $0x38] sm:$0xff]  ;;  %v518_v1 = vld [vmem:[%s778_s1 + $0x40] sm:$0xff]  ;;  %v390_v3 = vld [vmem:[%s779_s0 + $0x8] sm:$0xf0] }
   0x2   :  { %v494_v2 = vld [vmem:[%s779_s0 + $0x4] sm:$0xf]  ;;  %204 = vmatpush.bf16.msra.mxu0 %v517_v0  ;;  %566 = vmatpush.bf16.msra.mxu2 %v517_v0  ;;  %v516_v5 = vld [vmem:[%s778_s1 + $0x30] sm:$0xff]  ;;  %v515_v6 = vld [vmem:[%s778_s1 + $0x28] sm:$0xff] }
   0x3   :  { %v393_v4 = vor.u32 %v494_v2, %v390_v3  ;;  %260 = vmatpush.bf16.msra.mxu1 %v518_v1  ;;  %574 = vmatpush.bf16.msra.mxu3 %v518_v1  ;;  %v504_v7 = vld [vmem:[%s779_s0 + $0x54] sm:$0xf]  ;;  %v430_v8 = vld [vmem:[%s779_s0 + $0x58] sm:$0xf0]  ;;  %v514_v10 = vld [vmem:[%s778_s1 + $0x20] sm:$0xff] }
   0x4   :  { %v433_v9 = vor.u32 %v504_v7, %v430_v8  ;;  %v513_v11 = vld [vmem:[%s778_s1 + $0x18] sm:$0xff]  ;;  %v496_v12 = vld [vmem:[%s779_s0 + $0x14] sm:$0xf]  ;;  %v511_v16 = vld [vmem:[%s778_s1 + $0x8] sm:$0xff] }
   0x5   :  { %v398_v13 = vld [vmem:[%s779_s0 + $0x18] sm:$0xf0]  ;;  %v512_v15 = vld [vmem:[%s778_s1 + $0x10] sm:$0xff]  ;;  %v506_v17 = vld [vmem:[%s779_s0 + $0x64] sm:$0xf] }
   0x6   :  { %486 = vmatmul.msk.bf16.vlgmr.msra.gmra.mxu1 %vm179_vm0, %v393_v4  ;;  %205 = vmatpush.bf16.msra.mxu0 %v516_v5  ;;  %v401_v14 = vor.u32 %v496_v12, %v398_v13  ;;  %v438_v18 = vld [vmem:[%s779_s0 + $0x68] sm:$0xf0]  ;;  %v510_v20 = vld [vmem:[%s778_s1] sm:$0xff]  ;;  %v495_v22 = vld [vmem:[%s779_s0 + $0x4] sm:$0xf0] }
   0x7   :  { %567 = vmatpush.bf16.msra.mxu2 %v516_v5  ;;  %491 = vmatmul.msk.bf16.vlgmr.msra.gmra.mxu3 %vm179_vm0, %v433_v9  ;;  %v441_v19 = vor.u32 %v506_v17, %v438_v18  ;;  %v388_v21 = vld [vmem:[%s779_s0] sm:$0xf]  ;;  %v503_v24 = vld [vmem:[%s779_s0 + $0x44] sm:$0xf0]  ;;  %v498_v27 = vld [vmem:[%s779_s0 + $0x24] sm:$0xf] }
   0x8   :  { %v420_v23 = vld [vmem:[%s779_s0 + $0x40] sm:$0xf]  ;;  %v389_v25 = vor.u32 %v495_v22, %v388_v21  ;;  %v406_v28 = vld [vmem:[%s779_s0 + $0x28] sm:$0xf0]  ;;  %v508_v30 = vld [vmem:[%s779_s0 + $0x74] sm:$0xf] }
   0x9   :  { %v421_v26 = vor.u32 %v503_v24, %v420_v23  ;;  %v409_v29 = vor.u32 %v498_v27, %v406_v28  ;;  %v446_v31 = vld [vmem:[%s779_s0 + $0x78] sm:$0xf0]  ;;  %v396_v33 = vld [vmem:[%s779_s0 + $0x10] sm:$0xf]  ;;  %v497_v34 = vld [vmem:[%s779_s0 + $0x14] sm:$0xf0] }
   0xa   :  { %206 = vmatpush.bf16.msra.mxu0 %v515_v6  ;;  %v449_v32 = vor.u32 %v508_v30, %v446_v31  ;;  %v428_v35 = vld [vmem:[%s779_s0 + $0x50] sm:$0xf]  ;;  %v505_v36 = vld [vmem:[%s779_s0 + $0x54] sm:$0xf0]  ;;  %v397_v37 = vor.u32 %v497_v34, %v396_v33  ;;  %v500_v39 = vld [vmem:[%s779_s0 + $0x34] sm:$0xf] }
   0xb   :  { %568 = vmatpush.bf16.msra.mxu2 %v515_v6  ;;  %v429_v38 = vor.u32 %v505_v36, %v428_v35  ;;  %v414_v40 = vld [vmem:[%s779_s0 + $0x38] sm:$0xf0]  ;;  %v404_v42 = vld [vmem:[%s779_s0 + $0x20] sm:$0xf]  ;;  %v499_v43 = vld [vmem:[%s779_s0 + $0x24] sm:$0xf0] }
   0xc   :  { %v417_v41 = vor.u32 %v500_v39, %v414_v40  ;;  %v436_v44 = vld [vmem:[%s779_s0 + $0x60] sm:$0xf]  ;;  %v507_v45 = vld [vmem:[%s779_s0 + $0x64] sm:$0xf0]  ;;  %v405_v46 = vor.u32 %v499_v43, %v404_v42  ;;  %v502_v48 = vld [vmem:[%s779_s0 + $0x44] sm:$0xf] }
   0xd   :  { %v437_v47 = vor.u32 %v507_v45, %v436_v44  ;;  %v422_v49 = vld [vmem:[%s779_s0 + $0x48] sm:$0xf0]  ;;  %v412_v51 = vld [vmem:[%s779_s0 + $0x30] sm:$0xf]  ;;  %v501_v52 = vld [vmem:[%s779_s0 + $0x34] sm:$0xf0] }
   0xe   :  { %207 = vmatpush.bf16.msra.mxu0 %v514_v10  ;;  %v425_v50 = vor.u32 %v502_v48, %v422_v49  ;;  %v444_v53 = vld [vmem:[%s779_s0 + $0x70] sm:$0xf]  ;;  %v509_v54 = vld [vmem:[%s779_s0 + $0x74] sm:$0xf0]  ;;  %v413_v55 = vor.u32 %v501_v52, %v412_v51  ;;  %v730_v61 = vld [vmem:[%s780_s2] ss:$0 sm:$0xff] }
   0xf   :  { %569 = vmatpush.bf16.msra.mxu2 %v514_v10  ;;  %v445_v56 = vor.u32 %v509_v54, %v444_v53 }
  0x12   :  { %208 = vmatpush.bf16.msra.mxu0 %v513_v11 }
  0x13   :  { %570 = vmatpush.bf16.msra.mxu2 %v513_v11 }
  0x16   :  { %487 = vmatmul.msk.bf16.gmra.mxu1 %vm179_vm0, %v401_v14  ;;  %209 = vmatpush.bf16.msra.mxu0 %v512_v15 }
  0x17   :  { %571 = vmatpush.bf16.msra.mxu2 %v512_v15  ;;  %492 = vmatmul.msk.bf16.gmra.mxu3 %vm179_vm0, %v441_v19 }
  0x1a   :  { %210 = vmatpush.bf16.msra.mxu0 %v511_v16 }
  0x1b   :  { %572 = vmatpush.bf16.msra.mxu2 %v511_v16 }
  0x1e   :  { %211 = vmatpush.bf16.msra.mxu0 %v510_v20 }
  0x1f   :  { %573 = vmatpush.bf16.msra.mxu2 %v510_v20 }
  0x21   :  { %212 = vmatmul.bf16.vlgmr.msra.gmra.mxu0 %v389_v25 }
  0x22   :  { %232 = vmatmul.bf16.vlgmr.msra.gmra.mxu2 %v421_v26 }
  0x26   :  { %488 = vmatmul.msk.bf16.gmra.mxu1 %vm179_vm0, %v409_v29 }
  0x27   :  { %493 = vmatmul.msk.bf16.gmra.mxu3 %vm179_vm0, %v449_v32 }
  0x31   :  { %217 = vmatmul.bf16.gmra.mxu0 %v397_v37 }
  0x32   :  { %237 = vmatmul.bf16.gmra.mxu2 %v429_v38 }
  0x36   :  { %489 = vmatmul.msk.bf16.gmra.mxu1 %vm179_vm0, %v417_v41 }
  0x41   :  { %222 = vmatmul.bf16.gmra.mxu0 %v405_v46 }
  0x42   :  { %242 = vmatmul.bf16.gmra.mxu2 %v437_v47 }
  0x46   :  { %490 = vmatmul.msk.bf16.gmra.mxu1 %vm179_vm0, %v425_v50 }
  0x51   :  { %227 = vmatmul.bf16.gmra.mxu0 %v413_v55 }
  0x52   :  { %247 = vmatmul.bf16.gmra.mxu2 %v445_v56 }
  0x83   :  { %v262_v57 = vpop.f32.mrf.mxu1 }
  0x8a   :  { %v287_v12 = vpop.f32.mrf.mxu3 }
  0x8b   :  { %v264_v58 = vpop.f32.mrf.mxu1 }
  0x92   :  { %v289_v21 = vpop.f32.mrf.mxu3 }
  0x93   :  { %v267_v59 = vpop.f32.mrf.mxu1 }
  0x9a   :  { %v292_v37 = vpop.f32.mrf.mxu3 }
  0x9b   :  { %v269_v60 = vpop.f32.mrf.mxu1 }
  0x9e   :  { %v213_v62 = vpop.f32.mrf.mxu0 }
  0x9f   :  { %v214_v63 = vadd.f32 %v730_v61, %v213_v62 }
  0xa1   :  { %v263_v1 = vadd.f32 %v262_v57, %v214_v63 }
  0xa2   :  { %v294_v54 = vpop.f32.mrf.mxu3 }
  0xa3   :  { %v272_v0 = vpop.f32.mrf.mxu1  ;;  %v318_v5 = vmul.f32 0.01, %v263_v1  ;;  %vm302_vm1 = vcmp.ge.f32.partialorder %v263_v1, 0.0 }
  0xa5   :  { %v233_v2 = vpop.f32.mrf.mxu2  ;;  %v334_v9 = vsel %vm302_vm1, %v263_v1, %v318_v5 }
  0xa6   :  { %v215_v3 = vpop.f32.mrf.mxu0  ;;  %v234_v45 = vadd.f32 %v730_v61, %v233_v2 }
  0xa7   :  { %v216_v4 = vadd.f32 %v730_v61, %v215_v3 }
  0xa9   :  { %v265_v6 = vadd.f32 %v264_v58, %v216_v4 }
  0xab   :  { %vm303_vm2 = vcmp.ge.f32.partialorder %v265_v6, 0.0  ;;  %v319_v7 = vmul.f32 0.01, %v265_v6  ;;  %v274_v8 = vpop.f32.mrf.mxu1 }
  0xad   :  { %v335_v10 = vsel %vm303_vm2, %v265_v6, %v319_v7  ;;  %v235_v11 = vpop.f32.mrf.mxu2 }
  0xae   :  { %v522_v13 = vpack.c.bf16 %v335_v10, %v334_v9  ;;  %v218_v14 = vpop.f32.mrf.mxu0  ;;  %v236_v52 = vadd.f32 %v730_v61, %v235_v11 }
  0xaf   :  { %v219_v15 = vadd.f32 %v730_v61, %v218_v14  ;;  %v297_v14 = vpop.f32.mrf.mxu3 }
  0xb0   :  { %523 = vst [vmem:[%s781_s3] sm:$0xff] %v522_v13  }
  0xb1   :  { %v268_v17 = vadd.f32 %v267_v59, %v219_v15 }
  0xb3   :  { %v738_v16 = vpop.f32.mrf.mxu1  ;;  %v320_v23 = vmul.f32 0.01, %v268_v17  ;;  %vm304_vm3 = vcmp.ge.f32.partialorder %v268_v17, 0.0 }
  0xb5   :  { %v238_v18 = vpop.f32.mrf.mxu2  ;;  %v336_v28 = vsel %vm304_vm3, %v268_v17, %v320_v23 }
  0xb6   :  { %v220_v19 = vpop.f32.mrf.mxu0  ;;  %v239_v22 = vadd.f32 %v730_v61, %v238_v18 }
  0xb7   :  { %v221_v20 = vadd.f32 %v730_v61, %v220_v19 }
  0xb8   :  { %v288_v27 = vadd.f32 %v287_v12, %v239_v22 }
  0xb9   :  { %v270_v24 = vadd.f32 %v269_v60, %v221_v20 }
  0xba   :  { %v328_v34 = vmul.f32 0.01, %v288_v27  ;;  %vm312_vm5 = vcmp.ge.f32.partialorder %v288_v27, 0.0 }
  0xbb   :  { %vm305_vm4 = vcmp.ge.f32.partialorder %v270_v24, 0.0  ;;  %v321_v25 = vmul.f32 0.01, %v270_v24  ;;  %v742_v26 = vpop.f32.mrf.mxu1 }
  0xbc   :  { %v344_v40 = vsel %vm312_vm5, %v288_v27, %v328_v34 }
  0xbd   :  { %v337_v29 = vsel %vm305_vm4, %v270_v24, %v321_v25  ;;  %v240_v30 = vpop.f32.mrf.mxu2 }
  0xbe   :  { %v527_v31 = vpack.c.bf16 %v337_v29, %v336_v28  ;;  %v241_v32 = vadd.f32 %v730_v61, %v240_v30  ;;  %v223_v33 = vpop.f32.mrf.mxu0  ;;  %v299_v29 = vpop.f32.mrf.mxu3 }
  0xbf   :  { %v224_v36 = vadd.f32 %v730_v61, %v223_v33 }
  0xc0   :  { %559 = vst [vmem:[%s781_s3 + $0x8] sm:$0xff] %v527_v31   ;;  %v290_v35 = vadd.f32 %v289_v21, %v241_v32 }
  0xc1   :  { %v273_v43 = vadd.f32 %v272_v0, %v224_v36 }
  0xc2   :  { %vm313_vm6 = vcmp.ge.f32.partialorder %v290_v35, 0.0  ;;  %v329_v38 = vmul.f32 0.01, %v290_v35 }
  0xc3   :  { %v282_v39 = vpop.f32.mrf.mxu1  ;;  %v322_v50 = vmul.f32 0.01, %v273_v43  ;;  %vm306_vm7 = vcmp.ge.f32.partialorder %v273_v43, 0.0 }
  0xc4   :  { %v345_v41 = vsel %vm313_vm6, %v290_v35, %v329_v38  ;;  %v283_v48 = vadd.f32 %v282_v39, %v234_v45 }
  0xc5   :  { %v547_v42 = vpack.c.bf16 %v345_v41, %v344_v40  ;;  %v243_v44 = vpop.f32.mrf.mxu2  ;;  %v338_v59 = vsel %vm306_vm7, %v273_v43, %v322_v50 }
  0xc6   :  { %v225_v46 = vpop.f32.mrf.mxu0  ;;  %v244_v49 = vadd.f32 %v730_v61, %v243_v44  ;;  %v326_v56 = vmul.f32 0.01, %v283_v48  ;;  %vm310_vm9 = vcmp.ge.f32.partialorder %v283_v48, 0.0 }
  0xc7   :  { %563 = vst [vmem:[%s781_s3 + $0x28] sm:$0xff] %v547_v42   ;;  %v226_v47 = vadd.f32 %v730_v61, %v225_v46 }
  0xc8   :  { %v293_v57 = vadd.f32 %v292_v37, %v244_v49  ;;  %v342_v3 = vsel %vm310_vm9, %v283_v48, %v326_v56 }
  0xc9   :  { %v275_v51 = vadd.f32 %v274_v8, %v226_v47 }
  0xca   :  { %v330_v4 = vmul.f32 0.01, %v293_v57  ;;  %vm314_vm11 = vcmp.ge.f32.partialorder %v293_v57, 0.0 }
  0xcb   :  { %vm307_vm8 = vcmp.ge.f32.partialorder %v275_v51, 0.0  ;;  %v323_v53 = vmul.f32 0.01, %v275_v51  ;;  %v284_v55 = vpop.f32.mrf.mxu1 }
  0xcc   :  { %v285_v58 = vadd.f32 %v284_v55, %v236_v52  ;;  %v346_v10 = vsel %vm314_vm11, %v293_v57, %v330_v4 }
  0xcd   :  { %v339_v60 = vsel %vm307_vm8, %v275_v51, %v323_v53  ;;  %v245_v62 = vpop.f32.mrf.mxu2 }
  0xce   :  { %v532_v63 = vpack.c.bf16 %v339_v60, %v338_v59  ;;  %vm311_vm10 = vcmp.ge.f32.partialorder %v285_v58, 0.0  ;;  %v327_v0 = vmul.f32 0.01, %v285_v58  ;;  %v246_v1 = vadd.f32 %v730_v61, %v245_v62  ;;  %v228_v2 = vpop.f32.mrf.mxu0 }
  0xcf   :  { %v229_v8 = vadd.f32 %v730_v61, %v228_v2 }
  0xd0   :  { %560 = vst [vmem:[%s781_s3 + $0x10] sm:$0xff] %v532_v63   ;;  %v343_v5 = vsel %vm311_vm10, %v285_v58, %v327_v0  ;;  %v295_v6 = vadd.f32 %v294_v54, %v246_v1 }
  0xd1   :  { %v542_v7 = vpack.c.bf16 %v343_v5, %v342_v3  ;;  %v278_v13 = vadd.f32 %v738_v16, %v229_v8 }
  0xd2   :  { %vm315_vm12 = vcmp.ge.f32.partialorder %v295_v6, 0.0  ;;  %v331_v9 = vmul.f32 0.01, %v295_v6 }
  0xd3   :  { %562 = vst [vmem:[%s781_s3 + $0x20] sm:$0xff] %v542_v7   ;;  %v324_v20 = vmul.f32 0.01, %v278_v13  ;;  %vm308_vm13 = vcmp.ge.f32.partialorder %v278_v13, 0.0 }
  0xd4   :  { %v347_v11 = vsel %vm315_vm12, %v295_v6, %v331_v9 }
  0xd5   :  { %v552_v12 = vpack.c.bf16 %v347_v11, %v346_v10  ;;  %v248_v15 = vpop.f32.mrf.mxu2  ;;  %v340_v24 = vsel %vm308_vm13, %v278_v13, %v324_v20 }
  0xd6   :  { %v230_v17 = vpop.f32.mrf.mxu0  ;;  %v249_v19 = vadd.f32 %v730_v61, %v248_v15 }
  0xd7   :  { %564 = vst [vmem:[%s781_s3 + $0x30] sm:$0xff] %v552_v12   ;;  %v231_v18 = vadd.f32 %v730_v61, %v230_v17 }
  0xd8   :  { %v298_v23 = vadd.f32 %v297_v14, %v249_v19 }
  0xd9   :  { %v280_v21 = vadd.f32 %v742_v26, %v231_v18 }
  0xda   :  { %v332_v30 = vmul.f32 0.01, %v298_v23  ;;  %vm316_vm15 = vcmp.ge.f32.partialorder %v298_v23, 0.0 }
  0xdb   :  { %vm309_vm14 = vcmp.ge.f32.partialorder %v280_v21, 0.0  ;;  %v325_v22 = vmul.f32 0.01, %v280_v21 }
  0xdc   :  { %v348_v32 = vsel %vm316_vm15, %v298_v23, %v332_v30 }
  0xdd   :  { %v341_v16 = vsel %vm309_vm14, %v280_v21, %v325_v22  ;;  %v250_v25 = vpop.f32.mrf.mxu2 }
  0xde   :  { %v537_v27 = vpack.c.bf16 %v341_v16, %v340_v24  ;;  %v251_v28 = vadd.f32 %v730_v61, %v250_v25 }
  0xe0   :  { %561 = vst [vmem:[%s781_s3 + $0x18] sm:$0xff] %v537_v27   ;;  %v300_v31 = vadd.f32 %v299_v29, %v251_v28 }
  0xe2   :  { %vm317_vm0 = vcmp.ge.f32.partialorder %v300_v31, 0.0  ;;  %v333_v26 = vmul.f32 0.01, %v300_v31 }
  0xe4   :  { %v349_v33 = vsel %vm317_vm0, %v300_v31, %v333_v26 }
  0xe5   :  { %v557_v34 = vpack.c.bf16 %v349_v33, %v348_v32 }
  0xe7   :  { %565 = vst [vmem:[%s781_s3 + $0x38] sm:$0xff] %v557_v34  }

// kernel: generator_forward.17
= control target key start
LH: loop header
LB: loop body
LE: loop exit
PB: predicated region body
PF: predicated region fallthrough
CT: control target
= control target key end

     0   :  { %s920_s12 = smov 0   ;;  %s922_s13 = smov 0   ;;  %s992_s0 = inlined_call_operand.vmem [shape: bf16[4,128,64], index: 0, kind: input, shape index: {}]   ;;  %s993_s1 = inlined_call_operand.vmem [shape: bf16[4,64,128], index: 1, kind: input, shape index: {}]   ;;  %s994_s2 = inlined_call_operand.vmem [shape: bf16[4,128,128], index: 2, kind: output, shape index: {0}]   ;;  %s995_s3 = inlined_call_operand.vmem [shape: f32[4,1,8,256], index: 3, kind: output, shape index: {1}]  }
   0x1   :  { %s924_s14 = smov 0  }
   0x2 LB: > { %s33_s15 = sadd.s32 1, %s894_s13  ;;  %p710_p0 = scmp.ge.s32.totalorder %s898_s14, 1  ;;  %s898_s14 = sphi %s924_s14, %s14_s14   ;;  %s894_s13 = sphi %s922_s13, %s997_s13   ;;  %s890_s12 = sphi %s920_s12, %s996_s12  }
   0x3   : > { %p35_p1 = scmp.ge.s32.totalorder %s33_s15, 4  ;;  %p192_p2 = scmp.lt.s32.totalorder %s898_s14, 5 }
   0x5   : > { %s999_s15 = smov (%p35_p1, %s33_s15), 0  ;;  %p193_p3 = pnand %p710_p0, %p192_p2 }
   0x6   : > { %p246_p4 = scmp.lt.s32.totalorder (!%p193_p3), %s890_s12, 3 }
   0x7   : > { %196 = sbr.rel (%p193_p3) target bundleno = 222 (0xde), region = 28 }
   0xc   : > { %s1001_s12 = smov (!%p246_p4, %s890_s12), 3  ;;  %vm376_vm0 = vcmask 523264  }
   0xd   : > { %s778_s16 = sshll.u32 %s1001_s12, 5  ;;  %s777_s20 = sshll.u32 %s1001_s12, 6 }
   0xe   : > { %s266_s19 = scalar_lea.vmem %s993_s1, %s778_s16  ;;  %s256_s23 = scalar_lea.vmem %s992_s0, %s777_s20 }
   0xf   : > { %v792_v0 = vld [vmem:[%s266_s19 + $0x18] sm:$0xff]  ;;  %v791_v1 = vld [vmem:[%s266_s19 + $0x10] sm:$0xff]  ;;  %v790_v2 = vld [vmem:[%s266_s19 + $0x8] sm:$0xff]  ;;  %s965_s26 = scalar_lea.vmem %s994_s2, %s777_s20  ;;  %s780_s27 = sshll.u32 %s1001_s12, 4 }
  0x10   : > { %405 = vmatpush.bf16.msra.mxu0 %v792_v0  ;;  %840 = vmatpush.bf16.msra.mxu1 %v792_v0  ;;  %v789_v3 = vld [vmem:[%s266_s19] sm:$0xff]  ;;  %v783_v5 = vld [vmem:[%s256_s23 + $0x10] sm:$0xff]  ;;  %v782_v8 = vld [vmem:[%s256_s23 + $0x8] sm:$0xff]  ;;  %s286_s30 = scalar_lea.vmem %s995_s3, %s780_s27 }
  0x11   : > { %841 = vmatpush.bf16.msra.mxu2 %v792_v0  ;;  %842 = vmatpush.bf16.msra.mxu3 %v792_v0  ;;  %v781_v4 = vld [vmem:[%s256_s23] sm:$0xff]  ;;  %v787_v7 = vld [vmem:[%s256_s23 + $0x30] sm:$0xff]  ;;  %v784_v9 = vld [vmem:[%s256_s23 + $0x18] sm:$0xff] }
  0x12   : > { %v785_v6 = vld [vmem:[%s256_s23 + $0x20] sm:$0xff]  ;;  %v786_v10 = vld [vmem:[%s256_s23 + $0x28] sm:$0xff]  ;;  %v788_v11 = vld [vmem:[%s256_s23 + $0x38] sm:$0xff] }
  0x14   : > { %406 = vmatpush.bf16.msra.mxu0 %v791_v1  ;;  %843 = vmatpush.bf16.msra.mxu1 %v791_v1 }
  0x15   : > { %844 = vmatpush.bf16.msra.mxu2 %v791_v1  ;;  %845 = vmatpush.bf16.msra.mxu3 %v791_v1 }
  0x18   : > { %407 = vmatpush.bf16.msra.mxu0 %v790_v2  ;;  %846 = vmatpush.bf16.msra.mxu1 %v790_v2 }
  0x19   : > { %847 = vmatpush.bf16.msra.mxu2 %v790_v2  ;;  %848 = vmatpush.bf16.msra.mxu3 %v790_v2 }
  0x1c   : > { %408 = vmatpush.bf16.msra.mxu0 %v789_v3  ;;  %849 = vmatpush.bf16.msra.mxu1 %v789_v3 }
  0x1d   : > { %850 = vmatpush.bf16.msra.mxu2 %v789_v3  ;;  %851 = vmatpush.bf16.msra.mxu3 %v789_v3 }
  0x1f   : > { %767 = vmatmul.msk.bf16.vlgmr.msra.gmra.mxu0 %vm376_vm0, %v781_v4  ;;  %769 = vmatmul.msk.bf16.vlgmr.msra.gmra.mxu1 %vm376_vm0, %v783_v5 }
  0x20   : > { %771 = vmatmul.msk.bf16.vlgmr.msra.gmra.mxu2 %vm376_vm0, %v785_v6  ;;  %773 = vmatmul.msk.bf16.vlgmr.msra.gmra.mxu3 %vm376_vm0, %v787_v7 }
  0x2f   : > { %768 = vmatmul.msk.bf16.gmra.mxu0 %vm376_vm0, %v782_v8  ;;  %770 = vmatmul.msk.bf16.gmra.mxu1 %vm376_vm0, %v784_v9 }
  0x30   : > { %772 = vmatmul.msk.bf16.gmra.mxu2 %vm376_vm0, %v786_v10  ;;  %774 = vmatmul.msk.bf16.gmra.mxu3 %vm376_vm0, %v788_v11 }
  0x9c   : > { %v410_v12 = vpop.f32.mrf.mxu0  ;;  %v420_v13 = vpop.f32.mrf.mxu1 }
  0x9d   : > { %v482_v27 = vmul.f32 %v410_v12, %v410_v12  ;;  %v486_v41 = vmul.f32 %v420_v13, %v420_v13 }
  0xa3   : > { %v430_v14 = vpop.f32.mrf.mxu2  ;;  %v958_v15 = vpop.f32.mrf.mxu3 }
  0xa4   : > { %v412_v16 = vpop.f32.mrf.mxu0  ;;  %v422_v17 = vpop.f32.mrf.mxu1  ;;  %v490_v57 = vmul.f32 %v430_v14, %v430_v14  ;;  %v494_v5 = vmul.f32 %v958_v15, %v958_v15 }
  0xa5   : > { %v796_v18 = vpack.c.bf16 %v412_v16, %v410_v12  ;;  %v806_v19 = vpack.c.bf16 %v422_v17, %v420_v13  ;;  %v483_v26 = vmul.f32 %v412_v16, %v412_v16  ;;  %v498_v29 = vadd.f32 %v412_v16, %v410_v12 }
  0xa6   : > { %v487_v44 = vmul.f32 %v422_v17, %v422_v17 }
  0xa7   : > { %797 = vst [vmem:[%s965_s26] sm:$0xff] %v796_v18   ;;  %v519_v30 = vadd.f32 %v483_v26, %v482_v27 }
  0xa8   : > { %834 = vst [vmem:[%s965_s26 + $0x10] sm:$0xff] %v806_v19  }
  0xab   : > { %v432_v20 = vpop.f32.mrf.mxu2  ;;  %v442_v21 = vpop.f32.mrf.mxu3 }
  0xac   : > { %v415_v22 = vpop.f32.mrf.mxu0  ;;  %v425_v23 = vpop.f32.mrf.mxu1  ;;  %v816_v24 = vpack.c.bf16 %v432_v20, %v430_v14  ;;  %v826_v25 = vpack.c.bf16 %v442_v21, %v958_v15  ;;  %v491_v60 = vmul.f32 %v432_v20, %v432_v20  ;;  %v495_v8 = vmul.f32 %v442_v21, %v442_v21 }
  0xad   : > { %v484_v28 = vmul.f32 %v415_v22, %v415_v22  ;;  %v499_v31 = vadd.f32 %v498_v29, %v415_v22  ;;  %v488_v47 = vmul.f32 %v425_v23, %v425_v23 }
  0xae   : > { %836 = vst [vmem:[%s965_s26 + $0x20] sm:$0xff] %v816_v24  }
  0xaf   : > { %838 = vst [vmem:[%s965_s26 + $0x30] sm:$0xff] %v826_v25   ;;  %v520_v34 = vadd.f32 %v519_v30, %v484_v28 }
  0xb3   : > { %v435_v32 = vpop.f32.mrf.mxu2  ;;  %v445_v33 = vpop.f32.mrf.mxu3 }
  0xb4   : > { %v417_v35 = vpop.f32.mrf.mxu0  ;;  %v427_v36 = vpop.f32.mrf.mxu1  ;;  %v492_v63 = vmul.f32 %v435_v32, %v435_v32  ;;  %v496_v11 = vmul.f32 %v445_v33, %v445_v33 }
  0xb5   : > { %v801_v37 = vpack.c.bf16 %v417_v35, %v415_v22  ;;  %v485_v38 = vmul.f32 %v417_v35, %v417_v35  ;;  %v500_v39 = vadd.f32 %v499_v31, %v417_v35  ;;  %v811_v40 = vpack.c.bf16 %v427_v36, %v425_v23 }
  0xb6   : > { %v489_v54 = vmul.f32 %v427_v36, %v427_v36 }
  0xb7   : > { %833 = vst [vmem:[%s965_s26 + $0x8] sm:$0xff] %v801_v37   ;;  %v501_v42 = vadd.f32 %v500_v39, %v420_v13  ;;  %v521_v43 = vadd.f32 %v520_v34, %v485_v38 }
  0xb8   : > { %835 = vst [vmem:[%s965_s26 + $0x18] sm:$0xff] %v811_v40  }
  0xb9   : > { %v522_v45 = vadd.f32 %v521_v43, %v486_v41  ;;  %v502_v46 = vadd.f32 %v501_v42, %v422_v17 }
  0xbb   : > { %v503_v48 = vadd.f32 %v502_v46, %v425_v23  ;;  %v523_v49 = vadd.f32 %v522_v45, %v487_v44  ;;  %v437_v50 = vpop.f32.mrf.mxu2  ;;  %v447_v51 = vpop.f32.mrf.mxu3 }
  0xbc   : > { %v821_v52 = vpack.c.bf16 %v437_v50, %v435_v32  ;;  %v831_v53 = vpack.c.bf16 %v447_v51, %v445_v33  ;;  %v493_v3 = vmul.f32 %v437_v50, %v437_v50  ;;  %v497_v16 = vmul.f32 %v447_v51, %v447_v51 }
  0xbd   : > { %v504_v55 = vadd.f32 %v503_v48, %v427_v36  ;;  %v524_v56 = vadd.f32 %v523_v49, %v488_v47 }
  0xbe   : > { %837 = vst [vmem:[%s965_s26 + $0x28] sm:$0xff] %v821_v52  }
  0xbf   : > { %v505_v58 = vadd.f32 %v504_v55, %v430_v14  ;;  %v525_v59 = vadd.f32 %v524_v56, %v489_v54  ;;  %839 = vst [vmem:[%s965_s26 + $0x38] sm:$0xff] %v831_v53  }
  0xc1   : > { %v526_v61 = vadd.f32 %v525_v59, %v490_v57  ;;  %v506_v62 = vadd.f32 %v505_v58, %v432_v20 }
  0xc3   : > { %v507_v0 = vadd.f32 %v506_v62, %v435_v32  ;;  %v527_v1 = vadd.f32 %v526_v61, %v491_v60 }
  0xc5   : > { %v528_v2 = vadd.f32 %v527_v1, %v492_v63  ;;  %v508_v4 = vadd.f32 %v507_v0, %v437_v50 }
  0xc7   : > { %v509_v6 = vadd.f32 %v508_v4, %v958_v15  ;;  %v529_v7 = vadd.f32 %v528_v2, %v493_v3 }
  0xc9   : > { %v530_v9 = vadd.f32 %v529_v7, %v494_v5  ;;  %v510_v10 = vadd.f32 %v509_v6, %v442_v21 }
  0xcb   : > { %v511_v12 = vadd.f32 %v510_v10, %v445_v33  ;;  %v531_v13 = vadd.f32 %v530_v9, %v495_v8 }
  0xcd   : > { %v532_v14 = vadd.f32 %v531_v13, %v496_v11  ;;  %v512_v17 = vadd.f32 %v511_v12, %v447_v51 }
  0xcf   : > { %v513_v18 = vrot.slane %v512_v17, 4  ;;  %v533_v19 = vadd.f32 %v532_v14, %v497_v16 }
  0xd1   : > { %v514_v20 = vadd.f32 %v513_v18, %v512_v17  ;;  %v534_v22 = vrot.slane %v533_v19, 4 }
  0xd3   : > { %v515_v23 = vrot.slane %v514_v20, 2  ;;  %v535_v24 = vadd.f32 %v534_v22, %v533_v19 }
  0xd5   : > { %v516_v25 = vadd.f32 %v515_v23, %v514_v20  ;;  %v536_v15 = vrot.slane %v535_v24, 2 }
  0xd7   : > { %v517_v26 = vrot.slane %v516_v25, 1  ;;  %v537_v27 = vadd.f32 %v536_v15, %v535_v24 }
  0xd9   : > { %v518_v21 = vadd.f32 %v517_v26, %v516_v25  ;;  %v538_v28 = vrot.slane %v537_v27, 1 }
  0xdb   : > { %v539_v29 = vadd.f32 %v538_v28, %v537_v27  ;;  %540 = vst [vmem:[%s286_s30] sm:$0xff] %v518_v21 }
  0xdd   : > { %541 = vst [vmem:[%s286_s30 + $0x8] sm:$0xff] %v539_v29 }
  0xde PF: > { %s14_s14 = sadd.s32 1, %s898_s14   ;;  %s996_s12 = smov %s894_s13 }
  0xdf   : > { %p11_p5 = scmp.ge.s32.totalorder %s14_s14, 6   ;;  %s997_s13 = smov %s999_s15 }
  0xe1   :  { %13 = sbr.rel (!%p11_p5) target bundleno = 2 (0x2), region = 73 }

// kernel: generator_forward.18
= control target key start
LH: loop header
LB: loop body
LE: loop exit
PB: predicated region body
PF: predicated region fallthrough
CT: control target
= control target key end

     0   :  { %s1304_s0 = inlined_call_operand.vmem [shape: bf16[512,128], index: 0, kind: input, shape index: {}]   ;;  %s1305_s1 = inlined_call_operand.vmem [shape: f32[1,128], index: 1, kind: input, shape index: {}]   ;;  %s1306_s2 = inlined_call_operand.vmem [shape: f32[1,128], index: 2, kind: input, shape index: {}]   ;;  %s1307_s3 = inlined_call_operand.vmem [shape: bf16[512,128], index: 3, kind: output, shape index: {}]  }
   0x1   :  { %v603_v0 = vld [vmem:[%s1304_s0] sm:$0xff]   ;;  %v890_v5 = vld [vmem:[%s1304_s0 + $0x8] sm:$0xff]   ;;  %v891_v8 = vld [vmem:[%s1304_s0 + $0x10] sm:$0xff]  }
   0x2   :  { %v980_v1 = vld [vmem:[%s1305_s1] ss:$0 sm:$0xff]  ;;  %v604_v2 = vunpack.c.l.bf16 %v603_v0  ;;  %v605_v3 = vunpack.c.h.bf16 %v603_v0  ;;  %v608_v6 = vunpack.c.l.bf16 %v890_v5  ;;  %v609_v7 = vunpack.c.h.bf16 %v890_v5  ;;  %v892_v9 = vld [vmem:[%s1304_s0 + $0x18] sm:$0xff]   ;;  %v894_v39 = vld [vmem:[%s1304_s0 + $0x28] sm:$0xff]  }
   0x3   :  { %v985_v4 = vld [vmem:[%s1306_s2] ss:$0 sm:$0xff]  ;;  %v612_v12 = vunpack.c.l.bf16 %v891_v8  ;;  %v613_v13 = vunpack.c.h.bf16 %v891_v8  ;;  %v616_v16 = vunpack.c.l.bf16 %v892_v9  ;;  %v617_v17 = vunpack.c.h.bf16 %v892_v9  ;;  %v895_v49 = vld [vmem:[%s1304_s0 + $0x30] sm:$0xff]   ;;  %v896_v57 = vld [vmem:[%s1304_s0 + $0x38] sm:$0xff]  }
   0x4   :  { %v146_v10 = vmul.f32 %v980_v1, %v604_v2  ;;  %v147_v11 = vmul.f32 %v980_v1, %v605_v3  ;;  %v148_v14 = vmul.f32 %v980_v1, %v608_v6  ;;  %v149_v15 = vmul.f32 %v980_v1, %v609_v7  ;;  %v893_v38 = vld [vmem:[%s1304_s0 + $0x20] sm:$0xff]  }
   0x5   :  { %v150_v20 = vmul.f32 %v980_v1, %v612_v12  ;;  %v151_v21 = vmul.f32 %v980_v1, %v613_v13  ;;  %v152_v24 = vmul.f32 %v980_v1, %v616_v16  ;;  %v153_v25 = vmul.f32 %v980_v1, %v617_v17 }
   0x6   :  { %v214_v18 = vadd.f32 %v985_v4, %v146_v10  ;;  %v215_v19 = vadd.f32 %v985_v4, %v147_v11  ;;  %v216_v22 = vadd.f32 %v985_v4, %v148_v14  ;;  %v217_v23 = vadd.f32 %v985_v4, %v149_v15 }
   0x7   :  { %v218_v32 = vadd.f32 %v985_v4, %v150_v20  ;;  %v219_v33 = vadd.f32 %v985_v4, %v151_v21  ;;  %v220_v37 = vadd.f32 %v985_v4, %v152_v24  ;;  %v221_v43 = vadd.f32 %v985_v4, %v153_v25  ;;  %v898_v20 = vld [vmem:[%s1304_s0 + $0x48] sm:$0xff]  }
   0x8   :  { %vm278_vm0 = vcmp.ge.f32.partialorder %v214_v18, 0.0  ;;  %vm279_vm1 = vcmp.ge.f32.partialorder %v215_v19, 0.0  ;;  %v342_v26 = vmul.f32 0.2, %v214_v18  ;;  %v343_v27 = vmul.f32 0.2, %v215_v19 }
   0x9   :  { %vm280_vm2 = vcmp.ge.f32.partialorder %v216_v22, 0.0  ;;  %vm281_vm3 = vcmp.ge.f32.partialorder %v217_v23, 0.0  ;;  %v344_v28 = vmul.f32 0.2, %v216_v22  ;;  %v345_v29 = vmul.f32 0.2, %v217_v23 }
   0xa   :  { %v406_v30 = vsel %vm278_vm0, %v214_v18, %v342_v26  ;;  %v407_v31 = vsel %vm279_vm1, %v215_v19, %v343_v27  ;;  %vm282_vm4 = vcmp.ge.f32.partialorder %v218_v32, 0.0  ;;  %vm283_vm5 = vcmp.ge.f32.partialorder %v219_v33, 0.0  ;;  %v897_v19 = vld [vmem:[%s1304_s0 + $0x40] sm:$0xff]  }
   0xb   :  { %v733_v34 = vpack.c.bf16 %v407_v31, %v406_v30  ;;  %v408_v35 = vsel %vm280_vm2, %v216_v22, %v344_v28  ;;  %v409_v36 = vsel %vm281_vm3, %v217_v23, %v345_v29  ;;  %v346_v41 = vmul.f32 0.2, %v218_v32  ;;  %v899_v28 = vld [vmem:[%s1304_s0 + $0x50] sm:$0xff]  }
   0xc   :  { %v738_v40 = vpack.c.bf16 %v409_v36, %v408_v35  ;;  %v347_v42 = vmul.f32 0.2, %v219_v33  ;;  %vm284_vm6 = vcmp.ge.f32.partialorder %v220_v37, 0.0  ;;  %v348_v44 = vmul.f32 0.2, %v220_v37 }
   0xd   :  { %734 = vst [vmem:[%s1307_s3] sm:$0xff] %v733_v34   ;;  %v410_v45 = vsel %vm282_vm4, %v218_v32, %v346_v41  ;;  %v620_v46 = vunpack.c.l.bf16 %v893_v38  ;;  %v621_v47 = vunpack.c.h.bf16 %v893_v38  ;;  %v624_v48 = vunpack.c.l.bf16 %v894_v39 }
   0xe   :  { %921 = vst [vmem:[%s1307_s3 + $0x8] sm:$0xff] %v738_v40   ;;  %v411_v50 = vsel %vm283_vm5, %v219_v33, %v347_v42  ;;  %vm285_vm7 = vcmp.ge.f32.partialorder %v221_v43, 0.0  ;;  %v349_v51 = vmul.f32 0.2, %v221_v43  ;;  %v412_v52 = vsel %vm284_vm6, %v220_v37, %v348_v44 }
   0xf   :  { %v743_v53 = vpack.c.bf16 %v411_v50, %v410_v45  ;;  %v154_v54 = vmul.f32 %v980_v1, %v620_v46  ;;  %v155_v55 = vmul.f32 %v980_v1, %v621_v47  ;;  %v625_v56 = vunpack.c.h.bf16 %v894_v39 }
  0x10   :  { %v413_v58 = vsel %vm285_vm7, %v221_v43, %v349_v51  ;;  %v156_v59 = vmul.f32 %v980_v1, %v624_v48  ;;  %v628_v60 = vunpack.c.l.bf16 %v895_v49  ;;  %v629_v61 = vunpack.c.h.bf16 %v895_v49 }
  0x11   :  { %922 = vst [vmem:[%s1307_s3 + $0x10] sm:$0xff] %v743_v53   ;;  %v748_v62 = vpack.c.bf16 %v413_v58, %v412_v52  ;;  %v222_v63 = vadd.f32 %v985_v4, %v154_v54  ;;  %v223_v0 = vadd.f32 %v985_v4, %v155_v55  ;;  %v157_v2 = vmul.f32 %v980_v1, %v625_v56  ;;  %v900_v55 = vld [vmem:[%s1304_s0 + $0x58] sm:$0xff]   ;;  %v901_v56 = vld [vmem:[%s1304_s0 + $0x60] sm:$0xff]  }
  0x12   :  { %v224_v3 = vadd.f32 %v985_v4, %v156_v59  ;;  %v158_v5 = vmul.f32 %v980_v1, %v628_v60  ;;  %v159_v6 = vmul.f32 %v980_v1, %v629_v61  ;;  %v632_v7 = vunpack.c.l.bf16 %v896_v57 }
  0x13   :  { %923 = vst [vmem:[%s1307_s3 + $0x18] sm:$0xff] %v748_v62   ;;  %vm286_vm8 = vcmp.ge.f32.partialorder %v222_v63, 0.0  ;;  %vm287_vm9 = vcmp.ge.f32.partialorder %v223_v0, 0.0  ;;  %v350_v8 = vmul.f32 0.2, %v222_v63  ;;  %v225_v9 = vadd.f32 %v985_v4, %v157_v2  ;;  %v902_v2 = vld [vmem:[%s1304_s0 + $0x68] sm:$0xff]  }
  0x14   :  { %v351_v10 = vmul.f32 0.2, %v223_v0  ;;  %vm288_vm10 = vcmp.ge.f32.partialorder %v224_v3, 0.0  ;;  %v352_v11 = vmul.f32 0.2, %v224_v3  ;;  %v226_v12 = vadd.f32 %v985_v4, %v158_v5 }
  0x15   :  { %v414_v13 = vsel %vm286_vm8, %v222_v63, %v350_v8  ;;  %vm289_vm11 = vcmp.ge.f32.partialorder %v225_v9, 0.0  ;;  %v353_v14 = vmul.f32 0.2, %v225_v9  ;;  %v227_v15 = vadd.f32 %v985_v4, %v159_v6 }
  0x16   :  { %v415_v16 = vsel %vm287_vm9, %v223_v0, %v351_v10  ;;  %v416_v17 = vsel %vm288_vm10, %v224_v3, %v352_v11  ;;  %vm290_vm12 = vcmp.ge.f32.partialorder %v226_v12, 0.0  ;;  %v354_v18 = vmul.f32 0.2, %v226_v12 }
  0x17   :  { %v753_v21 = vpack.c.bf16 %v415_v16, %v414_v13  ;;  %v417_v22 = vsel %vm289_vm11, %v225_v9, %v353_v14  ;;  %vm291_vm13 = vcmp.ge.f32.partialorder %v227_v15, 0.0  ;;  %v355_v23 = vmul.f32 0.2, %v227_v15 }
  0x18   :  { %v758_v24 = vpack.c.bf16 %v417_v22, %v416_v17  ;;  %v418_v25 = vsel %vm290_vm12, %v226_v12, %v354_v18  ;;  %v633_v26 = vunpack.c.h.bf16 %v896_v57  ;;  %v160_v27 = vmul.f32 %v980_v1, %v632_v7 }
  0x19   :  { %924 = vst [vmem:[%s1307_s3 + $0x20] sm:$0xff] %v753_v21   ;;  %v419_v29 = vsel %vm291_vm13, %v227_v15, %v355_v23  ;;  %v636_v30 = vunpack.c.l.bf16 %v897_v19  ;;  %v637_v31 = vunpack.c.h.bf16 %v897_v19  ;;  %v640_v32 = vunpack.c.l.bf16 %v898_v20 }
  0x1a   :  { %925 = vst [vmem:[%s1307_s3 + $0x28] sm:$0xff] %v758_v24   ;;  %v763_v33 = vpack.c.bf16 %v419_v29, %v418_v25  ;;  %v161_v34 = vmul.f32 %v980_v1, %v633_v26  ;;  %v228_v35 = vadd.f32 %v985_v4, %v160_v27  ;;  %v641_v36 = vunpack.c.h.bf16 %v898_v20 }
  0x1b   :  { %v162_v37 = vmul.f32 %v980_v1, %v636_v30  ;;  %v163_v38 = vmul.f32 %v980_v1, %v637_v31  ;;  %v164_v39 = vmul.f32 %v980_v1, %v640_v32  ;;  %v644_v40 = vunpack.c.l.bf16 %v899_v28 }
  0x1c   :  { %926 = vst [vmem:[%s1307_s3 + $0x30] sm:$0xff] %v763_v33   ;;  %v229_v41 = vadd.f32 %v985_v4, %v161_v34  ;;  %vm292_vm14 = vcmp.ge.f32.partialorder %v228_v35, 0.0  ;;  %v356_v42 = vmul.f32 0.2, %v228_v35  ;;  %v165_v43 = vmul.f32 %v980_v1, %v641_v36 }
  0x1d   :  { %v230_v44 = vadd.f32 %v985_v4, %v162_v37  ;;  %v231_v45 = vadd.f32 %v985_v4, %v163_v38  ;;  %v232_v46 = vadd.f32 %v985_v4, %v164_v39  ;;  %v645_v47 = vunpack.c.h.bf16 %v899_v28  ;;  %v903_v28 = vld [vmem:[%s1304_s0 + $0x70] sm:$0xff]   ;;  %v904_v39 = vld [vmem:[%s1304_s0 + $0x78] sm:$0xff]  }
  0x1e   :  { %vm293_vm15 = vcmp.ge.f32.partialorder %v229_v41, 0.0  ;;  %v357_v48 = vmul.f32 0.2, %v229_v41  ;;  %v420_v49 = vsel %vm292_vm14, %v228_v35, %v356_v42  ;;  %v233_v50 = vadd.f32 %v985_v4, %v165_v43 }
  0x1f   :  { %vm294_vm0 = vcmp.ge.f32.partialorder %v230_v44, 0.0  ;;  %vm295_vm1 = vcmp.ge.f32.partialorder %v231_v45, 0.0  ;;  %v358_v51 = vmul.f32 0.2, %v230_v44  ;;  %v359_v52 = vmul.f32 0.2, %v231_v45 }
  0x20   :  { %v421_v53 = vsel %vm293_vm15, %v229_v41, %v357_v48  ;;  %vm296_vm2 = vcmp.ge.f32.partialorder %v232_v46, 0.0  ;;  %vm297_vm3 = vcmp.ge.f32.partialorder %v233_v50, 0.0  ;;  %v360_v54 = vmul.f32 0.2, %v232_v46 }
  0x21   :  { %v768_v57 = vpack.c.bf16 %v421_v53, %v420_v49  ;;  %v422_v58 = vsel %vm294_vm0, %v230_v44, %v358_v51  ;;  %v423_v59 = vsel %vm295_vm1, %v231_v45, %v359_v52  ;;  %v361_v60 = vmul.f32 0.2, %v233_v50  ;;  %v905_v44 = vld [vmem:[%s1304_s0 + $0x80] sm:$0xff]  }
  0x22   :  { %v773_v61 = vpack.c.bf16 %v423_v59, %v422_v58  ;;  %v424_v62 = vsel %vm296_vm2, %v232_v46, %v360_v54  ;;  %v166_v63 = vmul.f32 %v980_v1, %v644_v40  ;;  %v167_v0 = vmul.f32 %v980_v1, %v645_v47  ;;  %v906_v59 = vld [vmem:[%s1304_s0 + $0x88] sm:$0xff]  }
  0x23   :  { %927 = vst [vmem:[%s1307_s3 + $0x38] sm:$0xff] %v768_v57   ;;  %v425_v3 = vsel %vm297_vm3, %v233_v50, %v361_v60  ;;  %v648_v5 = vunpack.c.l.bf16 %v900_v55  ;;  %v649_v6 = vunpack.c.h.bf16 %v900_v55  ;;  %v652_v7 = vunpack.c.l.bf16 %v901_v56 }
  0x24   :  { %928 = vst [vmem:[%s1307_s3 + $0x40] sm:$0xff] %v773_v61   ;;  %v778_v8 = vpack.c.bf16 %v425_v3, %v424_v62  ;;  %v234_v9 = vadd.f32 %v985_v4, %v166_v63  ;;  %v235_v10 = vadd.f32 %v985_v4, %v167_v0  ;;  %v653_v11 = vunpack.c.h.bf16 %v901_v56 }
  0x25   :  { %v168_v12 = vmul.f32 %v980_v1, %v648_v5  ;;  %v169_v13 = vmul.f32 %v980_v1, %v649_v6  ;;  %v170_v14 = vmul.f32 %v980_v1, %v652_v7  ;;  %v656_v15 = vunpack.c.l.bf16 %v902_v2 }
  0x26   :  { %929 = vst [vmem:[%s1307_s3 + $0x48] sm:$0xff] %v778_v8   ;;  %vm298_vm4 = vcmp.ge.f32.partialorder %v234_v9, 0.0  ;;  %vm299_vm5 = vcmp.ge.f32.partialorder %v235_v10, 0.0  ;;  %v362_v16 = vmul.f32 0.2, %v234_v9  ;;  %v171_v17 = vmul.f32 %v980_v1, %v653_v11 }
  0x27   :  { %v363_v18 = vmul.f32 0.2, %v235_v10  ;;  %v236_v19 = vadd.f32 %v985_v4, %v168_v12  ;;  %v237_v20 = vadd.f32 %v985_v4, %v169_v13  ;;  %v238_v21 = vadd.f32 %v985_v4, %v170_v14  ;;  %v907_v14 = vld [vmem:[%s1304_s0 + $0x90] sm:$0xff]  }
  0x28   :  { %v426_v22 = vsel %vm298_vm4, %v234_v9, %v362_v16  ;;  %v239_v23 = vadd.f32 %v985_v4, %v171_v17  ;;  %v657_v24 = vunpack.c.h.bf16 %v902_v2  ;;  %v172_v25 = vmul.f32 %v980_v1, %v656_v15 }
  0x29   :  { %v427_v26 = vsel %vm299_vm5, %v235_v10, %v363_v18  ;;  %vm300_vm6 = vcmp.ge.f32.partialorder %v236_v19, 0.0  ;;  %vm301_vm7 = vcmp.ge.f32.partialorder %v237_v20, 0.0  ;;  %v364_v27 = vmul.f32 0.2, %v236_v19  ;;  %v908_v18 = vld [vmem:[%s1304_s0 + $0x98] sm:$0xff]  }
  0x2a   :  { %v783_v29 = vpack.c.bf16 %v427_v26, %v426_v22  ;;  %v365_v30 = vmul.f32 0.2, %v237_v20  ;;  %vm302_vm8 = vcmp.ge.f32.partialorder %v238_v21, 0.0  ;;  %vm303_vm9 = vcmp.ge.f32.partialorder %v239_v23, 0.0 }
  0x2b   :  { %v428_v31 = vsel %vm300_vm6, %v236_v19, %v364_v27  ;;  %v366_v32 = vmul.f32 0.2, %v238_v21  ;;  %v367_v33 = vmul.f32 0.2, %v239_v23  ;;  %v173_v34 = vmul.f32 %v980_v1, %v657_v24 }
  0x2c   :  { %930 = vst [vmem:[%s1307_s3 + $0x50] sm:$0xff] %v783_v29   ;;  %v429_v35 = vsel %vm301_vm7, %v237_v20, %v365_v30  ;;  %v240_v36 = vadd.f32 %v985_v4, %v172_v25  ;;  %v660_v37 = vunpack.c.l.bf16 %v903_v28  ;;  %v661_v38 = vunpack.c.h.bf16 %v903_v28 }
  0x2d   :  { %v788_v40 = vpack.c.bf16 %v429_v35, %v428_v31  ;;  %v430_v41 = vsel %vm302_vm8, %v238_v21, %v366_v32  ;;  %v431_v42 = vsel %vm303_vm9, %v239_v23, %v367_v33  ;;  %v241_v43 = vadd.f32 %v985_v4, %v173_v34  ;;  %v909_v34 = vld [vmem:[%s1304_s0 + $0xa0] sm:$0xff]  }
  0x2e   :  { %v793_v45 = vpack.c.bf16 %v431_v42, %v430_v41  ;;  %vm304_vm10 = vcmp.ge.f32.partialorder %v240_v36, 0.0  ;;  %v368_v46 = vmul.f32 0.2, %v240_v36  ;;  %v174_v47 = vmul.f32 %v980_v1, %v660_v37 }
  0x2f   :  { %931 = vst [vmem:[%s1307_s3 + $0x58] sm:$0xff] %v788_v40   ;;  %vm305_vm11 = vcmp.ge.f32.partialorder %v241_v43, 0.0  ;;  %v369_v48 = vmul.f32 0.2, %v241_v43  ;;  %v175_v49 = vmul.f32 %v980_v1, %v661_v38  ;;  %v664_v50 = vunpack.c.l.bf16 %v904_v39 }
  0x30   :  { %932 = vst [vmem:[%s1307_s3 + $0x60] sm:$0xff] %v793_v45   ;;  %v432_v51 = vsel %vm304_vm10, %v240_v36, %v368_v46  ;;  %v242_v52 = vadd.f32 %v985_v4, %v174_v47  ;;  %v665_v53 = vunpack.c.h.bf16 %v904_v39  ;;  %v668_v54 = vunpack.c.l.bf16 %v905_v44 }
  0x31   :  { %v433_v55 = vsel %vm305_vm11, %v241_v43, %v369_v48  ;;  %v243_v56 = vadd.f32 %v985_v4, %v175_v49  ;;  %v176_v57 = vmul.f32 %v980_v1, %v664_v50  ;;  %v669_v58 = vunpack.c.h.bf16 %v905_v44  ;;  %v910_v48 = vld [vmem:[%s1304_s0 + $0xa8] sm:$0xff]  }
  0x32   :  { %v798_v60 = vpack.c.bf16 %v433_v55, %v432_v51  ;;  %vm306_vm12 = vcmp.ge.f32.partialorder %v242_v52, 0.0  ;;  %v370_v61 = vmul.f32 0.2, %v242_v52  ;;  %v177_v62 = vmul.f32 %v980_v1, %v665_v53 }
  0x33   :  { %vm307_vm13 = vcmp.ge.f32.partialorder %v243_v56, 0.0  ;;  %v371_v63 = vmul.f32 0.2, %v243_v56  ;;  %v244_v0 = vadd.f32 %v985_v4, %v176_v57  ;;  %v178_v2 = vmul.f32 %v980_v1, %v668_v54 }
  0x34   :  { %933 = vst [vmem:[%s1307_s3 + $0x68] sm:$0xff] %v798_v60   ;;  %v434_v3 = vsel %vm306_vm12, %v242_v52, %v370_v61  ;;  %v245_v5 = vadd.f32 %v985_v4, %v177_v62  ;;  %v179_v6 = vmul.f32 %v980_v1, %v669_v58  ;;  %v672_v7 = vunpack.c.l.bf16 %v906_v59  ;;  %v911_v58 = vld [vmem:[%s1304_s0 + $0xb0] sm:$0xff]  }
  0x35   :  { %v435_v8 = vsel %vm307_vm13, %v243_v56, %v371_v63  ;;  %vm308_vm14 = vcmp.ge.f32.partialorder %v244_v0, 0.0  ;;  %v372_v9 = vmul.f32 0.2, %v244_v0  ;;  %v246_v10 = vadd.f32 %v985_v4, %v178_v2 }
  0x36   :  { %v803_v11 = vpack.c.bf16 %v435_v8, %v434_v3  ;;  %vm309_vm15 = vcmp.ge.f32.partialorder %v245_v5, 0.0  ;;  %v373_v12 = vmul.f32 0.2, %v245_v5  ;;  %v247_v13 = vadd.f32 %v985_v4, %v179_v6 }
  0x37   :  { %v436_v15 = vsel %vm308_vm14, %v244_v0, %v372_v9  ;;  %vm310_vm0 = vcmp.ge.f32.partialorder %v246_v10, 0.0  ;;  %v374_v16 = vmul.f32 0.2, %v246_v10  ;;  %v673_v17 = vunpack.c.h.bf16 %v906_v59  ;;  %v912_v59 = vld [vmem:[%s1304_s0 + $0xb8] sm:$0xff]  }
  0x38   :  { %934 = vst [vmem:[%s1307_s3 + $0x70] sm:$0xff] %v803_v11   ;;  %v437_v19 = vsel %vm309_vm15, %v245_v5, %v373_v12  ;;  %vm311_vm1 = vcmp.ge.f32.partialorder %v247_v13, 0.0  ;;  %v375_v20 = vmul.f32 0.2, %v247_v13  ;;  %v180_v21 = vmul.f32 %v980_v1, %v672_v7 }
  0x39   :  { %v808_v22 = vpack.c.bf16 %v437_v19, %v436_v15  ;;  %v438_v23 = vsel %vm310_vm0, %v246_v10, %v374_v16  ;;  %v181_v24 = vmul.f32 %v980_v1, %v673_v17  ;;  %v676_v25 = vunpack.c.l.bf16 %v907_v14 }
  0x3a   :  { %v439_v26 = vsel %vm311_vm1, %v247_v13, %v375_v20  ;;  %v248_v27 = vadd.f32 %v985_v4, %v180_v21  ;;  %v677_v28 = vunpack.c.h.bf16 %v907_v14  ;;  %v680_v29 = vunpack.c.l.bf16 %v908_v18 }
  0x3b   :  { %935 = vst [vmem:[%s1307_s3 + $0x78] sm:$0xff] %v808_v22   ;;  %v813_v30 = vpack.c.bf16 %v439_v26, %v438_v23  ;;  %v249_v31 = vadd.f32 %v985_v4, %v181_v24  ;;  %v182_v32 = vmul.f32 %v980_v1, %v676_v25  ;;  %v681_v33 = vunpack.c.h.bf16 %v908_v18  ;;  %v913_v26 = vld [vmem:[%s1304_s0 + $0xc0] sm:$0xff]  }
  0x3c   :  { %vm312_vm2 = vcmp.ge.f32.partialorder %v248_v27, 0.0  ;;  %v376_v35 = vmul.f32 0.2, %v248_v27  ;;  %v183_v36 = vmul.f32 %v980_v1, %v677_v28  ;;  %v184_v37 = vmul.f32 %v980_v1, %v680_v29 }
  0x3d   :  { %936 = vst [vmem:[%s1307_s3 + $0x80] sm:$0xff] %v813_v30   ;;  %vm313_vm3 = vcmp.ge.f32.partialorder %v249_v31, 0.0  ;;  %v377_v38 = vmul.f32 0.2, %v249_v31  ;;  %v250_v39 = vadd.f32 %v985_v4, %v182_v32  ;;  %v185_v40 = vmul.f32 %v980_v1, %v681_v33  ;;  %v914_v30 = vld [vmem:[%s1304_s0 + $0xc8] sm:$0xff]  }
  0x3e   :  { %v440_v41 = vsel %vm312_vm2, %v248_v27, %v376_v35  ;;  %v251_v42 = vadd.f32 %v985_v4, %v183_v36  ;;  %v252_v43 = vadd.f32 %v985_v4, %v184_v37  ;;  %v684_v44 = vunpack.c.l.bf16 %v909_v34 }
  0x3f   :  { %v441_v45 = vsel %vm313_vm3, %v249_v31, %v377_v38  ;;  %vm314_vm4 = vcmp.ge.f32.partialorder %v250_v39, 0.0  ;;  %v378_v46 = vmul.f32 0.2, %v250_v39  ;;  %v253_v47 = vadd.f32 %v985_v4, %v185_v40 }
  0x40   :  { %v818_v49 = vpack.c.bf16 %v441_v45, %v440_v41  ;;  %vm315_vm5 = vcmp.ge.f32.partialorder %v251_v42, 0.0  ;;  %v379_v50 = vmul.f32 0.2, %v251_v42  ;;  %vm316_vm6 = vcmp.ge.f32.partialorder %v252_v43, 0.0 }
  0x41   :  { %v442_v51 = vsel %vm314_vm4, %v250_v39, %v378_v46  ;;  %vm317_vm7 = vcmp.ge.f32.partialorder %v253_v47, 0.0  ;;  %v380_v52 = vmul.f32 0.2, %v252_v43  ;;  %v381_v53 = vmul.f32 0.2, %v253_v47 }
  0x42   :  { %937 = vst [vmem:[%s1307_s3 + $0x88] sm:$0xff] %v818_v49   ;;  %v443_v54 = vsel %vm315_vm5, %v251_v42, %v379_v50  ;;  %v685_v55 = vunpack.c.h.bf16 %v909_v34  ;;  %v186_v56 = vmul.f32 %v980_v1, %v684_v44  ;;  %v688_v57 = vunpack.c.l.bf16 %v910_v48  ;;  %v915_v42 = vld [vmem:[%s1304_s0 + $0xd0] sm:$0xff]  }
  0x43   :  { %v823_v60 = vpack.c.bf16 %v443_v54, %v442_v51  ;;  %v444_v61 = vsel %vm316_vm6, %v252_v43, %v380_v52  ;;  %v445_v62 = vsel %vm317_vm7, %v253_v47, %v381_v53  ;;  %v689_v63 = vunpack.c.h.bf16 %v910_v48 }
  0x44   :  { %v828_v0 = vpack.c.bf16 %v445_v62, %v444_v61  ;;  %v187_v2 = vmul.f32 %v980_v1, %v685_v55  ;;  %v254_v3 = vadd.f32 %v985_v4, %v186_v56  ;;  %v188_v5 = vmul.f32 %v980_v1, %v688_v57 }
  0x45   :  { %938 = vst [vmem:[%s1307_s3 + $0x90] sm:$0xff] %v823_v60   ;;  %v189_v6 = vmul.f32 %v980_v1, %v689_v63  ;;  %v692_v7 = vunpack.c.l.bf16 %v911_v58  ;;  %v693_v8 = vunpack.c.h.bf16 %v911_v58  ;;  %v696_v9 = vunpack.c.l.bf16 %v912_v59 }
  0x46   :  { %939 = vst [vmem:[%s1307_s3 + $0x98] sm:$0xff] %v828_v0   ;;  %v255_v10 = vadd.f32 %v985_v4, %v187_v2  ;;  %vm318_vm8 = vcmp.ge.f32.partialorder %v254_v3, 0.0  ;;  %v382_v11 = vmul.f32 0.2, %v254_v3  ;;  %v256_v12 = vadd.f32 %v985_v4, %v188_v5  ;;  %v916_v2 = vld [vmem:[%s1304_s0 + $0xd8] sm:$0xff]  }
  0x47   :  { %v257_v13 = vadd.f32 %v985_v4, %v189_v6  ;;  %v190_v14 = vmul.f32 %v980_v1, %v692_v7  ;;  %v191_v15 = vmul.f32 %v980_v1, %v693_v8  ;;  %v697_v16 = vunpack.c.h.bf16 %v912_v59  ;;  %v917_v8 = vld [vmem:[%s1304_s0 + $0xe0] sm:$0xff]  }
  0x48   :  { %vm319_vm9 = vcmp.ge.f32.partialorder %v255_v10, 0.0  ;;  %v383_v17 = vmul.f32 0.2, %v255_v10  ;;  %v446_v18 = vsel %vm318_vm8, %v254_v3, %v382_v11  ;;  %vm320_vm10 = vcmp.ge.f32.partialorder %v256_v12, 0.0 }
  0x49   :  { %vm321_vm11 = vcmp.ge.f32.partialorder %v257_v13, 0.0  ;;  %v384_v19 = vmul.f32 0.2, %v256_v12  ;;  %v385_v20 = vmul.f32 0.2, %v257_v13  ;;  %v258_v21 = vadd.f32 %v985_v4, %v190_v14 }
  0x4a   :  { %v447_v22 = vsel %vm319_vm9, %v255_v10, %v383_v17  ;;  %v259_v23 = vadd.f32 %v985_v4, %v191_v15  ;;  %v192_v24 = vmul.f32 %v980_v1, %v696_v9  ;;  %v193_v25 = vmul.f32 %v980_v1, %v697_v16 }
  0x4b   :  { %v833_v27 = vpack.c.bf16 %v447_v22, %v446_v18  ;;  %v448_v28 = vsel %vm320_vm10, %v256_v12, %v384_v19  ;;  %v449_v29 = vsel %vm321_vm11, %v257_v13, %v385_v20  ;;  %vm322_vm12 = vcmp.ge.f32.partialorder %v258_v21, 0.0  ;;  %v918_v12 = vld [vmem:[%s1304_s0 + $0xe8] sm:$0xff]   ;;  %v919_v20 = vld [vmem:[%s1304_s0 + $0xf0] sm:$0xff]  }
  0x4c   :  { %v838_v31 = vpack.c.bf16 %v449_v29, %v448_v28  ;;  %vm323_vm13 = vcmp.ge.f32.partialorder %v259_v23, 0.0  ;;  %v386_v32 = vmul.f32 0.2, %v258_v21  ;;  %v387_v33 = vmul.f32 0.2, %v259_v23 }
  0x4d   :  { %940 = vst [vmem:[%s1307_s3 + $0xa0] sm:$0xff] %v833_v27   ;;  %v260_v34 = vadd.f32 %v985_v4, %v192_v24  ;;  %v261_v35 = vadd.f32 %v985_v4, %v193_v25  ;;  %v700_v36 = vunpack.c.l.bf16 %v913_v26  ;;  %v701_v37 = vunpack.c.h.bf16 %v913_v26 }
  0x4e   :  { %941 = vst [vmem:[%s1307_s3 + $0xa8] sm:$0xff] %v838_v31   ;;  %v450_v38 = vsel %vm322_vm12, %v258_v21, %v386_v32  ;;  %v451_v39 = vsel %vm323_vm13, %v259_v23, %v387_v33  ;;  %v704_v40 = vunpack.c.l.bf16 %v914_v30  ;;  %v705_v41 = vunpack.c.h.bf16 %v914_v30 }
  0x4f   :  { %v843_v43 = vpack.c.bf16 %v451_v39, %v450_v38  ;;  %vm324_vm14 = vcmp.ge.f32.partialorder %v260_v34, 0.0  ;;  %vm325_vm15 = vcmp.ge.f32.partialorder %v261_v35, 0.0  ;;  %v388_v44 = vmul.f32 0.2, %v260_v34 }
  0x50   :  { %v389_v45 = vmul.f32 0.2, %v261_v35  ;;  %v194_v46 = vmul.f32 %v980_v1, %v700_v36  ;;  %v195_v47 = vmul.f32 %v980_v1, %v701_v37  ;;  %v196_v48 = vmul.f32 %v980_v1, %v704_v40 }
  0x51   :  { %942 = vst [vmem:[%s1307_s3 + $0xb0] sm:$0xff] %v843_v43   ;;  %v452_v49 = vsel %vm324_vm14, %v260_v34, %v388_v44  ;;  %v197_v50 = vmul.f32 %v980_v1, %v705_v41  ;;  %v708_v51 = vunpack.c.l.bf16 %v915_v42  ;;  %v709_v52 = vunpack.c.h.bf16 %v915_v42 }
  0x52   :  { %v453_v53 = vsel %vm325_vm15, %v261_v35, %v389_v45  ;;  %v262_v54 = vadd.f32 %v985_v4, %v194_v46  ;;  %v263_v55 = vadd.f32 %v985_v4, %v195_v47  ;;  %v264_v56 = vadd.f32 %v985_v4, %v196_v48  ;;  %v920_v48 = vld [vmem:[%s1304_s0 + $0xf8] sm:$0xff]  }
  0x53   :  { %v848_v57 = vpack.c.bf16 %v453_v53, %v452_v49  ;;  %v265_v58 = vadd.f32 %v985_v4, %v197_v50  ;;  %v198_v59 = vmul.f32 %v980_v1, %v708_v51  ;;  %v199_v60 = vmul.f32 %v980_v1, %v709_v52 }
  0x54   :  { %vm326_vm0 = vcmp.ge.f32.partialorder %v262_v54, 0.0  ;;  %vm327_vm1 = vcmp.ge.f32.partialorder %v263_v55, 0.0  ;;  %v390_v61 = vmul.f32 0.2, %v262_v54  ;;  %v391_v62 = vmul.f32 0.2, %v263_v55 }
  0x55   :  { %943 = vst [vmem:[%s1307_s3 + $0xb8] sm:$0xff] %v848_v57   ;;  %vm328_vm2 = vcmp.ge.f32.partialorder %v264_v56, 0.0  ;;  %vm329_vm3 = vcmp.ge.f32.partialorder %v265_v58, 0.0  ;;  %v392_v63 = vmul.f32 0.2, %v264_v56  ;;  %v266_v0 = vadd.f32 %v985_v4, %v198_v59 }
  0x56   :  { %v454_v3 = vsel %vm326_vm0, %v262_v54, %v390_v61  ;;  %v455_v5 = vsel %vm327_vm1, %v263_v55, %v391_v62  ;;  %v393_v6 = vmul.f32 0.2, %v265_v58  ;;  %v267_v7 = vadd.f32 %v985_v4, %v199_v60 }
  0x57   :  { %v853_v9 = vpack.c.bf16 %v455_v5, %v454_v3  ;;  %v456_v10 = vsel %vm328_vm2, %v264_v56, %v392_v63  ;;  %vm330_vm4 = vcmp.ge.f32.partialorder %v266_v0, 0.0  ;;  %v394_v11 = vmul.f32 0.2, %v266_v0 }
  0x58   :  { %v457_v13 = vsel %vm329_vm3, %v265_v58, %v393_v6  ;;  %vm331_vm5 = vcmp.ge.f32.partialorder %v267_v7, 0.0  ;;  %v395_v14 = vmul.f32 0.2, %v267_v7  ;;  %v712_v15 = vunpack.c.l.bf16 %v916_v2 }
  0x59   :  { %944 = vst [vmem:[%s1307_s3 + $0xc0] sm:$0xff] %v853_v9   ;;  %v858_v16 = vpack.c.bf16 %v457_v13, %v456_v10  ;;  %v458_v17 = vsel %vm330_vm4, %v266_v0, %v394_v11  ;;  %v713_v18 = vunpack.c.h.bf16 %v916_v2  ;;  %v716_v19 = vunpack.c.l.bf16 %v917_v8 }
  0x5a   :  { %v459_v21 = vsel %vm331_vm5, %v267_v7, %v395_v14  ;;  %v200_v22 = vmul.f32 %v980_v1, %v712_v15  ;;  %v717_v23 = vunpack.c.h.bf16 %v917_v8  ;;  %v720_v24 = vunpack.c.l.bf16 %v918_v12 }
  0x5b   :  { %945 = vst [vmem:[%s1307_s3 + $0xc8] sm:$0xff] %v858_v16   ;;  %v863_v25 = vpack.c.bf16 %v459_v21, %v458_v17  ;;  %v201_v26 = vmul.f32 %v980_v1, %v713_v18  ;;  %v202_v27 = vmul.f32 %v980_v1, %v716_v19  ;;  %v721_v28 = vunpack.c.h.bf16 %v918_v12 }
  0x5c   :  { %v268_v29 = vadd.f32 %v985_v4, %v200_v22  ;;  %v203_v30 = vmul.f32 %v980_v1, %v717_v23  ;;  %v204_v31 = vmul.f32 %v980_v1, %v720_v24  ;;  %v724_v32 = vunpack.c.l.bf16 %v919_v20 }
  0x5d   :  { %946 = vst [vmem:[%s1307_s3 + $0xd0] sm:$0xff] %v863_v25   ;;  %v269_v33 = vadd.f32 %v985_v4, %v201_v26  ;;  %v270_v34 = vadd.f32 %v985_v4, %v202_v27  ;;  %v205_v35 = vmul.f32 %v980_v1, %v721_v28  ;;  %v725_v36 = vunpack.c.h.bf16 %v919_v20 }
  0x5e   :  { %vm332_vm6 = vcmp.ge.f32.partialorder %v268_v29, 0.0  ;;  %v396_v37 = vmul.f32 0.2, %v268_v29  ;;  %v271_v38 = vadd.f32 %v985_v4, %v203_v30  ;;  %v272_v39 = vadd.f32 %v985_v4, %v204_v31 }
  0x5f   :  { %vm333_vm7 = vcmp.ge.f32.partialorder %v269_v33, 0.0  ;;  %v397_v40 = vmul.f32 0.2, %v269_v33  ;;  %vm334_vm8 = vcmp.ge.f32.partialorder %v270_v34, 0.0  ;;  %v398_v41 = vmul.f32 0.2, %v270_v34 }
  0x60   :  { %v460_v42 = vsel %vm332_vm6, %v268_v29, %v396_v37  ;;  %vm335_vm9 = vcmp.ge.f32.partialorder %v271_v38, 0.0  ;;  %v399_v43 = vmul.f32 0.2, %v271_v38  ;;  %v273_v44 = vadd.f32 %v985_v4, %v205_v35 }
  0x61   :  { %v461_v45 = vsel %vm333_vm7, %v269_v33, %v397_v40  ;;  %v462_v46 = vsel %vm334_vm8, %v270_v34, %v398_v41  ;;  %vm336_vm10 = vcmp.ge.f32.partialorder %v272_v39, 0.0  ;;  %v400_v47 = vmul.f32 0.2, %v272_v39 }
  0x62   :  { %v868_v49 = vpack.c.bf16 %v461_v45, %v460_v42  ;;  %v463_v50 = vsel %vm335_vm9, %v271_v38, %v399_v43  ;;  %vm337_vm11 = vcmp.ge.f32.partialorder %v273_v44, 0.0  ;;  %v401_v51 = vmul.f32 0.2, %v273_v44 }
  0x63   :  { %v873_v52 = vpack.c.bf16 %v463_v50, %v462_v46  ;;  %v464_v53 = vsel %vm336_vm10, %v272_v39, %v400_v47  ;;  %v206_v54 = vmul.f32 %v980_v1, %v724_v32  ;;  %v207_v55 = vmul.f32 %v980_v1, %v725_v36 }
  0x64   :  { %947 = vst [vmem:[%s1307_s3 + $0xd8] sm:$0xff] %v868_v49   ;;  %v465_v56 = vsel %vm337_vm11, %v273_v44, %v401_v51  ;;  %v728_v57 = vunpack.c.l.bf16 %v920_v48  ;;  %v729_v58 = vunpack.c.h.bf16 %v920_v48 }
  0x65   :  { %948 = vst [vmem:[%s1307_s3 + $0xe0] sm:$0xff] %v873_v52   ;;  %v878_v59 = vpack.c.bf16 %v465_v56, %v464_v53  ;;  %v274_v60 = vadd.f32 %v985_v4, %v206_v54  ;;  %v275_v61 = vadd.f32 %v985_v4, %v207_v55 }
  0x66   :  { %v208_v62 = vmul.f32 %v980_v1, %v728_v57  ;;  %v209_v63 = vmul.f32 %v980_v1, %v729_v58 }
  0x67   :  { %949 = vst [vmem:[%s1307_s3 + $0xe8] sm:$0xff] %v878_v59   ;;  %vm338_vm12 = vcmp.ge.f32.partialorder %v274_v60, 0.0  ;;  %vm339_vm13 = vcmp.ge.f32.partialorder %v275_v61, 0.0  ;;  %v402_v0 = vmul.f32 0.2, %v274_v60 }
  0x68   :  { %v403_v2 = vmul.f32 0.2, %v275_v61  ;;  %v276_v3 = vadd.f32 %v985_v4, %v208_v62  ;;  %v277_v5 = vadd.f32 %v985_v4, %v209_v63 }
  0x69   :  { %v466_v6 = vsel %vm338_vm12, %v274_v60, %v402_v0 }
  0x6a   :  { %v467_v7 = vsel %vm339_vm13, %v275_v61, %v403_v2  ;;  %vm340_vm14 = vcmp.ge.f32.partialorder %v276_v3, 0.0  ;;  %vm341_vm15 = vcmp.ge.f32.partialorder %v277_v5, 0.0  ;;  %v404_v8 = vmul.f32 0.2, %v276_v3 }
  0x6b   :  { %v883_v9 = vpack.c.bf16 %v467_v7, %v466_v6  ;;  %v405_v10 = vmul.f32 0.2, %v277_v5 }
  0x6c   :  { %v468_v1 = vsel %vm340_vm14, %v276_v3, %v404_v8 }
  0x6d   :  { %950 = vst [vmem:[%s1307_s3 + $0xf0] sm:$0xff] %v883_v9   ;;  %v469_v11 = vsel %vm341_vm15, %v277_v5, %v405_v10 }
  0x6e   :  { %v888_v12 = vpack.c.bf16 %v469_v11, %v468_v1 }
  0x70   :  { %951 = vst [vmem:[%s1307_s3 + $0xf8] sm:$0xff] %v888_v12  }

// kernel: generator_forward.19
= control target key start
LH: loop header
LB: loop body
LE: loop exit
PB: predicated region body
PF: predicated region fallthrough
CT: control target
= control target key end

     0   :  { %vm443_vm0 = vcmask 130048   ;;  %s2352_s1 = inlined_call_operand.vmem [shape: bf16[144,128], index: 1, kind: input, shape index: {}]   ;;  %s2353_s0 = inlined_call_operand.vmem [shape: bf16[512,144], index: 0, kind: input, shape index: {}]   ;;  %s2354_s2 = inlined_call_operand.vmem [shape: f32[1,128], index: 2, kind: input, shape index: {}]   ;;  %s2355_s3 = inlined_call_operand.vmem [shape: f32[512,128], index: 3, kind: output, shape index: {}]  }
   0x1   :  { %v1405_v0 = vld [vmem:[%s2352_s1 + $0x38] sm:$0xff]  ;;  %v1406_v1 = vld [vmem:[%s2352_s1 + $0x40] sm:$0xff]  ;;  %v1014_v3 = vld [vmem:[%s2353_s0 + $0x8] sm:$0xf0] }
   0x2   :  { %v1334_v2 = vld [vmem:[%s2353_s0 + $0x4] sm:$0xf]  ;;  %540 = vmatpush.bf16.msra.mxu0 %v1405_v0  ;;  %1407 = vmatpush.bf16.msra.mxu2 %v1405_v0  ;;  %v1404_v5 = vld [vmem:[%s2352_s1 + $0x30] sm:$0xff]  ;;  %v1403_v6 = vld [vmem:[%s2352_s1 + $0x28] sm:$0xff] }
   0x3   :  { %v1017_v4 = vor.u32 %v1334_v2, %v1014_v3  ;;  %716 = vmatpush.bf16.msra.mxu1 %v1406_v1  ;;  %1415 = vmatpush.bf16.msra.mxu3 %v1406_v1  ;;  %v1368_v7 = vld [vmem:[%s2353_s0 + $0x114] sm:$0xf]  ;;  %v1150_v8 = vld [vmem:[%s2353_s0 + $0x118] sm:$0xf0]  ;;  %v1402_v10 = vld [vmem:[%s2352_s1 + $0x20] sm:$0xff] }
   0x4   :  { %v1153_v9 = vor.u32 %v1368_v7, %v1150_v8  ;;  %v1401_v11 = vld [vmem:[%s2352_s1 + $0x18] sm:$0xff]  ;;  %v1336_v12 = vld [vmem:[%s2353_s0 + $0x14] sm:$0xf]  ;;  %v1399_v16 = vld [vmem:[%s2352_s1 + $0x8] sm:$0xff] }
   0x5   :  { %v1022_v13 = vld [vmem:[%s2353_s0 + $0x18] sm:$0xf0]  ;;  %v1400_v15 = vld [vmem:[%s2352_s1 + $0x10] sm:$0xff]  ;;  %v1370_v17 = vld [vmem:[%s2353_s0 + $0x124] sm:$0xf] }
   0x6   :  { %1302 = vmatmul.msk.bf16.vlgmr.msra.gmra.mxu1 %vm443_vm0, %v1017_v4  ;;  %541 = vmatpush.bf16.msra.mxu0 %v1404_v5  ;;  %v1025_v14 = vor.u32 %v1336_v12, %v1022_v13  ;;  %v1158_v18 = vld [vmem:[%s2353_s0 + $0x128] sm:$0xf0]  ;;  %v1398_v20 = vld [vmem:[%s2352_s1] sm:$0xff]  ;;  %v1335_v22 = vld [vmem:[%s2353_s0 + $0x4] sm:$0xf0] }
   0x7   :  { %1408 = vmatpush.bf16.msra.mxu2 %v1404_v5  ;;  %1319 = vmatmul.msk.bf16.vlgmr.msra.gmra.mxu3 %vm443_vm0, %v1153_v9  ;;  %v1161_v19 = vor.u32 %v1370_v17, %v1158_v18  ;;  %v1012_v21 = vld [vmem:[%s2353_s0] sm:$0xf]  ;;  %v1367_v24 = vld [vmem:[%s2353_s0 + $0x104] sm:$0xf0]  ;;  %v1338_v27 = vld [vmem:[%s2353_s0 + $0x24] sm:$0xf] }
   0x8   :  { %v1140_v23 = vld [vmem:[%s2353_s0 + $0x100] sm:$0xf]  ;;  %v1013_v25 = vor.u32 %v1335_v22, %v1012_v21  ;;  %v1030_v28 = vld [vmem:[%s2353_s0 + $0x28] sm:$0xf0]  ;;  %v1372_v30 = vld [vmem:[%s2353_s0 + $0x134] sm:$0xf] }
   0x9   :  { %v1141_v26 = vor.u32 %v1367_v24, %v1140_v23  ;;  %v1033_v29 = vor.u32 %v1338_v27, %v1030_v28  ;;  %v1166_v31 = vld [vmem:[%s2353_s0 + $0x138] sm:$0xf0]  ;;  %v1020_v33 = vld [vmem:[%s2353_s0 + $0x10] sm:$0xf]  ;;  %v1337_v34 = vld [vmem:[%s2353_s0 + $0x14] sm:$0xf0] }
   0xa   :  { %542 = vmatpush.bf16.msra.mxu0 %v1403_v6  ;;  %v1169_v32 = vor.u32 %v1372_v30, %v1166_v31  ;;  %v1148_v35 = vld [vmem:[%s2353_s0 + $0x110] sm:$0xf]  ;;  %v1369_v36 = vld [vmem:[%s2353_s0 + $0x114] sm:$0xf0]  ;;  %v1021_v37 = vor.u32 %v1337_v34, %v1020_v33  ;;  %v1340_v39 = vld [vmem:[%s2353_s0 + $0x34] sm:$0xf] }
   0xb   :  { %1409 = vmatpush.bf16.msra.mxu2 %v1403_v6  ;;  %v1149_v38 = vor.u32 %v1369_v36, %v1148_v35  ;;  %v1038_v40 = vld [vmem:[%s2353_s0 + $0x38] sm:$0xf0]  ;;  %v1374_v42 = vld [vmem:[%s2353_s0 + $0x144] sm:$0xf]  ;;  %v1174_v43 = vld [vmem:[%s2353_s0 + $0x148] sm:$0xf0] }
   0xc   :  { %v1041_v41 = vor.u32 %v1340_v39, %v1038_v40  ;;  %v1177_v44 = vor.u32 %v1374_v42, %v1174_v43  ;;  %v1028_v45 = vld [vmem:[%s2353_s0 + $0x20] sm:$0xf]  ;;  %v1339_v46 = vld [vmem:[%s2353_s0 + $0x24] sm:$0xf0]  ;;  %v1342_v51 = vld [vmem:[%s2353_s0 + $0x44] sm:$0xf] }
   0xd   :  { %v1156_v47 = vld [vmem:[%s2353_s0 + $0x120] sm:$0xf]  ;;  %v1371_v48 = vld [vmem:[%s2353_s0 + $0x124] sm:$0xf0]  ;;  %v1029_v49 = vor.u32 %v1339_v46, %v1028_v45  ;;  %v1046_v52 = vld [vmem:[%s2353_s0 + $0x48] sm:$0xf0] }
   0xe   :  { %543 = vmatpush.bf16.msra.mxu0 %v1402_v10  ;;  %v1157_v50 = vor.u32 %v1371_v48, %v1156_v47  ;;  %v1049_v53 = vor.u32 %v1342_v51, %v1046_v52  ;;  %v1376_v54 = vld [vmem:[%s2353_s0 + $0x154] sm:$0xf]  ;;  %v1182_v55 = vld [vmem:[%s2353_s0 + $0x158] sm:$0xf0]  ;;  %v1036_v57 = vld [vmem:[%s2353_s0 + $0x30] sm:$0xf] }
   0xf   :  { %1410 = vmatpush.bf16.msra.mxu2 %v1402_v10  ;;  %v1185_v56 = vor.u32 %v1376_v54, %v1182_v55  ;;  %v1341_v58 = vld [vmem:[%s2353_s0 + $0x34] sm:$0xf0]  ;;  %v1164_v59 = vld [vmem:[%s2353_s0 + $0x130] sm:$0xf]  ;;  %v1344_v63 = vld [vmem:[%s2353_s0 + $0x54] sm:$0xf] }
  0x10   :  { %v1373_v60 = vld [vmem:[%s2353_s0 + $0x134] sm:$0xf0]  ;;  %v1037_v61 = vor.u32 %v1341_v58, %v1036_v57  ;;  %v1054_v0 = vld [vmem:[%s2353_s0 + $0x58] sm:$0xf0]  ;;  %v1378_v2 = vld [vmem:[%s2353_s0 + $0x164] sm:$0xf] }
  0x11   :  { %v1165_v62 = vor.u32 %v1373_v60, %v1164_v59  ;;  %v1057_v1 = vor.u32 %v1344_v63, %v1054_v0  ;;  %v1190_v3 = vld [vmem:[%s2353_s0 + $0x168] sm:$0xf0]  ;;  %v1044_v5 = vld [vmem:[%s2353_s0 + $0x40] sm:$0xf]  ;;  %v1343_v6 = vld [vmem:[%s2353_s0 + $0x44] sm:$0xf0] }
  0x12   :  { %544 = vmatpush.bf16.msra.mxu0 %v1401_v11  ;;  %v1193_v4 = vor.u32 %v1378_v2, %v1190_v3  ;;  %v1172_v7 = vld [vmem:[%s2353_s0 + $0x140] sm:$0xf]  ;;  %v1375_v8 = vld [vmem:[%s2353_s0 + $0x144] sm:$0xf0]  ;;  %v1045_v9 = vor.u32 %v1343_v6, %v1044_v5  ;;  %v1062_v12 = vld [vmem:[%s2353_s0 + $0x68] sm:$0xf0] }
  0x13   :  { %1411 = vmatpush.bf16.msra.mxu2 %v1401_v11  ;;  %v1173_v10 = vor.u32 %v1375_v8, %v1172_v7  ;;  %v1346_v11 = vld [vmem:[%s2353_s0 + $0x64] sm:$0xf]  ;;  %v1345_v17 = vld [vmem:[%s2353_s0 + $0x54] sm:$0xf0]  ;;  %v1348_v23 = vld [vmem:[%s2353_s0 + $0x74] sm:$0xf] }
  0x14   :  { %v1065_v13 = vor.u32 %v1346_v11, %v1062_v12  ;;  %v1070_v24 = vld [vmem:[%s2353_s0 + $0x78] sm:$0xf0]  ;;  %v1206_v27 = vld [vmem:[%s2353_s0 + $0x188] sm:$0xf0]  ;;  %v1060_v28 = vld [vmem:[%s2353_s0 + $0x60] sm:$0xf] }
  0x15   :  { %v1188_v31 = vld [vmem:[%s2353_s0 + $0x160] sm:$0xf]  ;;  %v1350_v35 = vld [vmem:[%s2353_s0 + $0x84] sm:$0xf]  ;;  %v1078_v36 = vld [vmem:[%s2353_s0 + $0x88] sm:$0xf0] }
  0x16   :  { %1303 = vmatmul.msk.bf16.gmra.mxu1 %vm443_vm0, %v1025_v14  ;;  %545 = vmatpush.bf16.msra.mxu0 %v1400_v15  ;;  %v1380_v14 = vld [vmem:[%s2353_s0 + $0x174] sm:$0xf]  ;;  %v1214_v40 = vld [vmem:[%s2353_s0 + $0x198] sm:$0xf0]  ;;  %v1349_v42 = vld [vmem:[%s2353_s0 + $0x74] sm:$0xf0] }
  0x17   :  { %1412 = vmatpush.bf16.msra.mxu2 %v1400_v15  ;;  %1320 = vmatmul.msk.bf16.gmra.mxu3 %vm443_vm0, %v1161_v19  ;;  %v1198_v15 = vld [vmem:[%s2353_s0 + $0x178] sm:$0xf0]  ;;  %v1180_v19 = vld [vmem:[%s2353_s0 + $0x150] sm:$0xf]  ;;  %v1384_v39 = vld [vmem:[%s2353_s0 + $0x194] sm:$0xf] }
  0x18   :  { %v1201_v18 = vor.u32 %v1380_v14, %v1198_v15  ;;  %v1217_v43 = vor.u32 %v1384_v39, %v1214_v40  ;;  %v1196_v45 = vld [vmem:[%s2353_s0 + $0x170] sm:$0xf]  ;;  %v1381_v46 = vld [vmem:[%s2353_s0 + $0x174] sm:$0xf0]  ;;  %v1386_v55 = vld [vmem:[%s2353_s0 + $0x1a4] sm:$0xf] }
  0x19   :  { %v1197_v48 = vor.u32 %v1381_v46, %v1196_v45  ;;  %v1076_v57 = vld [vmem:[%s2353_s0 + $0x80] sm:$0xf]  ;;  %v1351_v58 = vld [vmem:[%s2353_s0 + $0x84] sm:$0xf0]  ;;  %v1094_v5 = vld [vmem:[%s2353_s0 + $0xa8] sm:$0xf0] }
  0x1a   :  { %546 = vmatpush.bf16.msra.mxu0 %v1399_v16  ;;  %v1383_v63 = vld [vmem:[%s2353_s0 + $0x184] sm:$0xf0]  ;;  %v1077_v0 = vor.u32 %v1351_v58, %v1076_v57  ;;  %v1238_v45 = vld [vmem:[%s2353_s0 + $0x1c8] sm:$0xf0]  ;;  %v1092_v46 = vld [vmem:[%s2353_s0 + $0xa0] sm:$0xf] }
  0x1b   :  { %1413 = vmatpush.bf16.msra.mxu2 %v1399_v16  ;;  %v1052_v16 = vld [vmem:[%s2353_s0 + $0x50] sm:$0xf] }
  0x1c   :  { %v1053_v21 = vor.u32 %v1345_v17, %v1052_v16  ;;  %v1388_v16 = vld [vmem:[%s2353_s0 + $0x1b4] sm:$0xf]  ;;  %v1230_v17 = vld [vmem:[%s2353_s0 + $0x1b8] sm:$0xf0] }
  0x1e   :  { %547 = vmatpush.bf16.msra.mxu0 %v1398_v20 }
  0x1f   :  { %1414 = vmatpush.bf16.msra.mxu2 %v1398_v20  ;;  %v1377_v20 = vld [vmem:[%s2353_s0 + $0x154] sm:$0xf0] }
  0x20   :  { %v1181_v22 = vor.u32 %v1377_v20, %v1180_v19  ;;  %v1353_v19 = vld [vmem:[%s2353_s0 + $0x94] sm:$0xf0]  ;;  %v1233_v20 = vor.u32 %v1388_v16, %v1230_v17  ;;  %v1392_v16 = vld [vmem:[%s2353_s0 + $0x1d4] sm:$0xf]  ;;  %v1246_v17 = vld [vmem:[%s2353_s0 + $0x1d8] sm:$0xf0] }
  0x21   :  { %548 = vmatmul.bf16.vlgmr.msra.gmra.mxu0 %v1013_v25  ;;  %v1073_v25 = vor.u32 %v1348_v23, %v1070_v24  ;;  %v1385_v23 = vld [vmem:[%s2353_s0 + $0x194] sm:$0xf0] }
  0x22   :  { %628 = vmatmul.bf16.vlgmr.msra.gmra.mxu2 %v1141_v26  ;;  %v1382_v26 = vld [vmem:[%s2353_s0 + $0x184] sm:$0xf] }
  0x23   :  { %v1209_v30 = vor.u32 %v1382_v26, %v1206_v27 }
  0x26   :  { %1304 = vmatmul.msk.bf16.gmra.mxu1 %vm443_vm0, %v1033_v29  ;;  %v1347_v29 = vld [vmem:[%s2353_s0 + $0x64] sm:$0xf0] }
  0x27   :  { %1321 = vmatmul.msk.bf16.gmra.mxu3 %vm443_vm0, %v1169_v32  ;;  %v1379_v32 = vld [vmem:[%s2353_s0 + $0x164] sm:$0xf0]  ;;  %v1061_v33 = vor.u32 %v1347_v29, %v1060_v28  ;;  %v1356_v29 = vld [vmem:[%s2353_s0 + $0xb4] sm:$0xf] }
  0x28   :  { %v1189_v34 = vor.u32 %v1379_v32, %v1188_v31 }
  0x31   :  { %553 = vmatmul.bf16.gmra.mxu0 %v1021_v37  ;;  %v1081_v37 = vor.u32 %v1350_v35, %v1078_v36 }
  0x32   :  { %633 = vmatmul.bf16.gmra.mxu2 %v1149_v38 }
  0x36   :  { %1305 = vmatmul.msk.bf16.gmra.mxu1 %vm443_vm0, %v1041_v41  ;;  %v1068_v41 = vld [vmem:[%s2353_s0 + $0x70] sm:$0xf] }
  0x37   :  { %1322 = vmatmul.msk.bf16.gmra.mxu3 %vm443_vm0, %v1177_v44  ;;  %v1069_v47 = vor.u32 %v1349_v42, %v1068_v41 }
  0x41   :  { %558 = vmatmul.bf16.gmra.mxu0 %v1029_v49  ;;  %v1352_v49 = vld [vmem:[%s2353_s0 + $0x94] sm:$0xf] }
  0x42   :  { %638 = vmatmul.bf16.gmra.mxu2 %v1157_v50  ;;  %v1086_v50 = vld [vmem:[%s2353_s0 + $0x98] sm:$0xf0] }
  0x43   :  { %v1089_v52 = vor.u32 %v1352_v49, %v1086_v50  ;;  %v1220_v50 = vld [vmem:[%s2353_s0 + $0x1a0] sm:$0xf] }
  0x46   :  { %1306 = vmatmul.msk.bf16.gmra.mxu1 %vm443_vm0, %v1049_v53 }
  0x47   :  { %1323 = vmatmul.msk.bf16.gmra.mxu3 %vm443_vm0, %v1185_v56  ;;  %v1222_v56 = vld [vmem:[%s2353_s0 + $0x1a8] sm:$0xf0] }
  0x48   :  { %v1225_v59 = vor.u32 %v1386_v55, %v1222_v56 }
  0x51   :  { %563 = vmatmul.bf16.gmra.mxu0 %v1037_v61  ;;  %v1841_v61 = vld [vmem:[%s2354_s2] ss:$0 sm:$0xff] }
  0x52   :  { %643 = vmatmul.bf16.gmra.mxu2 %v1165_v62  ;;  %v1204_v62 = vld [vmem:[%s2353_s0 + $0x180] sm:$0xf] }
  0x53   :  { %v1205_v2 = vor.u32 %v1383_v63, %v1204_v62 }
  0x56   :  { %1307 = vmatmul.msk.bf16.gmra.mxu1 %vm443_vm0, %v1057_v1 }
  0x57   :  { %1324 = vmatmul.msk.bf16.gmra.mxu3 %vm443_vm0, %v1193_v4  ;;  %v1354_v4 = vld [vmem:[%s2353_s0 + $0xa4] sm:$0xf] }
  0x58   :  { %v1097_v8 = vor.u32 %v1354_v4, %v1094_v5 }
  0x61   :  { %568 = vmatmul.bf16.gmra.mxu0 %v1045_v9 }
  0x62   :  { %648 = vmatmul.bf16.gmra.mxu2 %v1173_v10 }
  0x66   :  { %1308 = vmatmul.msk.bf16.gmra.mxu1 %vm443_vm0, %v1065_v13 }
  0x67   :  { %1325 = vmatmul.msk.bf16.gmra.mxu3 %vm443_vm0, %v1201_v18  ;;  %v1084_v18 = vld [vmem:[%s2353_s0 + $0x90] sm:$0xf] }
  0x71   :  { %573 = vmatmul.bf16.gmra.mxu0 %v1053_v21 }
  0x72   :  { %653 = vmatmul.bf16.gmra.mxu2 %v1181_v22  ;;  %v1212_v22 = vld [vmem:[%s2353_s0 + $0x190] sm:$0xf] }
  0x73   :  { %v1213_v27 = vor.u32 %v1385_v23, %v1212_v22  ;;  %v1389_v22 = vld [vmem:[%s2353_s0 + $0x1b4] sm:$0xf0] }
  0x76   :  { %1309 = vmatmul.msk.bf16.gmra.mxu1 %vm443_vm0, %v1073_v25  ;;  %v1085_v25 = vor.u32 %v1353_v19, %v1084_v18  ;;  %v1357_v18 = vld [vmem:[%s2353_s0 + $0xb4] sm:$0xf0]  ;;  %v1249_v19 = vor.u32 %v1392_v16, %v1246_v17 }
  0x77   :  { %1326 = vmatmul.msk.bf16.gmra.mxu3 %vm443_vm0, %v1209_v30  ;;  %v1102_v30 = vld [vmem:[%s2353_s0 + $0xb8] sm:$0xf0] }
  0x81   :  { %578 = vmatmul.bf16.gmra.mxu0 %v1061_v33 }
  0x82   :  { %658 = vmatmul.bf16.gmra.mxu2 %v1189_v34  ;;  %v1105_v34 = vor.u32 %v1356_v29, %v1102_v30  ;;  %v1360_v30 = vld [vmem:[%s2353_s0 + $0xd4] sm:$0xf] }
  0x83   :  { %v718_v38 = vpop.f32.mrf.mxu1 }
  0x86   :  { %1310 = vmatmul.msk.bf16.gmra.mxu1 %vm443_vm0, %v1081_v37 }
  0x87   :  { %1327 = vmatmul.msk.bf16.gmra.mxu3 %vm443_vm0, %v1217_v43 }
  0x8a   :  { %v1821_v51 = vpop.f32.mrf.mxu3 }
  0x8b   :  { %v720_v44 = vpop.f32.mrf.mxu1 }
  0x91   :  { %583 = vmatmul.bf16.gmra.mxu0 %v1069_v47  ;;  %v1355_v47 = vld [vmem:[%s2353_s0 + $0xa4] sm:$0xf0] }
  0x92   :  { %663 = vmatmul.bf16.gmra.mxu2 %v1197_v48  ;;  %v1824_v54 = vpop.f32.mrf.mxu3 }
  0x93   :  { %v723_v53 = vpop.f32.mrf.mxu1 }
  0x96   :  { %1311 = vmatmul.msk.bf16.gmra.mxu1 %vm443_vm0, %v1089_v52 }
  0x97   :  { %1328 = vmatmul.msk.bf16.gmra.mxu3 %vm443_vm0, %v1225_v59  ;;  %v1358_v59 = vld [vmem:[%s2353_s0 + $0xc4] sm:$0xf] }
  0x9a   :  { %v1857_v6 = vpop.f32.mrf.mxu3 }
  0x9b   :  { %v725_v60 = vpop.f32.mrf.mxu1 }
  0x9e   :  { %v549_v1 = vpop.f32.mrf.mxu0 }
  0x9f   :  { %v550_v3 = vadd.f32 %v1841_v61, %v549_v1 }
  0xa1   :  { %v719_v7 = vadd.f32 %v718_v38, %v550_v3  ;;  %588 = vmatmul.bf16.gmra.mxu0 %v1077_v0 }
  0xa2   :  { %668 = vmatmul.bf16.gmra.mxu2 %v1205_v2  ;;  %v1865_v13 = vpop.f32.mrf.mxu3 }
  0xa3   :  { %1417 = vtanh.f32 %v719_v7  ;;  %v1859_v9 = vpop.f32.mrf.mxu1 }
  0xa5   :  { %v1861_v10 = vpop.f32.mrf.mxu2 }
  0xa6   :  { %1312 = vmatmul.msk.bf16.gmra.mxu1 %vm443_vm0, %v1097_v8  ;;  %v551_v11 = vpop.f32.mrf.mxu0 }
  0xa7   :  { %v552_v12 = vadd.f32 %v1841_v61, %v551_v11  ;;  %1329 = vmatmul.msk.bf16.gmra.mxu3 %vm443_vm0, %v1233_v20 }
  0xa9   :  { %v1418_v14 = vpop.eup %1417  ;;  %v721_v15 = vadd.f32 %v720_v44, %v552_v12  ;;  %v1390_v44 = vld [vmem:[%s2353_s0 + $0x1c4] sm:$0xf] }
  0xaa   :  { %942 = vst [vmem:[%s2355_s3] sm:$0xff] %v1418_v14  ;;  %v1900_v31 = vpop.f32.mrf.mxu3  ;;  %v1241_v48 = vor.u32 %v1390_v44, %v1238_v45 }
  0xab   :  { %1419 = vtanh.f32 %v721_v15  ;;  %v1882_v21 = vpop.f32.mrf.mxu1 }
  0xad   :  { %v1891_v24 = vpop.f32.mrf.mxu2 }
  0xae   :  { %v554_v26 = vpop.f32.mrf.mxu0 }
  0xaf   :  { %v555_v28 = vadd.f32 %v1841_v61, %v554_v26 }
  0xb1   :  { %v1420_v32 = vpop.eup %1419  ;;  %v724_v33 = vadd.f32 %v723_v53, %v555_v28  ;;  %593 = vmatmul.bf16.gmra.mxu0 %v1085_v25  ;;  %v1093_v53 = vor.u32 %v1355_v47, %v1092_v46 }
  0xb2   :  { %943 = vst [vmem:[%s2355_s3 + $0x8] sm:$0xff] %v1420_v32  ;;  %673 = vmatmul.bf16.gmra.mxu2 %v1213_v27  ;;  %v1910_v40 = vpop.f32.mrf.mxu3  ;;  %v1118_v32 = vld [vmem:[%s2353_s0 + $0xd8] sm:$0xf0] }
  0xb3   :  { %1421 = vtanh.f32 %v724_v33  ;;  %v1905_v35 = vpop.f32.mrf.mxu1 }
  0xb5   :  { %v634_v36 = vpop.f32.mrf.mxu2 }
  0xb6   :  { %v635_v37 = vadd.f32 %v1841_v61, %v634_v36  ;;  %1313 = vmatmul.msk.bf16.gmra.mxu1 %vm443_vm0, %v1105_v34  ;;  %v556_v38 = vpop.f32.mrf.mxu0 }
  0xb7   :  { %v557_v39 = vadd.f32 %v1841_v61, %v556_v38  ;;  %1330 = vmatmul.msk.bf16.gmra.mxu3 %vm443_vm0, %v1241_v48 }
  0xb8   :  { %v804_v41 = vadd.f32 %v1821_v51, %v635_v37  ;;  %v1387_v51 = vld [vmem:[%s2353_s0 + $0x1a4] sm:$0xf0] }
  0xb9   :  { %v1422_v42 = vpop.eup %1421  ;;  %v726_v43 = vadd.f32 %v725_v60, %v557_v39  ;;  %v1221_v57 = vor.u32 %v1387_v51, %v1220_v50  ;;  %v1110_v60 = vld [vmem:[%s2353_s0 + $0xc8] sm:$0xf0]  ;;  %v1121_v39 = vor.u32 %v1360_v30, %v1118_v32  ;;  %v1394_v50 = vld [vmem:[%s2353_s0 + $0x1e4] sm:$0xf] }
  0xba   :  { %944 = vst [vmem:[%s2355_s3 + $0x10] sm:$0xff] %v1422_v42  ;;  %1423 = vtanh.f32 %v804_v41  ;;  %v1945_v62 = vpop.f32.mrf.mxu3  ;;  %v1113_v3 = vor.u32 %v1358_v59, %v1110_v60  ;;  %v1254_v51 = vld [vmem:[%s2353_s0 + $0x1e8] sm:$0xf0] }
  0xbb   :  { %1425 = vtanh.f32 %v726_v43  ;;  %v1928_v49 = vpop.f32.mrf.mxu1 }
  0xbd   :  { %v636_v52 = vpop.f32.mrf.mxu2 }
  0xbe   :  { %v637_v55 = vadd.f32 %v1841_v61, %v636_v52  ;;  %v559_v56 = vpop.f32.mrf.mxu0  ;;  %v1257_v52 = vor.u32 %v1394_v50, %v1254_v51 }
  0xbf   :  { %v560_v58 = vadd.f32 %v1841_v61, %v559_v56  ;;  %v1391_v56 = vld [vmem:[%s2353_s0 + $0x1c4] sm:$0xf0] }
  0xc0   :  { %v1424_v63 = vpop.eup %1423  ;;  %v806_v0 = vadd.f32 %v1824_v54, %v637_v55  ;;  %v1236_v55 = vld [vmem:[%s2353_s0 + $0x1c0] sm:$0xf] }
  0xc1   :  { %v1426_v1 = vpop.eup %1425  ;;  %976 = vst [vmem:[%s2355_s3 + $0x110] sm:$0xff] %v1424_v63  ;;  %v729_v2 = vadd.f32 %v1859_v9, %v560_v58  ;;  %598 = vmatmul.bf16.gmra.mxu0 %v1093_v53  ;;  %v1237_v63 = vor.u32 %v1391_v56, %v1236_v55  ;;  %v1395_v56 = vld [vmem:[%s2353_s0 + $0x1e4] sm:$0xf0] }
  0xc2   :  { %945 = vst [vmem:[%s2355_s3 + $0x18] sm:$0xff] %v1426_v1  ;;  %1427 = vtanh.f32 %v806_v0  ;;  %678 = vmatmul.bf16.gmra.mxu2 %v1221_v57  ;;  %v1960_v9 = vpop.f32.mrf.mxu3  ;;  %v1362_v1 = vld [vmem:[%s2353_s0 + $0xe4] sm:$0xf] }
  0xc3   :  { %1429 = vtanh.f32 %v729_v2  ;;  %v1955_v4 = vpop.f32.mrf.mxu1  ;;  %v1126_v2 = vld [vmem:[%s2353_s0 + $0xe8] sm:$0xf0] }
  0xc5   :  { %v639_v5 = vpop.f32.mrf.mxu2 }
  0xc6   :  { %v640_v54 = vadd.f32 %v1841_v61, %v639_v5  ;;  %1314 = vmatmul.msk.bf16.gmra.mxu1 %vm443_vm0, %v1113_v3  ;;  %v561_v7 = vpop.f32.mrf.mxu0 }
  0xc7   :  { %v562_v8 = vadd.f32 %v1841_v61, %v561_v7  ;;  %1331 = vmatmul.msk.bf16.gmra.mxu3 %vm443_vm0, %v1249_v19  ;;  %v1396_v19 = vld [vmem:[%s2353_s0 + $0x1f4] sm:$0xf] }
  0xc8   :  { %v1428_v11 = vpop.eup %1427  ;;  %v809_v12 = vadd.f32 %v1857_v6, %v640_v54  ;;  %v1100_v6 = vld [vmem:[%s2353_s0 + $0xb0] sm:$0xf] }
  0xc9   :  { %v1430_v14 = vpop.eup %1429  ;;  %977 = vst [vmem:[%s2355_s3 + $0x118] sm:$0xff] %v1428_v11  ;;  %v731_v15 = vadd.f32 %v1882_v21, %v562_v8  ;;  %v1228_v21 = vld [vmem:[%s2353_s0 + $0x1b0] sm:$0xf]  ;;  %v1101_v25 = vor.u32 %v1357_v18, %v1100_v6  ;;  %v1129_v11 = vor.u32 %v1362_v1, %v1126_v2  ;;  %v1366_v1 = vld [vmem:[%s2353_s0 + $0x104] sm:$0xf] }
  0xca   :  { %946 = vst [vmem:[%s2355_s3 + $0x20] sm:$0xff] %v1430_v14  ;;  %1431 = vtanh.f32 %v809_v12  ;;  %v1229_v28 = vor.u32 %v1389_v22, %v1228_v21  ;;  %v1999_v33 = vpop.f32.mrf.mxu3  ;;  %v1262_v21 = vld [vmem:[%s2353_s0 + $0x1f8] sm:$0xf0]  ;;  %v1142_v2 = vld [vmem:[%s2353_s0 + $0x108] sm:$0xf0] }
  0xcb   :  { %1433 = vtanh.f32 %v731_v15  ;;  %v1982_v20 = vpop.f32.mrf.mxu1  ;;  %v1265_v22 = vor.u32 %v1396_v19, %v1262_v21  ;;  %v1132_v21 = vld [vmem:[%s2353_s0 + $0xf0] sm:$0xf] }
  0xcd   :  { %v641_v23 = vpop.f32.mrf.mxu2 }
  0xce   :  { %v642_v26 = vadd.f32 %v1841_v61, %v641_v23  ;;  %v564_v27 = vpop.f32.mrf.mxu0 }
  0xcf   :  { %v565_v29 = vadd.f32 %v1841_v61, %v564_v27 }
  0xd0   :  { %v1432_v34 = vpop.eup %1431  ;;  %v811_v36 = vadd.f32 %v1865_v13, %v642_v26  ;;  %v1393_v26 = vld [vmem:[%s2353_s0 + $0x1d4] sm:$0xf0] }
  0xd1   :  { %v1434_v37 = vpop.eup %1433  ;;  %978 = vst [vmem:[%s2355_s3 + $0x120] sm:$0xff] %v1432_v34  ;;  %v734_v38 = vadd.f32 %v1905_v35, %v565_v29  ;;  %603 = vmatmul.bf16.gmra.mxu0 %v1101_v25  ;;  %v1244_v25 = vld [vmem:[%s2353_s0 + $0x1d0] sm:$0xf] }
  0xd2   :  { %947 = vst [vmem:[%s2355_s3 + $0x28] sm:$0xff] %v1434_v37  ;;  %1435 = vtanh.f32 %v811_v36  ;;  %683 = vmatmul.bf16.gmra.mxu2 %v1229_v28  ;;  %v2014_v35 = vpop.f32.mrf.mxu3  ;;  %v1245_v34 = vor.u32 %v1393_v26, %v1244_v25  ;;  %v1364_v37 = vld [vmem:[%s2353_s0 + $0xf4] sm:$0xf] }
  0xd3   :  { %1437 = vtanh.f32 %v734_v38  ;;  %v2009_v41 = vpop.f32.mrf.mxu1  ;;  %v1134_v38 = vld [vmem:[%s2353_s0 + $0xf8] sm:$0xf0] }
  0xd5   :  { %v644_v42 = vpop.f32.mrf.mxu2 }
  0xd6   :  { %v645_v13 = vadd.f32 %v1841_v61, %v644_v42  ;;  %1315 = vmatmul.msk.bf16.gmra.mxu1 %vm443_vm0, %v1121_v39  ;;  %v566_v43 = vpop.f32.mrf.mxu0 }
  0xd7   :  { %v567_v44 = vadd.f32 %v1841_v61, %v566_v43  ;;  %1332 = vmatmul.msk.bf16.gmra.mxu3 %vm443_vm0, %v1257_v52  ;;  %v1124_v52 = vld [vmem:[%s2353_s0 + $0xe0] sm:$0xf] }
  0xd8   :  { %v1436_v45 = vpop.eup %1435  ;;  %v814_v46 = vadd.f32 %v1900_v31, %v645_v13  ;;  %v1108_v31 = vld [vmem:[%s2353_s0 + $0xc0] sm:$0xf] }
  0xd9   :  { %v1438_v47 = vpop.eup %1437  ;;  %979 = vst [vmem:[%s2355_s3 + $0x128] sm:$0xff] %v1436_v45  ;;  %v736_v48 = vadd.f32 %v1928_v49, %v567_v44  ;;  %v1359_v49 = vld [vmem:[%s2353_s0 + $0xc4] sm:$0xf0]  ;;  %v1137_v44 = vor.u32 %v1364_v37, %v1134_v38 }
  0xda   :  { %948 = vst [vmem:[%s2355_s3 + $0x30] sm:$0xff] %v1438_v47  ;;  %1439 = vtanh.f32 %v814_v46  ;;  %v1109_v58 = vor.u32 %v1359_v49, %v1108_v31  ;;  %v2058_v8 = vpop.f32.mrf.mxu3 }
  0xdb   :  { %1441 = vtanh.f32 %v736_v48  ;;  %v2036_v53 = vpop.f32.mrf.mxu1 }
  0xdd   :  { %v646_v57 = vpop.f32.mrf.mxu2 }
  0xde   :  { %v647_v59 = vadd.f32 %v1841_v61, %v646_v57  ;;  %v569_v60 = vpop.f32.mrf.mxu0 }
  0xdf   :  { %v570_v0 = vadd.f32 %v1841_v61, %v569_v60 }
  0xe0   :  { %v1440_v3 = vpop.eup %1439  ;;  %v816_v5 = vadd.f32 %v1910_v40, %v647_v59 }
  0xe1   :  { %v1442_v54 = vpop.eup %1441  ;;  %980 = vst [vmem:[%s2355_s3 + $0x130] sm:$0xff] %v1440_v3  ;;  %v739_v7 = vadd.f32 %v1955_v4, %v570_v0  ;;  %608 = vmatmul.bf16.gmra.mxu0 %v1109_v58 }
  0xe2   :  { %949 = vst [vmem:[%s2355_s3 + $0x38] sm:$0xff] %v1442_v54  ;;  %1443 = vtanh.f32 %v816_v5  ;;  %688 = vmatmul.bf16.gmra.mxu2 %v1237_v63  ;;  %v2096_v27 = vpop.f32.mrf.mxu3 }
  0xe3   :  { %1445 = vtanh.f32 %v739_v7  ;;  %v2063_v12 = vpop.f32.mrf.mxu1 }
  0xe5   :  { %v649_v40 = vpop.f32.mrf.mxu2 }
  0xe6   :  { %v650_v14 = vadd.f32 %v1841_v61, %v649_v40  ;;  %1316 = vmatmul.msk.bf16.gmra.mxu1 %vm443_vm0, %v1129_v11  ;;  %v571_v15 = vpop.f32.mrf.mxu0  ;;  %v1145_v40 = vor.u32 %v1366_v1, %v1142_v2 }
  0xe7   :  { %v572_v4 = vadd.f32 %v1841_v61, %v571_v15  ;;  %1333 = vmatmul.msk.bf16.gmra.mxu3 %vm443_vm0, %v1265_v22  ;;  %v1397_v22 = vld [vmem:[%s2353_s0 + $0x1f4] sm:$0xf0] }
  0xe8   :  { %v1444_v16 = vpop.eup %1443  ;;  %v819_v17 = vadd.f32 %v1945_v62, %v650_v14  ;;  %v1116_v62 = vld [vmem:[%s2353_s0 + $0xd0] sm:$0xf] }
  0xe9   :  { %v1446_v6 = vpop.eup %1445  ;;  %981 = vst [vmem:[%s2355_s3 + $0x138] sm:$0xff] %v1444_v16  ;;  %v741_v18 = vadd.f32 %v1982_v20, %v572_v4  ;;  %v1361_v20 = vld [vmem:[%s2353_s0 + $0xd4] sm:$0xf0] }
  0xea   :  { %950 = vst [vmem:[%s2355_s3 + $0x40] sm:$0xff] %v1446_v6  ;;  %1447 = vtanh.f32 %v819_v17  ;;  %v1117_v29 = vor.u32 %v1361_v20, %v1116_v62  ;;  %v1260_v20 = vld [vmem:[%s2353_s0 + $0x1f0] sm:$0xf] }
  0xeb   :  { %1449 = vtanh.f32 %v741_v18  ;;  %v2088_v23 = vpop.f32.mrf.mxu1 }
  0xed   :  { %v651_v28 = vpop.f32.mrf.mxu2 }
  0xee   :  { %v652_v30 = vadd.f32 %v1841_v61, %v651_v28  ;;  %v574_v32 = vpop.f32.mrf.mxu0 }
  0xef   :  { %v575_v36 = vadd.f32 %v1841_v61, %v574_v32 }
  0xf0   :  { %v1448_v39 = vpop.eup %1447  ;;  %v821_v42 = vadd.f32 %v1960_v9, %v652_v30  ;;  %v2117_v9 = vpop.f32.mrf.mxu3 }
  0xf1   :  { %v1450_v13 = vpop.eup %1449  ;;  %982 = vst [vmem:[%s2355_s3 + $0x140] sm:$0xff] %v1448_v39  ;;  %v744_v43 = vadd.f32 %v2009_v41, %v575_v36  ;;  %613 = vmatmul.bf16.gmra.mxu0 %v1117_v29  ;;  %v1261_v29 = vor.u32 %v1397_v22, %v1260_v20 }
  0xf2   :  { %951 = vst [vmem:[%s2355_s3 + $0x48] sm:$0xff] %v1450_v13  ;;  %1451 = vtanh.f32 %v821_v42  ;;  %693 = vmatmul.bf16.gmra.mxu2 %v1245_v34 }
  0xf3   :  { %1453 = vtanh.f32 %v744_v43  ;;  %v2115_v45 = vpop.f32.mrf.mxu1 }
  0xf5   :  { %v654_v46 = vpop.f32.mrf.mxu2 }
  0xf6   :  { %v655_v47 = vadd.f32 %v1841_v61, %v654_v46  ;;  %1317 = vmatmul.msk.bf16.gmra.mxu1 %vm443_vm0, %v1137_v44  ;;  %v576_v48 = vpop.f32.mrf.mxu0 }
  0xf7   :  { %v577_v41 = vadd.f32 %v1841_v61, %v576_v48 }
  0xf8   :  { %v1452_v50 = vpop.eup %1451  ;;  %v824_v51 = vadd.f32 %v1999_v33, %v655_v47  ;;  %v1363_v33 = vld [vmem:[%s2353_s0 + $0xe4] sm:$0xf0]  ;;  %v2152_v3 = vpop.f32.mrf.mxu3 }
  0xf9   :  { %v1454_v31 = vpop.eup %1453  ;;  %983 = vst [vmem:[%s2355_s3 + $0x148] sm:$0xff] %v1452_v50  ;;  %v746_v49 = vadd.f32 %v2036_v53, %v577_v41  ;;  %v1252_v53 = vld [vmem:[%s2353_s0 + $0x1e0] sm:$0xf]  ;;  %v1125_v58 = vor.u32 %v1363_v33, %v1124_v52 }
  0xfa   :  { %952 = vst [vmem:[%s2355_s3 + $0x50] sm:$0xff] %v1454_v31  ;;  %1455 = vtanh.f32 %v824_v51  ;;  %v1253_v63 = vor.u32 %v1395_v56, %v1252_v53 }
  0xfb   :  { %1457 = vtanh.f32 %v746_v49  ;;  %v2136_v55 = vpop.f32.mrf.mxu1 }
  0xfd   :  { %v656_v57 = vpop.f32.mrf.mxu2 }
  0xfe   :  { %v657_v59 = vadd.f32 %v1841_v61, %v656_v57  ;;  %v579_v60 = vpop.f32.mrf.mxu0 }
  0xff   :  { %v580_v0 = vadd.f32 %v1841_v61, %v579_v60 }
 0x100   :  { %v1456_v5 = vpop.eup %1455  ;;  %v826_v54 = vadd.f32 %v2014_v35, %v657_v59  ;;  %v838_v19 = vpop.f32.mrf.mxu3 }
 0x101   :  { %v1458_v7 = vpop.eup %1457  ;;  %984 = vst [vmem:[%s2355_s3 + $0x150] sm:$0xff] %v1456_v5  ;;  %v749_v11 = vadd.f32 %v2063_v12, %v580_v0  ;;  %618 = vmatmul.bf16.gmra.mxu0 %v1125_v58 }
 0x102   :  { %953 = vst [vmem:[%s2355_s3 + $0x58] sm:$0xff] %v1458_v7  ;;  %1459 = vtanh.f32 %v826_v54  ;;  %698 = vmatmul.bf16.gmra.mxu2 %v1253_v63 }
 0x103   :  { %1461 = vtanh.f32 %v749_v11  ;;  %v758_v14 = vpop.f32.mrf.mxu1 }
 0x105   :  { %v659_v15 = vpop.f32.mrf.mxu2 }
 0x106   :  { %v660_v35 = vadd.f32 %v1841_v61, %v659_v15  ;;  %1318 = vmatmul.msk.bf16.gmra.mxu1 %vm443_vm0, %v1145_v40  ;;  %v581_v4 = vpop.f32.mrf.mxu0 }
 0x107   :  { %v582_v16 = vadd.f32 %v1841_v61, %v581_v4 }
 0x108   :  { %v1460_v17 = vpop.eup %1459  ;;  %v829_v12 = vadd.f32 %v2058_v8, %v660_v35  ;;  %v1365_v8 = vld [vmem:[%s2353_s0 + $0xf4] sm:$0xf0]  ;;  %v840_v39 = vpop.f32.mrf.mxu3 }
 0x109   :  { %v1462_v6 = vpop.eup %1461  ;;  %985 = vst [vmem:[%s2355_s3 + $0x158] sm:$0xff] %v1460_v17  ;;  %v751_v18 = vadd.f32 %v2088_v23, %v582_v16  ;;  %v1133_v25 = vor.u32 %v1365_v8, %v1132_v21 }
 0x10a   :  { %954 = vst [vmem:[%s2355_s3 + $0x60] sm:$0xff] %v1462_v6  ;;  %1463 = vtanh.f32 %v829_v12 }
 0x10b   :  { %1465 = vtanh.f32 %v751_v18  ;;  %v760_v62 = vpop.f32.mrf.mxu1 }
 0x10d   :  { %v661_v23 = vpop.f32.mrf.mxu2 }
 0x10e   :  { %v662_v26 = vadd.f32 %v1841_v61, %v661_v23  ;;  %v584_v28 = vpop.f32.mrf.mxu0 }
 0x10f   :  { %v585_v30 = vadd.f32 %v1841_v61, %v584_v28 }
 0x110   :  { %v1464_v32 = vpop.eup %1463  ;;  %v831_v34 = vadd.f32 %v2096_v27, %v662_v26  ;;  %v843_v50 = vpop.f32.mrf.mxu3 }
 0x111   :  { %v1466_v36 = vpop.eup %1465  ;;  %986 = vst [vmem:[%s2355_s3 + $0x160] sm:$0xff] %v1464_v32  ;;  %v754_v37 = vadd.f32 %v2115_v45, %v585_v30  ;;  %623 = vmatmul.bf16.gmra.mxu0 %v1133_v25 }
 0x112   :  { %955 = vst [vmem:[%s2355_s3 + $0x68] sm:$0xff] %v1466_v36  ;;  %1467 = vtanh.f32 %v831_v34  ;;  %703 = vmatmul.bf16.gmra.mxu2 %v1261_v29 }
 0x113   :  { %1469 = vtanh.f32 %v754_v37  ;;  %v763_v38 = vpop.f32.mrf.mxu1 }
 0x115   :  { %v664_v42 = vpop.f32.mrf.mxu2 }
 0x116   :  { %v665_v27 = vadd.f32 %v1841_v61, %v664_v42  ;;  %v586_v13 = vpop.f32.mrf.mxu0 }
 0x117   :  { %v587_v43 = vadd.f32 %v1841_v61, %v586_v13 }
 0x118   :  { %v1468_v44 = vpop.eup %1467  ;;  %v834_v46 = vadd.f32 %v2117_v9, %v665_v27  ;;  %v845_v60 = vpop.f32.mrf.mxu3 }
 0x119   :  { %v1470_v45 = vpop.eup %1469  ;;  %987 = vst [vmem:[%s2355_s3 + $0x168] sm:$0xff] %v1468_v44  ;;  %v756_v47 = vadd.f32 %v2136_v55, %v587_v43 }
 0x11a   :  { %956 = vst [vmem:[%s2355_s3 + $0x70] sm:$0xff] %v1470_v45  ;;  %1471 = vtanh.f32 %v834_v46 }
 0x11b   :  { %1473 = vtanh.f32 %v756_v47  ;;  %v765_v48 = vpop.f32.mrf.mxu1 }
 0x11d   :  { %v666_v41 = vpop.f32.mrf.mxu2 }
 0x11e   :  { %v667_v51 = vadd.f32 %v1841_v61, %v666_v41  ;;  %v589_v31 = vpop.f32.mrf.mxu0 }
 0x11f   :  { %v590_v9 = vadd.f32 %v1841_v61, %v589_v31 }
 0x120   :  { %v1472_v49 = vpop.eup %1471  ;;  %v836_v52 = vadd.f32 %v2152_v3, %v667_v51  ;;  %v848_v4 = vpop.f32.mrf.mxu3 }
 0x121   :  { %v1474_v33 = vpop.eup %1473  ;;  %988 = vst [vmem:[%s2355_s3 + $0x170] sm:$0xff] %v1472_v49  ;;  %v759_v55 = vadd.f32 %v758_v14, %v590_v9 }
 0x122   :  { %957 = vst [vmem:[%s2355_s3 + $0x78] sm:$0xff] %v1474_v33  ;;  %1475 = vtanh.f32 %v836_v52 }
 0x123   :  { %1477 = vtanh.f32 %v759_v55  ;;  %v768_v53 = vpop.f32.mrf.mxu1 }
 0x125   :  { %v669_v56 = vpop.f32.mrf.mxu2 }
 0x126   :  { %v670_v57 = vadd.f32 %v1841_v61, %v669_v56  ;;  %v591_v58 = vpop.f32.mrf.mxu0 }
 0x127   :  { %v592_v59 = vadd.f32 %v1841_v61, %v591_v58 }
 0x128   :  { %v1476_v63 = vpop.eup %1475  ;;  %v839_v0 = vadd.f32 %v838_v19, %v670_v57  ;;  %v850_v22 = vpop.f32.mrf.mxu3 }
 0x129   :  { %v1478_v1 = vpop.eup %1477  ;;  %989 = vst [vmem:[%s2355_s3 + $0x178] sm:$0xff] %v1476_v63  ;;  %v761_v2 = vadd.f32 %v760_v62, %v592_v59 }
 0x12a   :  { %958 = vst [vmem:[%s2355_s3 + $0x80] sm:$0xff] %v1478_v1  ;;  %1479 = vtanh.f32 %v839_v0 }
 0x12b   :  { %1481 = vtanh.f32 %v761_v2  ;;  %v770_v3 = vpop.f32.mrf.mxu1 }
 0x12d   :  { %v671_v5 = vpop.f32.mrf.mxu2 }
 0x12e   :  { %v672_v54 = vadd.f32 %v1841_v61, %v671_v5  ;;  %v594_v7 = vpop.f32.mrf.mxu0 }
 0x12f   :  { %v595_v11 = vadd.f32 %v1841_v61, %v594_v7 }
 0x130   :  { %v1480_v40 = vpop.eup %1479  ;;  %v841_v14 = vadd.f32 %v840_v39, %v672_v54 }
 0x131   :  { %v1482_v15 = vpop.eup %1481  ;;  %990 = vst [vmem:[%s2355_s3 + $0x180] sm:$0xff] %v1480_v40  ;;  %v764_v35 = vadd.f32 %v763_v38, %v595_v11  ;;  %v853_v38 = vpop.f32.mrf.mxu3 }
 0x132   :  { %959 = vst [vmem:[%s2355_s3 + $0x88] sm:$0xff] %v1482_v15  ;;  %1483 = vtanh.f32 %v841_v14 }
 0x133   :  { %1485 = vtanh.f32 %v764_v35  ;;  %v773_v16 = vpop.f32.mrf.mxu1 }
 0x135   :  { %v674_v17 = vpop.f32.mrf.mxu2 }
 0x136   :  { %v675_v12 = vadd.f32 %v1841_v61, %v674_v17  ;;  %v596_v6 = vpop.f32.mrf.mxu0 }
 0x137   :  { %v597_v18 = vadd.f32 %v1841_v61, %v596_v6 }
 0x138   :  { %v1484_v19 = vpop.eup %1483  ;;  %v844_v21 = vadd.f32 %v843_v50, %v675_v12 }
 0x139   :  { %v1486_v8 = vpop.eup %1485  ;;  %991 = vst [vmem:[%s2355_s3 + $0x188] sm:$0xff] %v1484_v19  ;;  %v766_v62 = vadd.f32 %v765_v48, %v597_v18  ;;  %v855_v51 = vpop.f32.mrf.mxu3 }
 0x13a   :  { %960 = vst [vmem:[%s2355_s3 + $0x90] sm:$0xff] %v1486_v8  ;;  %1487 = vtanh.f32 %v844_v21 }
 0x13b   :  { %1489 = vtanh.f32 %v766_v62  ;;  %v775_v20 = vpop.f32.mrf.mxu1 }
 0x13d   :  { %v676_v23 = vpop.f32.mrf.mxu2 }
 0x13e   :  { %v677_v25 = vadd.f32 %v1841_v61, %v676_v23  ;;  %v599_v26 = vpop.f32.mrf.mxu0 }
 0x13f   :  { %v600_v28 = vadd.f32 %v1841_v61, %v599_v26 }
 0x140   :  { %v1488_v29 = vpop.eup %1487  ;;  %v846_v30 = vadd.f32 %v845_v60, %v677_v25 }
 0x141   :  { %v1490_v32 = vpop.eup %1489  ;;  %992 = vst [vmem:[%s2355_s3 + $0x190] sm:$0xff] %v1488_v29  ;;  %v769_v34 = vadd.f32 %v768_v53, %v600_v28  ;;  %v858_v0 = vpop.f32.mrf.mxu3 }
 0x142   :  { %961 = vst [vmem:[%s2355_s3 + $0x98] sm:$0xff] %v1490_v32  ;;  %1491 = vtanh.f32 %v846_v30 }
 0x143   :  { %1493 = vtanh.f32 %v769_v34  ;;  %v778_v36 = vpop.f32.mrf.mxu1 }
 0x145   :  { %v679_v37 = vpop.f32.mrf.mxu2 }
 0x146   :  { %v680_v39 = vadd.f32 %v1841_v61, %v679_v37  ;;  %v601_v42 = vpop.f32.mrf.mxu0 }
 0x147   :  { %v602_v27 = vadd.f32 %v1841_v61, %v601_v42 }
 0x148   :  { %v1492_v13 = vpop.eup %1491  ;;  %v849_v43 = vadd.f32 %v848_v4, %v680_v39 }
 0x149   :  { %v1494_v44 = vpop.eup %1493  ;;  %993 = vst [vmem:[%s2355_s3 + $0x198] sm:$0xff] %v1492_v13  ;;  %v771_v46 = vadd.f32 %v770_v3, %v602_v27  ;;  %v860_v35 = vpop.f32.mrf.mxu3 }
 0x14a   :  { %962 = vst [vmem:[%s2355_s3 + $0xa0] sm:$0xff] %v1494_v44  ;;  %1495 = vtanh.f32 %v849_v43 }
 0x14b   :  { %1497 = vtanh.f32 %v771_v46  ;;  %v780_v45 = vpop.f32.mrf.mxu1 }
 0x14d   :  { %v681_v47 = vpop.f32.mrf.mxu2 }
 0x14e   :  { %v682_v48 = vadd.f32 %v1841_v61, %v681_v47  ;;  %v604_v41 = vpop.f32.mrf.mxu0 }
 0x14f   :  { %v605_v50 = vadd.f32 %v1841_v61, %v604_v41 }
 0x150   :  { %v1496_v31 = vpop.eup %1495  ;;  %v851_v9 = vadd.f32 %v850_v22, %v682_v48 }
 0x151   :  { %v1498_v49 = vpop.eup %1497  ;;  %994 = vst [vmem:[%s2355_s3 + $0x1a0] sm:$0xff] %v1496_v31  ;;  %v774_v52 = vadd.f32 %v773_v16, %v605_v50 }
 0x152   :  { %963 = vst [vmem:[%s2355_s3 + $0xa8] sm:$0xff] %v1498_v49  ;;  %1499 = vtanh.f32 %v851_v9  ;;  %v630_v49 = vadd.f32 %v1841_v61, %v1861_v10 }
 0x153   :  { %1501 = vtanh.f32 %v774_v52  ;;  %v783_v33 = vpop.f32.mrf.mxu1 }
 0x155   :  { %v684_v55 = vpop.f32.mrf.mxu2 }
 0x156   :  { %v685_v53 = vadd.f32 %v1841_v61, %v684_v55  ;;  %v606_v56 = vpop.f32.mrf.mxu0 }
 0x157   :  { %v607_v57 = vadd.f32 %v1841_v61, %v606_v56 }
 0x158   :  { %v1500_v58 = vpop.eup %1499  ;;  %v854_v59 = vadd.f32 %v853_v38, %v685_v53 }
 0x159   :  { %v1502_v60 = vpop.eup %1501  ;;  %995 = vst [vmem:[%s2355_s3 + $0x1a8] sm:$0xff] %v1500_v58  ;;  %v776_v63 = vadd.f32 %v775_v20, %v607_v57  ;;  %v863_v20 = vpop.f32.mrf.mxu3 }
 0x15a   :  { %964 = vst [vmem:[%s2355_s3 + $0xb0] sm:$0xff] %v1502_v60  ;;  %1503 = vtanh.f32 %v854_v59 }
 0x15b   :  { %1505 = vtanh.f32 %v776_v63  ;;  %v785_v1 = vpop.f32.mrf.mxu1  ;;  %v632_v63 = vadd.f32 %v1841_v61, %v1891_v24 }
 0x15d   :  { %v686_v2 = vpop.f32.mrf.mxu2 }
 0x15e   :  { %v687_v3 = vadd.f32 %v1841_v61, %v686_v2  ;;  %v609_v5 = vpop.f32.mrf.mxu0 }
 0x15f   :  { %v610_v54 = vadd.f32 %v1841_v61, %v609_v5 }
 0x160   :  { %v1504_v7 = vpop.eup %1503  ;;  %v856_v11 = vadd.f32 %v855_v51, %v687_v3 }
 0x161   :  { %v1506_v40 = vpop.eup %1505  ;;  %996 = vst [vmem:[%s2355_s3 + $0x1b0] sm:$0xff] %v1504_v7  ;;  %v779_v14 = vadd.f32 %v778_v36, %v610_v54  ;;  %v865_v39 = vpop.f32.mrf.mxu3 }
 0x162   :  { %965 = vst [vmem:[%s2355_s3 + $0xb8] sm:$0xff] %v1506_v40  ;;  %1507 = vtanh.f32 %v856_v11 }
 0x163   :  { %1509 = vtanh.f32 %v779_v14  ;;  %v788_v15 = vpop.f32.mrf.mxu1 }
 0x165   :  { %v689_v4 = vpop.f32.mrf.mxu2 }
 0x166   :  { %v690_v16 = vadd.f32 %v1841_v61, %v689_v4  ;;  %v611_v17 = vpop.f32.mrf.mxu0 }
 0x167   :  { %v612_v12 = vadd.f32 %v1841_v61, %v611_v17 }
 0x168   :  { %v1508_v6 = vpop.eup %1507  ;;  %v859_v18 = vadd.f32 %v858_v0, %v690_v16 }
 0x169   :  { %v1510_v19 = vpop.eup %1509  ;;  %997 = vst [vmem:[%s2355_s3 + $0x1b8] sm:$0xff] %v1508_v6  ;;  %v781_v21 = vadd.f32 %v780_v45, %v612_v12  ;;  %v868_v9 = vpop.f32.mrf.mxu3 }
 0x16a   :  { %966 = vst [vmem:[%s2355_s3 + $0xc0] sm:$0xff] %v1510_v19  ;;  %1511 = vtanh.f32 %v859_v18 }
 0x16b   :  { %1513 = vtanh.f32 %v781_v21  ;;  %v790_v8 = vpop.f32.mrf.mxu1 }
 0x16d   :  { %v691_v62 = vpop.f32.mrf.mxu2 }
 0x16e   :  { %v692_v22 = vadd.f32 %v1841_v61, %v691_v62  ;;  %v614_v23 = vpop.f32.mrf.mxu0 }
 0x16f   :  { %v615_v25 = vadd.f32 %v1841_v61, %v614_v23 }
 0x170   :  { %v1512_v26 = vpop.eup %1511  ;;  %v861_v28 = vadd.f32 %v860_v35, %v692_v22 }
 0x171   :  { %v1514_v29 = vpop.eup %1513  ;;  %998 = vst [vmem:[%s2355_s3 + $0x1c0] sm:$0xff] %v1512_v26  ;;  %v784_v30 = vadd.f32 %v783_v33, %v615_v25  ;;  %v870_v0 = vpop.f32.mrf.mxu3 }
 0x172   :  { %967 = vst [vmem:[%s2355_s3 + $0xc8] sm:$0xff] %v1514_v29  ;;  %1515 = vtanh.f32 %v861_v28 }
 0x173   :  { %1517 = vtanh.f32 %v784_v30  ;;  %v793_v32 = vpop.f32.mrf.mxu1 }
 0x175   :  { %v694_v34 = vpop.f32.mrf.mxu2 }
 0x176   :  { %v695_v36 = vadd.f32 %v1841_v61, %v694_v34  ;;  %v616_v37 = vpop.f32.mrf.mxu0 }
 0x177   :  { %v617_v38 = vadd.f32 %v1841_v61, %v616_v37 }
 0x178   :  { %v1516_v42 = vpop.eup %1515  ;;  %v864_v27 = vadd.f32 %v863_v20, %v695_v36 }
 0x179   :  { %v1518_v13 = vpop.eup %1517  ;;  %999 = vst [vmem:[%s2355_s3 + $0x1c8] sm:$0xff] %v1516_v42  ;;  %v786_v43 = vadd.f32 %v785_v1, %v617_v38  ;;  %v873_v4 = vpop.f32.mrf.mxu3 }
 0x17a   :  { %968 = vst [vmem:[%s2355_s3 + $0xd0] sm:$0xff] %v1518_v13  ;;  %1519 = vtanh.f32 %v864_v27 }
 0x17b   :  { %1521 = vtanh.f32 %v786_v43  ;;  %v795_v44 = vpop.f32.mrf.mxu1 }
 0x17d   :  { %v696_v46 = vpop.f32.mrf.mxu2 }
 0x17e   :  { %v697_v45 = vadd.f32 %v1841_v61, %v696_v46  ;;  %v619_v47 = vpop.f32.mrf.mxu0 }
 0x17f   :  { %v620_v48 = vadd.f32 %v1841_v61, %v619_v47 }
 0x180   :  { %v1520_v41 = vpop.eup %1519  ;;  %v866_v50 = vadd.f32 %v865_v39, %v697_v45 }
 0x181   :  { %v1522_v51 = vpop.eup %1521  ;;  %1000 = vst [vmem:[%s2355_s3 + $0x1d0] sm:$0xff] %v1520_v41  ;;  %v789_v31 = vadd.f32 %v788_v15, %v620_v48  ;;  %v875_v22 = vpop.f32.mrf.mxu3 }
 0x182   :  { %969 = vst [vmem:[%s2355_s3 + $0xd8] sm:$0xff] %v1522_v51  ;;  %1523 = vtanh.f32 %v866_v50 }
 0x183   :  { %1525 = vtanh.f32 %v789_v31  ;;  %v798_v52 = vpop.f32.mrf.mxu1 }
 0x184   :  { %v799_v33 = vadd.f32 %v798_v52, %v630_v49 }
 0x185   :  { %v699_v55 = vpop.f32.mrf.mxu2 }
 0x186   :  { %1527 = vtanh.f32 %v799_v33  ;;  %v700_v53 = vadd.f32 %v1841_v61, %v699_v55  ;;  %v621_v56 = vpop.f32.mrf.mxu0 }
 0x187   :  { %v622_v57 = vadd.f32 %v1841_v61, %v621_v56  ;;  %v1545_v61 = vld [vmem:[%s2354_s2] ss:$0 sm:$0xff] }
 0x188   :  { %v1524_v58 = vpop.eup %1523  ;;  %v869_v59 = vadd.f32 %v868_v9, %v700_v53 }
 0x189   :  { %v1526_v60 = vpop.eup %1525  ;;  %1001 = vst [vmem:[%s2355_s3 + $0x1d8] sm:$0xff] %v1524_v58  ;;  %v791_v10 = vadd.f32 %v790_v8, %v622_v57 }
 0x18a   :  { %970 = vst [vmem:[%s2355_s3 + $0xe0] sm:$0xff] %v1526_v60  ;;  %1529 = vtanh.f32 %v869_v59 }
 0x18b   :  { %1531 = vtanh.f32 %v791_v10  ;;  %v800_v1 = vpop.f32.mrf.mxu1 }
 0x18c   :  { %v1528_v2 = vpop.eup %1527  ;;  %v801_v3 = vadd.f32 %v800_v1, %v632_v63 }
 0x18d   :  { %974 = vst [vmem:[%s2355_s3 + $0x100] sm:$0xff] %v1528_v2  ;;  %v701_v5 = vpop.f32.mrf.mxu2 }
 0x18e   :  { %1533 = vtanh.f32 %v801_v3  ;;  %v702_v24 = vadd.f32 %v1545_v61, %v701_v5  ;;  %v624_v54 = vpop.f32.mrf.mxu0 }
 0x18f   :  { %v625_v7 = vadd.f32 %v1545_v61, %v624_v54 }
 0x190   :  { %v1530_v11 = vpop.eup %1529  ;;  %v871_v40 = vadd.f32 %v870_v0, %v702_v24 }
 0x191   :  { %v1532_v14 = vpop.eup %1531  ;;  %1002 = vst [vmem:[%s2355_s3 + $0x1e0] sm:$0xff] %v1530_v11  ;;  %v794_v15 = vadd.f32 %v793_v32, %v625_v7 }
 0x192   :  { %971 = vst [vmem:[%s2355_s3 + $0xe8] sm:$0xff] %v1532_v14  ;;  %1535 = vtanh.f32 %v871_v40 }
 0x193   :  { %1537 = vtanh.f32 %v794_v15 }
 0x194   :  { %v1534_v35 = vpop.eup %1533 }
 0x195   :  { %975 = vst [vmem:[%s2355_s3 + $0x108] sm:$0xff] %v1534_v35  ;;  %v704_v16 = vpop.f32.mrf.mxu2 }
 0x196   :  { %v705_v17 = vadd.f32 %v1545_v61, %v704_v16  ;;  %v626_v12 = vpop.f32.mrf.mxu0 }
 0x197   :  { %v627_v6 = vadd.f32 %v1545_v61, %v626_v12 }
 0x198   :  { %v1536_v18 = vpop.eup %1535  ;;  %v874_v19 = vadd.f32 %v873_v4, %v705_v17 }
 0x199   :  { %v1538_v21 = vpop.eup %1537  ;;  %1003 = vst [vmem:[%s2355_s3 + $0x1e8] sm:$0xff] %v1536_v18  ;;  %v796_v8 = vadd.f32 %v795_v44, %v627_v6 }
 0x19a   :  { %972 = vst [vmem:[%s2355_s3 + $0xf0] sm:$0xff] %v1538_v21  ;;  %1539 = vtanh.f32 %v874_v19 }
 0x19b   :  { %1541 = vtanh.f32 %v796_v8 }
 0x19d   :  { %v706_v62 = vpop.f32.mrf.mxu2 }
 0x19e   :  { %v707_v20 = vadd.f32 %v1545_v61, %v706_v62 }
 0x1a0   :  { %v1540_v23 = vpop.eup %1539  ;;  %v876_v25 = vadd.f32 %v875_v22, %v707_v20 }
 0x1a1   :  { %v1542_v26 = vpop.eup %1541  ;;  %1004 = vst [vmem:[%s2355_s3 + $0x1f0] sm:$0xff] %v1540_v23 }
 0x1a2   :  { %973 = vst [vmem:[%s2355_s3 + $0xf8] sm:$0xff] %v1542_v26  ;;  %1543 = vtanh.f32 %v876_v25 }
 0x1a8   :  { %v1544_v28 = vpop.eup %1543 }
 0x1a9   :  { %1005 = vst [vmem:[%s2355_s3 + $0x1f8] sm:$0xff] %v1544_v28 }

</bundles_post_ra>
